<compile_context>
chip_gen: v7x
topology: tpu7x:2x2x1
jax: 0.10.0
libtpu: 0.0.40
codegen_flags: <defaults>
</compile_context>

<pallas_src>
import functools

import jax
import jax.numpy as jnp
from jax.experimental import pallas as pl
from jax.experimental.pallas import tpu as pltpu


_MM_DTYPE = jnp.bfloat16   # MXU operand dtype (f32 accumulation); jnp.float32 for exact f32
_N_LAYER_PARAMS = 14


# --------------------------------------------------------------------------------------
# Host-side operator construction (exact linear-algebra folding of the PyTorch module)
# --------------------------------------------------------------------------------------

def _bn_fold(gamma, beta, eps=1e-5):
    # eval-mode BatchNorm2d with running_mean=0, running_var=1 -> per-channel affine
    return gamma / jnp.sqrt(1.0 + eps), beta


def _dft_mats(F):
    """Real DFT matrices reproducing torch.fft.rfft / irfft (dim=-2, norm='ortho')."""
    K = F // 2 + 1
    h = jnp.arange(F, dtype=jnp.float32)
    k = jnp.arange(K, dtype=jnp.float32)
    inv = 1.0 / jnp.sqrt(jnp.float32(F))
    ang = 2.0 * jnp.pi * k[:, None] * h[None, :] / F
    rr = jnp.cos(ang) * inv                                    # (K, F) real part
    ri = -jnp.sin(ang) * inv                                   # (K, F) imag part
    c = jnp.where((k == 0) | (k == F // 2), 1.0, 2.0)          # Hermitian weights (even F)
    ang2 = 2.0 * jnp.pi * h[:, None] * k[None, :] / F
    icr = jnp.cos(ang2) * c[None, :] * inv                     # (F, K)
    ici = -jnp.sin(ang2) * c[None, :] * inv                    # (F, K)
    return rr, ri, icr, ici


def _split_conv_weight(w, gamma, beta):
    """De-interleave the FourierUnit 1x1 conv (2C,2C) [out,in] (channel order
    [c0_real, c0_imag, ...]) into block form [[Wrr,Wri],[Wir,Wii]] with the BN scale
    folded into the rows; returns (Wb (2C,2C), bias (2C,1)) for [reals; imags] ordering."""
    s, b = _bn_fold(gamma, beta)
    W_rr, W_ri = w[0::2, 0::2], w[0::2, 1::2]
    W_ir, W_ii = w[1::2, 0::2], w[1::2, 1::2]
    top = s[0::2][:, None] * jnp.concatenate([W_rr, W_ri], axis=1)
    bot = s[1::2][:, None] * jnp.concatenate([W_ir, W_ii], axis=1)
    Wb = jnp.concatenate([top, bot], axis=0)
    bv = jnp.concatenate([b[0::2], b[1::2]])[:, None]
    return Wb, bv


def _quadrant_select(H, W):
    """4 selection matrices (H*W, (H/2)*(W/2)) in torch LFU channel order [TL, BL, TR, BR]."""
    Hh, Wh = H // 2, W // 2
    mats = []
    for r0, c0 in ((0, 0), (Hh, 0), (0, Wh), (Hh, Wh)):
        rows = ((r0 + jnp.arange(Hh))[:, None] * W
                + (c0 + jnp.arange(Wh))[None, :]).reshape(-1)
        S = jnp.zeros((H * W, Hh * Wh), jnp.float32).at[rows, jnp.arange(Hh * Wh)].set(1.0)
        mats.append(S)
    return mats


def _tile2x2(H, W):
    """T ((H/2)*(W/2), H*W): flat 2x2 spatial tiling (torch .repeat(1,1,2,2))."""
    Hh, Wh = H // 2, W // 2
    h = jnp.arange(H)
    w = jnp.arange(W)
    rows = ((h % Hh)[:, None] * Wh + (w % Wh)[None, :]).reshape(-1)
    return jnp.zeros((Hh * Wh, H * W), jnp.float32).at[rows, jnp.arange(H * W)].set(1.0)


def _fu_ops(w_conv, gamma, beta, F, Wd):
    """Global FourierUnit folded into:  G = x @ R ; Y = relu(Wb @ [Gr;Gi] + bv) ;
    out = Yr @ C[:KW] + Yi @ C[KW:]   (x, out in flat (C, F*Wd) layout)."""
    rr, ri, icr, ici = _dft_mats(F)
    eye = jnp.eye(Wd, dtype=jnp.float32)
    R = jnp.concatenate([jnp.kron(rr.T, eye), jnp.kron(ri.T, eye)], axis=1)   # (F*Wd, 2K*Wd)
    Cm = jnp.concatenate([jnp.kron(icr.T, eye), jnp.kron(ici.T, eye)], axis=0)  # (2K*Wd, F*Wd)
    Wb, bv = _split_conv_weight(w_conv, gamma, beta)
    return R, Wb, bv, Cm


def _lfu_ops(w_conv, gamma, beta, H, W):
    """LFU FourierUnit with the 2x2 quadrant split folded into R (8 column blocks:
    TLr,BLr,TRr,BRr,TLi,BLi,TRi,BRi) and the 2x2 output tiling folded into C."""
    Hh, Wh = H // 2, W // 2
    rr, ri, icr, ici = _dft_mats(Hh)
    eye = jnp.eye(Wh, dtype=jnp.float32)
    Rr, Ri = jnp.kron(rr.T, eye), jnp.kron(ri.T, eye)          # (Hh*Wh, Kl*Wh)
    sel = _quadrant_select(H, W)
    R = jnp.concatenate([s @ Rr for s in sel] + [s @ Ri for s in sel], axis=1)  # (HW, 8*Kl*Wh)
    T = _tile2x2(H, W)
    Cm = jnp.concatenate([jnp.kron(icr.T, eye) @ T,
                          jnp.kron(ici.T, eye) @ T], axis=0)   # (2*Kl*Wh, HW)
    Wb, bv = _split_conv_weight(w_conv, gamma, beta)
    return R, Wb, bv, Cm


def _tap_masks(H, W, dil):
    """(9, H*W) 0/1 masks for the flat-shift im2col taps of a padding=dil 3x3 conv."""
    h = jnp.arange(H)[:, None]
    w = jnp.arange(W)[None, :]
    rows = []
    for kh in range(3):
        for kw in range(3):
            dh, dw = (kh - 1) * dil, (kw - 1) * dil
            m = (h + dh >= 0) & (h + dh < H) & (w + dw >= 0) & (w + dw < W)
            rows.append(m.reshape(H * W))
    return jnp.stack(rows, axis=0).astype(jnp.float32)


def pack_ffc_layer_params(tp, H, W):
    """Fold one FFC_BN_ACT layer's torch-style parameters into kernel operators."""
    cl, cg = tp["w_l2l"].shape[0], tp["w_l2g"].shape[0]
    cgh = tp["w_st1"].shape[0]
    C = cl + cg
    assert cgh % 4 == 0 and H % 4 == 0 and W % 2 == 0
    s_l, b_l = _bn_fold(tp["g_l"], tp["bt_l"])
    s_g, b_g = _bn_fold(tp["g_g"], tp["bt_g"])
    s_1, b_1 = _bn_fold(tp["g_st1"], tp["bt_st1"])
    # combined 3x3 operator: rows [0:cl] = bn_l-scaled (convl2l | convg2l),
    # rows [cl:] = bn_g-scaled (convl2g | 0); columns in tap-major order (kh*3+kw)*C + c
    w_top = jnp.concatenate([tp["w_l2l"], tp["w_g2l"]], axis=1) * s_l[:, None, None, None]
    w_bot = jnp.concatenate([tp["w_l2g"], jnp.zeros((cg, cg, 3, 3), jnp.float32)],
                            axis=1) * s_g[:, None, None, None]
    w_all = jnp.concatenate([w_top, w_bot], axis=0)                 # (C, C, 3, 3)
    w3 = jnp.transpose(w_all, (0, 2, 3, 1)).reshape(C, 9 * C)
    R_fu, Wb_fu, bv_fu, C_fu = _fu_ops(tp["w_fu"], tp["g_fu"], tp["bt_fu"], H, W)
    R_lfu, Wb_lfu, bv_lfu, C_lfu = _lfu_ops(tp["w_lfu"], tp["g_lfu"], tp["bt_lfu"], H, W)
    wdt = _MM_DTYPE
    return (w3.astype(wdt), b_l[:, None], b_g[:, None],
            (s_1[:, None] * tp["w_st1"]).astype(wdt), b_1[:, None],
            R_fu.astype(wdt), Wb_fu.astype(wdt), bv_fu, C_fu.astype(wdt),
            R_lfu.astype(wdt), Wb_lfu.astype(wdt), bv_lfu, C_lfu.astype(wdt),
            (s_g[:, None] * tp["w_st2"]).astype(wdt))


# --------------------------------------------------------------------------------------
# Fused Pallas kernel: whole FFCResnetBlock forward, one batch element per grid step
# --------------------------------------------------------------------------------------

def _ffc_resnet_block_kernel(*refs, cl, cg, H, W, dil, n_layer_params):
    C = cl + cg
    cgh = cg // 2
    HW = H * W
    KW = (H // 2 + 1) * W                   # global FU spectral width
    KWl = ((H // 2) // 2 + 1) * (W // 2)    # LFU spectral width
    f32 = jnp.float32

    xl_ref, xg_ref, mask_ref = refs[0], refs[1], refs[2]
    p1 = refs[3:3 + n_layer_params]
    p2 = refs[3 + n_layer_params:3 + 2 * n_layer_params]
    ol_ref, og_ref = refs[-2], refs[-1]

    masks = mask_ref[...]                                       # (9, HW), f32

    def mdot(a, b):
        return jnp.dot(a.astype(_MM_DTYPE), b.astype(_MM_DTYPE),
                       preferred_element_type=f32)

    def shift_cols(x, delta):
        # out[:, j] = x[:, j + delta]  (zero where j + delta runs off the array)
        if delta == 0:
            return x
        z = jnp.zeros((x.shape[0], abs(delta)), x.dtype)
        if delta > 0:
            return jnp.concatenate([x[:, delta:], z], axis=1)
        return jnp.concatenate([z, x[:, :delta]], axis=1)

    def ffc_bn_act(xl, xg, p):
        (w3, b_l, b_g, w_st1, b_st1,
         R_fu, Wb_fu, bv_fu, C_fu,
         R_lfu, Wb_lfu, bv_lfu, C_lfu, w_st2) = [r[...] for r in p]

        # --- convl2l + convg2l + convl2g: a single im2col-style matmul over 9 taps ---
        x_all = jnp.concatenate([xl, xg], axis=0)               # (C, HW)
        taps = []
        for kh in range(3):
            for kw in range(3):
                delta = ((kh - 1) * W + (kw - 1)) * dil
                t = kh * 3 + kw
                taps.append(shift_cols(x_all, delta) * masks[t:t + 1, :])
        patches = jnp.concatenate(taps, axis=0)                 # (9*C, HW)
        pre = mdot(w3, patches)                                 # (C, HW), BN scales folded
        y_l = jnp.maximum(pre[:cl] + b_l, 0.0)                  # act_l(bn_l(out_xl))
        g_loc = pre[cl:]                                        # bn_g-scaled convl2g(x_l)

        # --- SpectralTransform(x_g): conv1 1x1 + BN + ReLU ---
        x1 = jnp.maximum(mdot(w_st1, xg) + b_st1, 0.0)          # (cgh, HW)

        # global FourierUnit (rfft-H, 1x1 mix, BN, ReLU, irfft) as dense operators
        G = mdot(x1, R_fu)                                      # (cgh, 2*KW)
        Gs = jnp.concatenate([G[:, :KW], G[:, KW:]], axis=0)    # (2*cgh, KW) [reals; imags]
        Yf = jnp.maximum(mdot(Wb_fu, Gs) + bv_fu, 0.0)
        fu = mdot(Yf[:cgh], C_fu[:KW]) + mdot(Yf[cgh:], C_fu[KW:])     # (cgh, HW)

        # LFU: quadrant-stacked FourierUnit; selection + 2x2 tiling folded into R/C
        q = x1[:cgh // 4]                                       # (cgh//4, HW)
        Gl = mdot(q, R_lfu)                                     # (cgh//4, 8*KWl)
        Gls = jnp.concatenate([Gl[:, i * KWl:(i + 1) * KWl] for i in range(8)], axis=0)
        Yl = jnp.maximum(mdot(Wb_lfu, Gls) + bv_lfu, 0.0)       # (2*cgh, KWl)
        xs = mdot(Yl[:cgh], C_lfu[:KWl]) + mdot(Yl[cgh:], C_lfu[KWl:])  # (cgh, HW), tiled

        # conv2(x1 + fu + xs) + convl2g(x_l) -> bn_g -> ReLU
        y_g = jnp.maximum(mdot(w_st2, x1 + fu + xs) + g_loc + b_g, 0.0)
        return y_l, y_g

    xl0 = xl_ref[...]
    xg0 = xg_ref[...]
    y_l, y_g = ffc_bn_act(xl0, xg0, p1)
    y_l, y_g = ffc_bn_act(y_l, y_g, p2)
    ol_ref[...] = xl0 + y_l
    og_ref[...] = xg0 + y_g


def ffc_resnet_block(x_l, x_g, params, t_emb=None, *, dilation=1):
    """FFCResnetBlock.forward((x_l, x_g), t_emb), inline=False.  NCHW in / NCHW out."""
    assert t_emb is None  # TODO(synk): Dense_0 / act are undefined in the torch module.
    B, cl, H, W = x_l.shape
    cg = x_g.shape[1]
    assert (cg // 2) % 4 == 0 and H % 4 == 0 and W % 2 == 0
    HW = H * W
    p1, p2 = params["conv1"], params["conv2"]
    p_all = list(p1) + list(p2)
    masks = _tap_masks(H, W, dilation)

    kern = functools.partial(_ffc_resnet_block_kernel, cl=cl, cg=cg, H=H, W=W,
                             dil=dilation, n_layer_params=len(p1))

    def act_spec(c):
        return pl.BlockSpec((None, c, HW), lambda b: (b, 0, 0))

    def rep_spec(a):
        return pl.BlockSpec(a.shape, lambda b, n=a.ndim: (0,) * n)

    out_l, out_g = pl.pallas_call(
        kern,
        out_shape=(jax.ShapeDtypeStruct((B, cl, HW), jnp.float32),
                   jax.ShapeDtypeStruct((B, cg, HW), jnp.float32)),
        grid=(B,),
        in_specs=([act_spec(cl), act_spec(cg), rep_spec(masks)]
                  + [rep_spec(a) for a in p_all]),
        out_specs=(act_spec(cl), act_spec(cg)),
        compiler_params=pltpu.CompilerParams(dimension_semantics=("parallel",)),
    )(x_l.reshape(B, cl, HW).astype(jnp.float32),
      x_g.reshape(B, cg, HW).astype(jnp.float32),
      masks, *p_all)
    return out_l.reshape(B, cl, H, W), out_g.reshape(B, cg, H, W)


# --------------------------------------------------------------------------------------
# Deterministic synthetic torch-style parameters
# --------------------------------------------------------------------------------------

def init_ffc_layer_torch_params(key, dim, ratio):
    cl = dim - int(dim * ratio)
    cg = int(dim * ratio)
    cgh = cg // 2
    ks = jax.random.split(key, 17)
    wn = lambda k, shape: 0.1 * jax.random.normal(k, shape, jnp.float32)
    gm = lambda k, c: 1.0 + 0.1 * jax.random.normal(k, (c,), jnp.float32)
    bt = lambda k, c: 0.1 * jax.random.normal(k, (c,), jnp.float32)
    return dict(
        w_l2l=wn(ks[0], (cl, cl, 3, 3)),
        w_g2l=wn(ks[1], (cl, cg, 3, 3)),
        w_l2g=wn(ks[2], (cg, cl, 3, 3)),
        g_l=gm(ks[3], cl), bt_l=bt(ks[4], cl),
        g_g=gm(ks[5], cg), bt_g=bt(ks[6], cg),
        w_st1=wn(ks[7], (cgh, cg, 1, 1))[:, :, 0, 0],
        g_st1=gm(ks[8], cgh), bt_st1=bt(ks[9], cgh),
        w_fu=wn(ks[10], (2 * cgh, 2 * cgh, 1, 1))[:, :, 0, 0],
        g_fu=gm(ks[11], 2 * cgh), bt_fu=bt(ks[12], 2 * cgh),
        w_lfu=wn(ks[13], (2 * cgh, 2 * cgh, 1, 1))[:, :, 0, 0],
        g_lfu=gm(ks[14], 2 * cgh), bt_lfu=bt(ks[15], 2 * cgh),
        w_st2=wn(ks[16], (cg, cgh, 1, 1))[:, :, 0, 0],
    )


if __name__ == "__main__":
    key = jax.random.PRNGKey(0)
    dim, B, H, W = 16, 2, 16, 16              # ratio_gin = ratio_gout = 0.5, dilation = 1
    cg = int(dim * 0.5)
    cl = dim - cg

    k_par, k_xl, k_xg = jax.random.split(key, 3)
    k1, k2 = jax.random.split(k_par)
    params = {
        "conv1": pack_ffc_layer_params(init_ffc_layer_torch_params(k1, dim, 0.5), H, W),
        "conv2": pack_ffc_layer_params(init_ffc_layer_torch_params(k2, dim, 0.5), H, W),
    }

    x_l = jax.random.normal(k_xl, (B, cl, H, W), jnp.float32)   # NCHW interface
    x_g = jax.random.normal(k_xg, (B, cg, H, W), jnp.float32)

    fwd = jax.jit(ffc_resnet_block)
    out_l, out_g = fwd(x_l, x_g, params)
    jax.block_until_ready((out_l, out_g))

    assert out_l.shape == (B, cl, H, W) and out_g.shape == (B, cg, H, W)
    assert bool(jnp.all(jnp.isfinite(out_l))) and bool(jnp.all(jnp.isfinite(out_g)))
    print("KERNEL_OK")
</pallas_src>

<mosaic_0001>
module attributes {stable_mosaic.version = 11 : i64} {
  func.func @_ffc_resnet_block_kernel(%arg0: i32, %arg1: memref<1x8x256xf32, #tpu.memory_space<vmem>>, %arg2: memref<1x8x256xf32, #tpu.memory_space<vmem>>, %arg3: memref<9x256xf32, #tpu.memory_space<vmem>>, %arg4: memref<16x144xbf16, #tpu.memory_space<vmem>>, %arg5: memref<8x1xf32, #tpu.memory_space<vmem>>, %arg6: memref<8x1xf32, #tpu.memory_space<vmem>>, %arg7: memref<4x8xbf16, #tpu.memory_space<vmem>>, %arg8: memref<4x1xf32, #tpu.memory_space<vmem>>, %arg9: memref<256x288xbf16, #tpu.memory_space<vmem>>, %arg10: memref<8x8xbf16, #tpu.memory_space<vmem>>, %arg11: memref<8x1xf32, #tpu.memory_space<vmem>>, %arg12: memref<288x256xbf16, #tpu.memory_space<vmem>>, %arg13: memref<256x320xbf16, #tpu.memory_space<vmem>>, %arg14: memref<8x8xbf16, #tpu.memory_space<vmem>>, %arg15: memref<8x1xf32, #tpu.memory_space<vmem>>, %arg16: memref<80x256xbf16, #tpu.memory_space<vmem>>, %arg17: memref<8x4xbf16, #tpu.memory_space<vmem>>, %arg18: memref<16x144xbf16, #tpu.memory_space<vmem>>, %arg19: memref<8x1xf32, #tpu.memory_space<vmem>>, %arg20: memref<8x1xf32, #tpu.memory_space<vmem>>, %arg21: memref<4x8xbf16, #tpu.memory_space<vmem>>, %arg22: memref<4x1xf32, #tpu.memory_space<vmem>>, %arg23: memref<256x288xbf16, #tpu.memory_space<vmem>>, %arg24: memref<8x8xbf16, #tpu.memory_space<vmem>>, %arg25: memref<8x1xf32, #tpu.memory_space<vmem>>, %arg26: memref<288x256xbf16, #tpu.memory_space<vmem>>, %arg27: memref<256x320xbf16, #tpu.memory_space<vmem>>, %arg28: memref<8x8xbf16, #tpu.memory_space<vmem>>, %arg29: memref<8x1xf32, #tpu.memory_space<vmem>>, %arg30: memref<80x256xbf16, #tpu.memory_space<vmem>>, %arg31: memref<8x4xbf16, #tpu.memory_space<vmem>>, %arg32: memref<1x8x256xf32, #tpu.memory_space<vmem>>, %arg33: memref<1x8x256xf32, #tpu.memory_space<vmem>>) attributes {dimension_semantics = [#tpu.dimension_semantics<parallel>], iteration_bounds = array<i64: 2>, scalar_prefetch = 0 : i64, scratch_operands = 0 : i64, tpu.core_type = #tpu.core_type<tc>, window_params = [{transform_indices = @transform_0, window_bounds = array<i64: 1, 8, 256>}, {transform_indices = @transform_1, window_bounds = array<i64: 1, 8, 256>}, {pipeline_mode = #tpu.pipeline_mode<synchronous>, transform_indices = @transform_2, window_bounds = array<i64: 9, 256>}, {pipeline_mode = #tpu.pipeline_mode<synchronous>, transform_indices = @transform_3, window_bounds = array<i64: 16, 144>}, {pipeline_mode = #tpu.pipeline_mode<synchronous>, transform_indices = @transform_4, window_bounds = array<i64: 8, 1>}, {pipeline_mode = #tpu.pipeline_mode<synchronous>, transform_indices = @transform_5, window_bounds = array<i64: 8, 1>}, {pipeline_mode = #tpu.pipeline_mode<synchronous>, transform_indices = @transform_6, window_bounds = array<i64: 4, 8>}, {pipeline_mode = #tpu.pipeline_mode<synchronous>, transform_indices = @transform_7, window_bounds = array<i64: 4, 1>}, {pipeline_mode = #tpu.pipeline_mode<synchronous>, transform_indices = @transform_8, window_bounds = array<i64: 256, 288>}, {pipeline_mode = #tpu.pipeline_mode<synchronous>, transform_indices = @transform_9, window_bounds = array<i64: 8, 8>}, {pipeline_mode = #tpu.pipeline_mode<synchronous>, transform_indices = @transform_10, window_bounds = array<i64: 8, 1>}, {pipeline_mode = #tpu.pipeline_mode<synchronous>, transform_indices = @transform_11, window_bounds = array<i64: 288, 256>}, {pipeline_mode = #tpu.pipeline_mode<synchronous>, transform_indices = @transform_12, window_bounds = array<i64: 256, 320>}, {pipeline_mode = #tpu.pipeline_mode<synchronous>, transform_indices = @transform_13, window_bounds = array<i64: 8, 8>}, {pipeline_mode = #tpu.pipeline_mode<synchronous>, transform_indices = @transform_14, window_bounds = array<i64: 8, 1>}, {pipeline_mode = #tpu.pipeline_mode<synchronous>, transform_indices = @transform_15, window_bounds = array<i64: 80, 256>}, {pipeline_mode = #tpu.pipeline_mode<synchronous>, transform_indices = @transform_16, window_bounds = array<i64: 8, 4>}, {pipeline_mode = #tpu.pipeline_mode<synchronous>, transform_indices = @transform_17, window_bounds = array<i64: 16, 144>}, {pipeline_mode = #tpu.pipeline_mode<synchronous>, transform_indices = @transform_18, window_bounds = array<i64: 8, 1>}, {pipeline_mode = #tpu.pipeline_mode<synchronous>, transform_indices = @transform_19, window_bounds = array<i64: 8, 1>}, {pipeline_mode = #tpu.pipeline_mode<synchronous>, transform_indices = @transform_20, window_bounds = array<i64: 4, 8>}, {pipeline_mode = #tpu.pipeline_mode<synchronous>, transform_indices = @transform_21, window_bounds = array<i64: 4, 1>}, {pipeline_mode = #tpu.pipeline_mode<synchronous>, transform_indices = @transform_22, window_bounds = array<i64: 256, 288>}, {pipeline_mode = #tpu.pipeline_mode<synchronous>, transform_indices = @transform_23, window_bounds = array<i64: 8, 8>}, {pipeline_mode = #tpu.pipeline_mode<synchronous>, transform_indices = @transform_24, window_bounds = array<i64: 8, 1>}, {pipeline_mode = #tpu.pipeline_mode<synchronous>, transform_indices = @transform_25, window_bounds = array<i64: 288, 256>}, {pipeline_mode = #tpu.pipeline_mode<synchronous>, transform_indices = @transform_26, window_bounds = array<i64: 256, 320>}, {pipeline_mode = #tpu.pipeline_mode<synchronous>, transform_indices = @transform_27, window_bounds = array<i64: 8, 8>}, {pipeline_mode = #tpu.pipeline_mode<synchronous>, transform_indices = @transform_28, window_bounds = array<i64: 8, 1>}, {pipeline_mode = #tpu.pipeline_mode<synchronous>, transform_indices = @transform_29, window_bounds = array<i64: 80, 256>}, {pipeline_mode = #tpu.pipeline_mode<synchronous>, transform_indices = @transform_30, window_bounds = array<i64: 8, 4>}, {transform_indices = @transform_31, window_bounds = array<i64: 1, 8, 256>}, {transform_indices = @transform_32, window_bounds = array<i64: 1, 8, 256>}]} {
    %c0 = arith.constant 0 : index
    %c0_0 = arith.constant 0 : index
    %0 = vector.load %arg3[%c0, %c0_0] : memref<9x256xf32, #tpu.memory_space<vmem>>, vector<9x256xf32>
    %c0_1 = arith.constant 0 : index
    %c0_2 = arith.constant 0 : index
    %c0_3 = arith.constant 0 : index
    %1 = vector.load %arg1[%c0_1, %c0_2, %c0_3] : memref<1x8x256xf32, #tpu.memory_space<vmem>>, vector<1x8x256xf32>
    %2 = vector.shape_cast %1 : vector<1x8x256xf32> to vector<8x256xf32>
    %c0_4 = arith.constant 0 : index
    %c0_5 = arith.constant 0 : index
    %c0_6 = arith.constant 0 : index
    %3 = vector.load %arg2[%c0_4, %c0_5, %c0_6] : memref<1x8x256xf32, #tpu.memory_space<vmem>>, vector<1x8x256xf32>
    %4 = vector.shape_cast %3 : vector<1x8x256xf32> to vector<8x256xf32>
    %c0_7 = arith.constant 0 : index
    %c0_8 = arith.constant 0 : index
    %5 = vector.load %arg4[%c0_7, %c0_8] : memref<16x144xbf16, #tpu.memory_space<vmem>>, vector<16x144xbf16>
    %c0_9 = arith.constant 0 : index
    %c0_10 = arith.constant 0 : index
    %6 = vector.load %arg5[%c0_9, %c0_10] : memref<8x1xf32, #tpu.memory_space<vmem>>, vector<8x1xf32>
    %c0_11 = arith.constant 0 : index
    %c0_12 = arith.constant 0 : index
    %7 = vector.load %arg6[%c0_11, %c0_12] : memref<8x1xf32, #tpu.memory_space<vmem>>, vector<8x1xf32>
    %c0_13 = arith.constant 0 : index
    %c0_14 = arith.constant 0 : index
    %8 = vector.load %arg7[%c0_13, %c0_14] : memref<4x8xbf16, #tpu.memory_space<vmem>>, vector<4x8xbf16>
    %c0_15 = arith.constant 0 : index
    %c0_16 = arith.constant 0 : index
    %9 = vector.load %arg8[%c0_15, %c0_16] : memref<4x1xf32, #tpu.memory_space<vmem>>, vector<4x1xf32>
    %c0_17 = arith.constant 0 : index
    %c0_18 = arith.constant 0 : index
    %10 = vector.load %arg9[%c0_17, %c0_18] : memref<256x288xbf16, #tpu.memory_space<vmem>>, vector<256x288xbf16>
    %c0_19 = arith.constant 0 : index
    %c0_20 = arith.constant 0 : index
    %11 = vector.load %arg10[%c0_19, %c0_20] : memref<8x8xbf16, #tpu.memory_space<vmem>>, vector<8x8xbf16>
    %c0_21 = arith.constant 0 : index
    %c0_22 = arith.constant 0 : index
    %12 = vector.load %arg11[%c0_21, %c0_22] : memref<8x1xf32, #tpu.memory_space<vmem>>, vector<8x1xf32>
    %c0_23 = arith.constant 0 : index
    %c0_24 = arith.constant 0 : index
    %13 = vector.load %arg12[%c0_23, %c0_24] : memref<288x256xbf16, #tpu.memory_space<vmem>>, vector<288x256xbf16>
    %c0_25 = arith.constant 0 : index
    %c0_26 = arith.constant 0 : index
    %14 = vector.load %arg13[%c0_25, %c0_26] : memref<256x320xbf16, #tpu.memory_space<vmem>>, vector<256x320xbf16>
    %c0_27 = arith.constant 0 : index
    %c0_28 = arith.constant 0 : index
    %15 = vector.load %arg14[%c0_27, %c0_28] : memref<8x8xbf16, #tpu.memory_space<vmem>>, vector<8x8xbf16>
    %c0_29 = arith.constant 0 : index
    %c0_30 = arith.constant 0 : index
    %16 = vector.load %arg15[%c0_29, %c0_30] : memref<8x1xf32, #tpu.memory_space<vmem>>, vector<8x1xf32>
    %c0_31 = arith.constant 0 : index
    %c0_32 = arith.constant 0 : index
    %17 = vector.load %arg16[%c0_31, %c0_32] : memref<80x256xbf16, #tpu.memory_space<vmem>>, vector<80x256xbf16>
    %c0_33 = arith.constant 0 : index
    %c0_34 = arith.constant 0 : index
    %18 = vector.load %arg17[%c0_33, %c0_34] : memref<8x4xbf16, #tpu.memory_space<vmem>>, vector<8x4xbf16>
    %19 = tpu.concatenate %2, %4 in 0 : vector<8x256xf32>, vector<8x256xf32> -> vector<16x256xf32>
    %cst = arith.constant 0.000000e+00 : f32
    %20 = vector.broadcast %cst : f32 to vector<16x17xf32>
    %21 = vector.extract_strided_slice %19 {offsets = [0, 0], sizes = [16, 239], strides = [1, 1]} : vector<16x256xf32> to vector<16x239xf32>
    %22 = tpu.concatenate %20, %21 in 1 : vector<16x17xf32>, vector<16x239xf32> -> vector<16x256xf32>
    %23 = vector.extract_strided_slice %0 {offsets = [0, 0], sizes = [1, 256], strides = [1, 1]} : vector<9x256xf32> to vector<1x256xf32>
    %24 = vector.broadcast %23 : vector<1x256xf32> to vector<16x256xf32>
    %25 = arith.mulf %22, %24 : vector<16x256xf32>
    %cst_35 = arith.constant 0.000000e+00 : f32
    %26 = vector.broadcast %cst_35 : f32 to vector<16x16xf32>
    %27 = vector.extract_strided_slice %19 {offsets = [0, 0], sizes = [16, 240], strides = [1, 1]} : vector<16x256xf32> to vector<16x240xf32>
    %28 = tpu.concatenate %26, %27 in 1 : vector<16x16xf32>, vector<16x240xf32> -> vector<16x256xf32>
    %29 = vector.extract_strided_slice %0 {offsets = [1, 0], sizes = [1, 256], strides = [1, 1]} : vector<9x256xf32> to vector<1x256xf32>
    %30 = vector.broadcast %29 : vector<1x256xf32> to vector<16x256xf32>
    %31 = arith.mulf %28, %30 : vector<16x256xf32>
    %cst_36 = arith.constant 0.000000e+00 : f32
    %32 = vector.broadcast %cst_36 : f32 to vector<16x15xf32>
    %33 = vector.extract_strided_slice %19 {offsets = [0, 0], sizes = [16, 241], strides = [1, 1]} : vector<16x256xf32> to vector<16x241xf32>
    %34 = tpu.concatenate %32, %33 in 1 : vector<16x15xf32>, vector<16x241xf32> -> vector<16x256xf32>
    %35 = vector.extract_strided_slice %0 {offsets = [2, 0], sizes = [1, 256], strides = [1, 1]} : vector<9x256xf32> to vector<1x256xf32>
    %36 = vector.broadcast %35 : vector<1x256xf32> to vector<16x256xf32>
    %37 = arith.mulf %34, %36 : vector<16x256xf32>
    %cst_37 = arith.constant 0.000000e+00 : f32
    %38 = vector.broadcast %cst_37 : f32 to vector<16x1xf32>
    %39 = vector.extract_strided_slice %19 {offsets = [0, 0], sizes = [16, 255], strides = [1, 1]} : vector<16x256xf32> to vector<16x255xf32>
    %40 = tpu.concatenate %38, %39 in 1 : vector<16x1xf32>, vector<16x255xf32> -> vector<16x256xf32>
    %41 = vector.extract_strided_slice %0 {offsets = [3, 0], sizes = [1, 256], strides = [1, 1]} : vector<9x256xf32> to vector<1x256xf32>
    %42 = vector.broadcast %41 : vector<1x256xf32> to vector<16x256xf32>
    %43 = arith.mulf %40, %42 : vector<16x256xf32>
    %44 = vector.extract_strided_slice %0 {offsets = [4, 0], sizes = [1, 256], strides = [1, 1]} : vector<9x256xf32> to vector<1x256xf32>
    %45 = vector.broadcast %44 : vector<1x256xf32> to vector<16x256xf32>
    %46 = arith.mulf %19, %45 : vector<16x256xf32>
    %cst_38 = arith.constant 0.000000e+00 : f32
    %47 = vector.broadcast %cst_38 : f32 to vector<16x1xf32>
    %48 = vector.extract_strided_slice %19 {offsets = [0, 1], sizes = [16, 255], strides = [1, 1]} : vector<16x256xf32> to vector<16x255xf32>
    %49 = tpu.concatenate %48, %47 in 1 : vector<16x255xf32>, vector<16x1xf32> -> vector<16x256xf32>
    %50 = vector.extract_strided_slice %0 {offsets = [5, 0], sizes = [1, 256], strides = [1, 1]} : vector<9x256xf32> to vector<1x256xf32>
    %51 = vector.broadcast %50 : vector<1x256xf32> to vector<16x256xf32>
    %52 = arith.mulf %49, %51 : vector<16x256xf32>
    %cst_39 = arith.constant 0.000000e+00 : f32
    %53 = vector.broadcast %cst_39 : f32 to vector<16x15xf32>
    %54 = vector.extract_strided_slice %19 {offsets = [0, 15], sizes = [16, 241], strides = [1, 1]} : vector<16x256xf32> to vector<16x241xf32>
    %55 = tpu.concatenate %54, %53 in 1 : vector<16x241xf32>, vector<16x15xf32> -> vector<16x256xf32>
    %56 = vector.extract_strided_slice %0 {offsets = [6, 0], sizes = [1, 256], strides = [1, 1]} : vector<9x256xf32> to vector<1x256xf32>
    %57 = vector.broadcast %56 : vector<1x256xf32> to vector<16x256xf32>
    %58 = arith.mulf %55, %57 : vector<16x256xf32>
    %cst_40 = arith.constant 0.000000e+00 : f32
    %59 = vector.broadcast %cst_40 : f32 to vector<16x16xf32>
    %60 = vector.extract_strided_slice %19 {offsets = [0, 16], sizes = [16, 240], strides = [1, 1]} : vector<16x256xf32> to vector<16x240xf32>
    %61 = tpu.concatenate %60, %59 in 1 : vector<16x240xf32>, vector<16x16xf32> -> vector<16x256xf32>
    %62 = vector.extract_strided_slice %0 {offsets = [7, 0], sizes = [1, 256], strides = [1, 1]} : vector<9x256xf32> to vector<1x256xf32>
    %63 = vector.broadcast %62 : vector<1x256xf32> to vector<16x256xf32>
    %64 = arith.mulf %61, %63 : vector<16x256xf32>
    %cst_41 = arith.constant 0.000000e+00 : f32
    %65 = vector.broadcast %cst_41 : f32 to vector<16x17xf32>
    %66 = vector.extract_strided_slice %19 {offsets = [0, 17], sizes = [16, 239], strides = [1, 1]} : vector<16x256xf32> to vector<16x239xf32>
    %67 = tpu.concatenate %66, %65 in 1 : vector<16x239xf32>, vector<16x17xf32> -> vector<16x256xf32>
    %68 = vector.extract_strided_slice %0 {offsets = [8, 0], sizes = [1, 256], strides = [1, 1]} : vector<9x256xf32> to vector<1x256xf32>
    %69 = vector.broadcast %68 : vector<1x256xf32> to vector<16x256xf32>
    %70 = arith.mulf %67, %69 : vector<16x256xf32>
    %71 = tpu.concatenate %25, %31, %37, %43, %46, %52, %58, %64, %70 in 0 : vector<16x256xf32>, vector<16x256xf32>, vector<16x256xf32>, vector<16x256xf32>, vector<16x256xf32>, vector<16x256xf32>, vector<16x256xf32>, vector<16x256xf32>, vector<16x256xf32> -> vector<144x256xf32>
    %72 = arith.truncf %71 : vector<144x256xf32> to vector<144x256xbf16>
    %cst_42 = arith.constant dense<0.000000e+00> : vector<16x256xf32>
    %73 = tpu.matmul %5, %72, %cst_42 {dimension_numbers = #tpu.dot_dimension_numbers<[1], [0], [0], [1], [0, 0, 1, 1], [], []>} : vector<16x144xbf16>, vector<144x256xbf16>, vector<16x256xf32> -> vector<16x256xf32>
    %74 = vector.extract_strided_slice %73 {offsets = [0, 0], sizes = [8, 256], strides = [1, 1]} : vector<16x256xf32> to vector<8x256xf32>
    %75 = vector.broadcast %6 : vector<8x1xf32> to vector<8x256xf32>
    %76 = arith.addf %74, %75 : vector<8x256xf32>
    %cst_43 = arith.constant 0.000000e+00 : f32
    %77 = vector.broadcast %cst_43 : f32 to vector<8x256xf32>
    %78 = arith.maximumf %76, %77 : vector<8x256xf32>
    %79 = vector.extract_strided_slice %73 {offsets = [8, 0], sizes = [8, 256], strides = [1, 1]} : vector<16x256xf32> to vector<8x256xf32>
    %80 = arith.truncf %4 : vector<8x256xf32> to vector<8x256xbf16>
    %cst_44 = arith.constant dense<0.000000e+00> : vector<4x256xf32>
    %81 = tpu.matmul %8, %80, %cst_44 {dimension_numbers = #tpu.dot_dimension_numbers<[1], [0], [0], [1], [0, 0, 1, 1], [], []>} : vector<4x8xbf16>, vector<8x256xbf16>, vector<4x256xf32> -> vector<4x256xf32>
    %82 = vector.broadcast %9 : vector<4x1xf32> to vector<4x256xf32>
    %83 = arith.addf %81, %82 : vector<4x256xf32>
    %cst_45 = arith.constant 0.000000e+00 : f32
    %84 = vector.broadcast %cst_45 : f32 to vector<4x256xf32>
    %85 = arith.maximumf %83, %84 : vector<4x256xf32>
    %86 = arith.truncf %85 : vector<4x256xf32> to vector<4x256xbf16>
    %cst_46 = arith.constant dense<0.000000e+00> : vector<4x288xf32>
    %87 = tpu.matmul %86, %10, %cst_46 {dimension_numbers = #tpu.dot_dimension_numbers<[1], [0], [0], [1], [0, 0, 1, 1], [], []>} : vector<4x256xbf16>, vector<256x288xbf16>, vector<4x288xf32> -> vector<4x288xf32>
    %88 = vector.extract_strided_slice %87 {offsets = [0, 0], sizes = [4, 144], strides = [1, 1]} : vector<4x288xf32> to vector<4x144xf32>
    %89 = vector.extract_strided_slice %87 {offsets = [0, 144], sizes = [4, 144], strides = [1, 1]} : vector<4x288xf32> to vector<4x144xf32>
    %90 = tpu.concatenate %88, %89 in 0 : vector<4x144xf32>, vector<4x144xf32> -> vector<8x144xf32>
    %91 = arith.truncf %90 : vector<8x144xf32> to vector<8x144xbf16>
    %cst_47 = arith.constant dense<0.000000e+00> : vector<8x144xf32>
    %92 = tpu.matmul %11, %91, %cst_47 {dimension_numbers = #tpu.dot_dimension_numbers<[1], [0], [0], [1], [0, 0, 1, 1], [], []>} : vector<8x8xbf16>, vector<8x144xbf16>, vector<8x144xf32> -> vector<8x144xf32>
    %93 = vector.broadcast %12 : vector<8x1xf32> to vector<8x144xf32>
    %94 = arith.addf %92, %93 : vector<8x144xf32>
    %cst_48 = arith.constant 0.000000e+00 : f32
    %95 = vector.broadcast %cst_48 : f32 to vector<8x144xf32>
    %96 = arith.maximumf %94, %95 : vector<8x144xf32>
    %97 = vector.extract_strided_slice %96 {offsets = [0, 0], sizes = [4, 144], strides = [1, 1]} : vector<8x144xf32> to vector<4x144xf32>
    %98 = vector.extract_strided_slice %13 {offsets = [0, 0], sizes = [144, 256], strides = [1, 1]} : vector<288x256xbf16> to vector<144x256xbf16>
    %99 = arith.truncf %97 : vector<4x144xf32> to vector<4x144xbf16>
    %cst_49 = arith.constant dense<0.000000e+00> : vector<4x256xf32>
    %100 = tpu.matmul %99, %98, %cst_49 {dimension_numbers = #tpu.dot_dimension_numbers<[1], [0], [0], [1], [0, 0, 1, 1], [], []>} : vector<4x144xbf16>, vector<144x256xbf16>, vector<4x256xf32> -> vector<4x256xf32>
    %101 = vector.extract_strided_slice %96 {offsets = [4, 0], sizes = [4, 144], strides = [1, 1]} : vector<8x144xf32> to vector<4x144xf32>
    %102 = vector.extract_strided_slice %13 {offsets = [144, 0], sizes = [144, 256], strides = [1, 1]} : vector<288x256xbf16> to vector<144x256xbf16>
    %103 = arith.truncf %101 : vector<4x144xf32> to vector<4x144xbf16>
    %cst_50 = arith.constant dense<0.000000e+00> : vector<4x256xf32>
    %104 = tpu.matmul %103, %102, %cst_50 {dimension_numbers = #tpu.dot_dimension_numbers<[1], [0], [0], [1], [0, 0, 1, 1], [], []>} : vector<4x144xbf16>, vector<144x256xbf16>, vector<4x256xf32> -> vector<4x256xf32>
    %105 = arith.addf %100, %104 : vector<4x256xf32>
    %106 = vector.extract_strided_slice %85 {offsets = [0, 0], sizes = [1, 256], strides = [1, 1]} : vector<4x256xf32> to vector<1x256xf32>
    %107 = arith.truncf %106 : vector<1x256xf32> to vector<1x256xbf16>
    %cst_51 = arith.constant dense<0.000000e+00> : vector<1x320xf32>
    %108 = tpu.matmul %107, %14, %cst_51 {dimension_numbers = #tpu.dot_dimension_numbers<[1], [0], [0], [1], [0, 0, 1, 1], [], []>} : vector<1x256xbf16>, vector<256x320xbf16>, vector<1x320xf32> -> vector<1x320xf32>
    %109 = vector.extract_strided_slice %108 {offsets = [0, 0], sizes = [1, 40], strides = [1, 1]} : vector<1x320xf32> to vector<1x40xf32>
    %110 = vector.extract_strided_slice %108 {offsets = [0, 40], sizes = [1, 40], strides = [1, 1]} : vector<1x320xf32> to vector<1x40xf32>
    %111 = vector.extract_strided_slice %108 {offsets = [0, 80], sizes = [1, 40], strides = [1, 1]} : vector<1x320xf32> to vector<1x40xf32>
    %112 = vector.extract_strided_slice %108 {offsets = [0, 120], sizes = [1, 40], strides = [1, 1]} : vector<1x320xf32> to vector<1x40xf32>
    %113 = vector.extract_strided_slice %108 {offsets = [0, 160], sizes = [1, 40], strides = [1, 1]} : vector<1x320xf32> to vector<1x40xf32>
    %114 = vector.extract_strided_slice %108 {offsets = [0, 200], sizes = [1, 40], strides = [1, 1]} : vector<1x320xf32> to vector<1x40xf32>
    %115 = vector.extract_strided_slice %108 {offsets = [0, 240], sizes = [1, 40], strides = [1, 1]} : vector<1x320xf32> to vector<1x40xf32>
    %116 = vector.extract_strided_slice %108 {offsets = [0, 280], sizes = [1, 40], strides = [1, 1]} : vector<1x320xf32> to vector<1x40xf32>
    %117 = tpu.concatenate %109, %110, %111, %112, %113, %114, %115, %116 in 0 : vector<1x40xf32>, vector<1x40xf32>, vector<1x40xf32>, vector<1x40xf32>, vector<1x40xf32>, vector<1x40xf32>, vector<1x40xf32>, vector<1x40xf32> -> vector<8x40xf32>
    %118 = arith.truncf %117 : vector<8x40xf32> to vector<8x40xbf16>
    %cst_52 = arith.constant dense<0.000000e+00> : vector<8x40xf32>
    %119 = tpu.matmul %15, %118, %cst_52 {dimension_numbers = #tpu.dot_dimension_numbers<[1], [0], [0], [1], [0, 0, 1, 1], [], []>} : vector<8x8xbf16>, vector<8x40xbf16>, vector<8x40xf32> -> vector<8x40xf32>
    %120 = vector.broadcast %16 : vector<8x1xf32> to vector<8x40xf32>
    %121 = arith.addf %119, %120 : vector<8x40xf32>
    %cst_53 = arith.constant 0.000000e+00 : f32
    %122 = vector.broadcast %cst_53 : f32 to vector<8x40xf32>
    %123 = arith.maximumf %121, %122 : vector<8x40xf32>
    %124 = vector.extract_strided_slice %123 {offsets = [0, 0], sizes = [4, 40], strides = [1, 1]} : vector<8x40xf32> to vector<4x40xf32>
    %125 = vector.extract_strided_slice %17 {offsets = [0, 0], sizes = [40, 256], strides = [1, 1]} : vector<80x256xbf16> to vector<40x256xbf16>
    %126 = arith.truncf %124 : vector<4x40xf32> to vector<4x40xbf16>
    %cst_54 = arith.constant dense<0.000000e+00> : vector<4x256xf32>
    %127 = tpu.matmul %126, %125, %cst_54 {dimension_numbers = #tpu.dot_dimension_numbers<[1], [0], [0], [1], [0, 0, 1, 1], [], []>} : vector<4x40xbf16>, vector<40x256xbf16>, vector<4x256xf32> -> vector<4x256xf32>
    %128 = vector.extract_strided_slice %123 {offsets = [4, 0], sizes = [4, 40], strides = [1, 1]} : vector<8x40xf32> to vector<4x40xf32>
    %129 = vector.extract_strided_slice %17 {offsets = [40, 0], sizes = [40, 256], strides = [1, 1]} : vector<80x256xbf16> to vector<40x256xbf16>
    %130 = arith.truncf %128 : vector<4x40xf32> to vector<4x40xbf16>
    %cst_55 = arith.constant dense<0.000000e+00> : vector<4x256xf32>
    %131 = tpu.matmul %130, %129, %cst_55 {dimension_numbers = #tpu.dot_dimension_numbers<[1], [0], [0], [1], [0, 0, 1, 1], [], []>} : vector<4x40xbf16>, vector<40x256xbf16>, vector<4x256xf32> -> vector<4x256xf32>
    %132 = arith.addf %127, %131 : vector<4x256xf32>
    %133 = arith.addf %85, %105 : vector<4x256xf32>
    %134 = arith.addf %133, %132 : vector<4x256xf32>
    %135 = arith.truncf %134 : vector<4x256xf32> to vector<4x256xbf16>
    %cst_56 = arith.constant dense<0.000000e+00> : vector<8x256xf32>
    %136 = tpu.matmul %18, %135, %cst_56 {dimension_numbers = #tpu.dot_dimension_numbers<[1], [0], [0], [1], [0, 0, 1, 1], [], []>} : vector<8x4xbf16>, vector<4x256xbf16>, vector<8x256xf32> -> vector<8x256xf32>
    %137 = arith.addf %136, %79 : vector<8x256xf32>
    %138 = vector.broadcast %7 : vector<8x1xf32> to vector<8x256xf32>
    %139 = arith.addf %137, %138 : vector<8x256xf32>
    %cst_57 = arith.constant 0.000000e+00 : f32
    %140 = vector.broadcast %cst_57 : f32 to vector<8x256xf32>
    %141 = arith.maximumf %139, %140 : vector<8x256xf32>
    %c0_58 = arith.constant 0 : index
    %c0_59 = arith.constant 0 : index
    %142 = vector.load %arg18[%c0_58, %c0_59] : memref<16x144xbf16, #tpu.memory_space<vmem>>, vector<16x144xbf16>
    %c0_60 = arith.constant 0 : index
    %c0_61 = arith.constant 0 : index
    %143 = vector.load %arg19[%c0_60, %c0_61] : memref<8x1xf32, #tpu.memory_space<vmem>>, vector<8x1xf32>
    %c0_62 = arith.constant 0 : index
    %c0_63 = arith.constant 0 : index
    %144 = vector.load %arg20[%c0_62, %c0_63] : memref<8x1xf32, #tpu.memory_space<vmem>>, vector<8x1xf32>
    %c0_64 = arith.constant 0 : index
    %c0_65 = arith.constant 0 : index
    %145 = vector.load %arg21[%c0_64, %c0_65] : memref<4x8xbf16, #tpu.memory_space<vmem>>, vector<4x8xbf16>
    %c0_66 = arith.constant 0 : index
    %c0_67 = arith.constant 0 : index
    %146 = vector.load %arg22[%c0_66, %c0_67] : memref<4x1xf32, #tpu.memory_space<vmem>>, vector<4x1xf32>
    %c0_68 = arith.constant 0 : index
    %c0_69 = arith.constant 0 : index
    %147 = vector.load %arg23[%c0_68, %c0_69] : memref<256x288xbf16, #tpu.memory_space<vmem>>, vector<256x288xbf16>
    %c0_70 = arith.constant 0 : index
    %c0_71 = arith.constant 0 : index
    %148 = vector.load %arg24[%c0_70, %c0_71] : memref<8x8xbf16, #tpu.memory_space<vmem>>, vector<8x8xbf16>
    %c0_72 = arith.constant 0 : index
    %c0_73 = arith.constant 0 : index
    %149 = vector.load %arg25[%c0_72, %c0_73] : memref<8x1xf32, #tpu.memory_space<vmem>>, vector<8x1xf32>
    %c0_74 = arith.constant 0 : index
    %c0_75 = arith.constant 0 : index
    %150 = vector.load %arg26[%c0_74, %c0_75] : memref<288x256xbf16, #tpu.memory_space<vmem>>, vector<288x256xbf16>
    %c0_76 = arith.constant 0 : index
    %c0_77 = arith.constant 0 : index
    %151 = vector.load %arg27[%c0_76, %c0_77] : memref<256x320xbf16, #tpu.memory_space<vmem>>, vector<256x320xbf16>
    %c0_78 = arith.constant 0 : index
    %c0_79 = arith.constant 0 : index
    %152 = vector.load %arg28[%c0_78, %c0_79] : memref<8x8xbf16, #tpu.memory_space<vmem>>, vector<8x8xbf16>
    %c0_80 = arith.constant 0 : index
    %c0_81 = arith.constant 0 : index
    %153 = vector.load %arg29[%c0_80, %c0_81] : memref<8x1xf32, #tpu.memory_space<vmem>>, vector<8x1xf32>
    %c0_82 = arith.constant 0 : index
    %c0_83 = arith.constant 0 : index
    %154 = vector.load %arg30[%c0_82, %c0_83] : memref<80x256xbf16, #tpu.memory_space<vmem>>, vector<80x256xbf16>
    %c0_84 = arith.constant 0 : index
    %c0_85 = arith.constant 0 : index
    %155 = vector.load %arg31[%c0_84, %c0_85] : memref<8x4xbf16, #tpu.memory_space<vmem>>, vector<8x4xbf16>
    %156 = tpu.concatenate %78, %141 in 0 : vector<8x256xf32>, vector<8x256xf32> -> vector<16x256xf32>
    %cst_86 = arith.constant 0.000000e+00 : f32
    %157 = vector.broadcast %cst_86 : f32 to vector<16x17xf32>
    %158 = vector.extract_strided_slice %156 {offsets = [0, 0], sizes = [16, 239], strides = [1, 1]} : vector<16x256xf32> to vector<16x239xf32>
    %159 = tpu.concatenate %157, %158 in 1 : vector<16x17xf32>, vector<16x239xf32> -> vector<16x256xf32>
    %160 = vector.extract_strided_slice %0 {offsets = [0, 0], sizes = [1, 256], strides = [1, 1]} : vector<9x256xf32> to vector<1x256xf32>
    %161 = vector.broadcast %160 : vector<1x256xf32> to vector<16x256xf32>
    %162 = arith.mulf %159, %161 : vector<16x256xf32>
    %cst_87 = arith.constant 0.000000e+00 : f32
    %163 = vector.broadcast %cst_87 : f32 to vector<16x16xf32>
    %164 = vector.extract_strided_slice %156 {offsets = [0, 0], sizes = [16, 240], strides = [1, 1]} : vector<16x256xf32> to vector<16x240xf32>
    %165 = tpu.concatenate %163, %164 in 1 : vector<16x16xf32>, vector<16x240xf32> -> vector<16x256xf32>
    %166 = vector.extract_strided_slice %0 {offsets = [1, 0], sizes = [1, 256], strides = [1, 1]} : vector<9x256xf32> to vector<1x256xf32>
    %167 = vector.broadcast %166 : vector<1x256xf32> to vector<16x256xf32>
    %168 = arith.mulf %165, %167 : vector<16x256xf32>
    %cst_88 = arith.constant 0.000000e+00 : f32
    %169 = vector.broadcast %cst_88 : f32 to vector<16x15xf32>
    %170 = vector.extract_strided_slice %156 {offsets = [0, 0], sizes = [16, 241], strides = [1, 1]} : vector<16x256xf32> to vector<16x241xf32>
    %171 = tpu.concatenate %169, %170 in 1 : vector<16x15xf32>, vector<16x241xf32> -> vector<16x256xf32>
    %172 = vector.extract_strided_slice %0 {offsets = [2, 0], sizes = [1, 256], strides = [1, 1]} : vector<9x256xf32> to vector<1x256xf32>
    %173 = vector.broadcast %172 : vector<1x256xf32> to vector<16x256xf32>
    %174 = arith.mulf %171, %173 : vector<16x256xf32>
    %cst_89 = arith.constant 0.000000e+00 : f32
    %175 = vector.broadcast %cst_89 : f32 to vector<16x1xf32>
    %176 = vector.extract_strided_slice %156 {offsets = [0, 0], sizes = [16, 255], strides = [1, 1]} : vector<16x256xf32> to vector<16x255xf32>
    %177 = tpu.concatenate %175, %176 in 1 : vector<16x1xf32>, vector<16x255xf32> -> vector<16x256xf32>
    %178 = vector.extract_strided_slice %0 {offsets = [3, 0], sizes = [1, 256], strides = [1, 1]} : vector<9x256xf32> to vector<1x256xf32>
    %179 = vector.broadcast %178 : vector<1x256xf32> to vector<16x256xf32>
    %180 = arith.mulf %177, %179 : vector<16x256xf32>
    %181 = vector.extract_strided_slice %0 {offsets = [4, 0], sizes = [1, 256], strides = [1, 1]} : vector<9x256xf32> to vector<1x256xf32>
    %182 = vector.broadcast %181 : vector<1x256xf32> to vector<16x256xf32>
    %183 = arith.mulf %156, %182 : vector<16x256xf32>
    %cst_90 = arith.constant 0.000000e+00 : f32
    %184 = vector.broadcast %cst_90 : f32 to vector<16x1xf32>
    %185 = vector.extract_strided_slice %156 {offsets = [0, 1], sizes = [16, 255], strides = [1, 1]} : vector<16x256xf32> to vector<16x255xf32>
    %186 = tpu.concatenate %185, %184 in 1 : vector<16x255xf32>, vector<16x1xf32> -> vector<16x256xf32>
    %187 = vector.extract_strided_slice %0 {offsets = [5, 0], sizes = [1, 256], strides = [1, 1]} : vector<9x256xf32> to vector<1x256xf32>
    %188 = vector.broadcast %187 : vector<1x256xf32> to vector<16x256xf32>
    %189 = arith.mulf %186, %188 : vector<16x256xf32>
    %cst_91 = arith.constant 0.000000e+00 : f32
    %190 = vector.broadcast %cst_91 : f32 to vector<16x15xf32>
    %191 = vector.extract_strided_slice %156 {offsets = [0, 15], sizes = [16, 241], strides = [1, 1]} : vector<16x256xf32> to vector<16x241xf32>
    %192 = tpu.concatenate %191, %190 in 1 : vector<16x241xf32>, vector<16x15xf32> -> vector<16x256xf32>
    %193 = vector.extract_strided_slice %0 {offsets = [6, 0], sizes = [1, 256], strides = [1, 1]} : vector<9x256xf32> to vector<1x256xf32>
    %194 = vector.broadcast %193 : vector<1x256xf32> to vector<16x256xf32>
    %195 = arith.mulf %192, %194 : vector<16x256xf32>
    %cst_92 = arith.constant 0.000000e+00 : f32
    %196 = vector.broadcast %cst_92 : f32 to vector<16x16xf32>
    %197 = vector.extract_strided_slice %156 {offsets = [0, 16], sizes = [16, 240], strides = [1, 1]} : vector<16x256xf32> to vector<16x240xf32>
    %198 = tpu.concatenate %197, %196 in 1 : vector<16x240xf32>, vector<16x16xf32> -> vector<16x256xf32>
    %199 = vector.extract_strided_slice %0 {offsets = [7, 0], sizes = [1, 256], strides = [1, 1]} : vector<9x256xf32> to vector<1x256xf32>
    %200 = vector.broadcast %199 : vector<1x256xf32> to vector<16x256xf32>
    %201 = arith.mulf %198, %200 : vector<16x256xf32>
    %cst_93 = arith.constant 0.000000e+00 : f32
    %202 = vector.broadcast %cst_93 : f32 to vector<16x17xf32>
    %203 = vector.extract_strided_slice %156 {offsets = [0, 17], sizes = [16, 239], strides = [1, 1]} : vector<16x256xf32> to vector<16x239xf32>
    %204 = tpu.concatenate %203, %202 in 1 : vector<16x239xf32>, vector<16x17xf32> -> vector<16x256xf32>
    %205 = vector.extract_strided_slice %0 {offsets = [8, 0], sizes = [1, 256], strides = [1, 1]} : vector<9x256xf32> to vector<1x256xf32>
    %206 = vector.broadcast %205 : vector<1x256xf32> to vector<16x256xf32>
    %207 = arith.mulf %204, %206 : vector<16x256xf32>
    %208 = tpu.concatenate %162, %168, %174, %180, %183, %189, %195, %201, %207 in 0 : vector<16x256xf32>, vector<16x256xf32>, vector<16x256xf32>, vector<16x256xf32>, vector<16x256xf32>, vector<16x256xf32>, vector<16x256xf32>, vector<16x256xf32>, vector<16x256xf32> -> vector<144x256xf32>
    %209 = arith.truncf %208 : vector<144x256xf32> to vector<144x256xbf16>
    %cst_94 = arith.constant dense<0.000000e+00> : vector<16x256xf32>
    %210 = tpu.matmul %142, %209, %cst_94 {dimension_numbers = #tpu.dot_dimension_numbers<[1], [0], [0], [1], [0, 0, 1, 1], [], []>} : vector<16x144xbf16>, vector<144x256xbf16>, vector<16x256xf32> -> vector<16x256xf32>
    %211 = vector.extract_strided_slice %210 {offsets = [0, 0], sizes = [8, 256], strides = [1, 1]} : vector<16x256xf32> to vector<8x256xf32>
    %212 = vector.broadcast %143 : vector<8x1xf32> to vector<8x256xf32>
    %213 = arith.addf %211, %212 : vector<8x256xf32>
    %cst_95 = arith.constant 0.000000e+00 : f32
    %214 = vector.broadcast %cst_95 : f32 to vector<8x256xf32>
    %215 = arith.maximumf %213, %214 : vector<8x256xf32>
    %216 = vector.extract_strided_slice %210 {offsets = [8, 0], sizes = [8, 256], strides = [1, 1]} : vector<16x256xf32> to vector<8x256xf32>
    %217 = arith.truncf %141 : vector<8x256xf32> to vector<8x256xbf16>
    %cst_96 = arith.constant dense<0.000000e+00> : vector<4x256xf32>
    %218 = tpu.matmul %145, %217, %cst_96 {dimension_numbers = #tpu.dot_dimension_numbers<[1], [0], [0], [1], [0, 0, 1, 1], [], []>} : vector<4x8xbf16>, vector<8x256xbf16>, vector<4x256xf32> -> vector<4x256xf32>
    %219 = vector.broadcast %146 : vector<4x1xf32> to vector<4x256xf32>
    %220 = arith.addf %218, %219 : vector<4x256xf32>
    %cst_97 = arith.constant 0.000000e+00 : f32
    %221 = vector.broadcast %cst_97 : f32 to vector<4x256xf32>
    %222 = arith.maximumf %220, %221 : vector<4x256xf32>
    %223 = arith.truncf %222 : vector<4x256xf32> to vector<4x256xbf16>
    %cst_98 = arith.constant dense<0.000000e+00> : vector<4x288xf32>
    %224 = tpu.matmul %223, %147, %cst_98 {dimension_numbers = #tpu.dot_dimension_numbers<[1], [0], [0], [1], [0, 0, 1, 1], [], []>} : vector<4x256xbf16>, vector<256x288xbf16>, vector<4x288xf32> -> vector<4x288xf32>
    %225 = vector.extract_strided_slice %224 {offsets = [0, 0], sizes = [4, 144], strides = [1, 1]} : vector<4x288xf32> to vector<4x144xf32>
    %226 = vector.extract_strided_slice %224 {offsets = [0, 144], sizes = [4, 144], strides = [1, 1]} : vector<4x288xf32> to vector<4x144xf32>
    %227 = tpu.concatenate %225, %226 in 0 : vector<4x144xf32>, vector<4x144xf32> -> vector<8x144xf32>
    %228 = arith.truncf %227 : vector<8x144xf32> to vector<8x144xbf16>
    %cst_99 = arith.constant dense<0.000000e+00> : vector<8x144xf32>
    %229 = tpu.matmul %148, %228, %cst_99 {dimension_numbers = #tpu.dot_dimension_numbers<[1], [0], [0], [1], [0, 0, 1, 1], [], []>} : vector<8x8xbf16>, vector<8x144xbf16>, vector<8x144xf32> -> vector<8x144xf32>
    %230 = vector.broadcast %149 : vector<8x1xf32> to vector<8x144xf32>
    %231 = arith.addf %229, %230 : vector<8x144xf32>
    %cst_100 = arith.constant 0.000000e+00 : f32
    %232 = vector.broadcast %cst_100 : f32 to vector<8x144xf32>
    %233 = arith.maximumf %231, %232 : vector<8x144xf32>
    %234 = vector.extract_strided_slice %233 {offsets = [0, 0], sizes = [4, 144], strides = [1, 1]} : vector<8x144xf32> to vector<4x144xf32>
    %235 = vector.extract_strided_slice %150 {offsets = [0, 0], sizes = [144, 256], strides = [1, 1]} : vector<288x256xbf16> to vector<144x256xbf16>
    %236 = arith.truncf %234 : vector<4x144xf32> to vector<4x144xbf16>
    %cst_101 = arith.constant dense<0.000000e+00> : vector<4x256xf32>
    %237 = tpu.matmul %236, %235, %cst_101 {dimension_numbers = #tpu.dot_dimension_numbers<[1], [0], [0], [1], [0, 0, 1, 1], [], []>} : vector<4x144xbf16>, vector<144x256xbf16>, vector<4x256xf32> -> vector<4x256xf32>
    %238 = vector.extract_strided_slice %233 {offsets = [4, 0], sizes = [4, 144], strides = [1, 1]} : vector<8x144xf32> to vector<4x144xf32>
    %239 = vector.extract_strided_slice %150 {offsets = [144, 0], sizes = [144, 256], strides = [1, 1]} : vector<288x256xbf16> to vector<144x256xbf16>
    %240 = arith.truncf %238 : vector<4x144xf32> to vector<4x144xbf16>
    %cst_102 = arith.constant dense<0.000000e+00> : vector<4x256xf32>
    %241 = tpu.matmul %240, %239, %cst_102 {dimension_numbers = #tpu.dot_dimension_numbers<[1], [0], [0], [1], [0, 0, 1, 1], [], []>} : vector<4x144xbf16>, vector<144x256xbf16>, vector<4x256xf32> -> vector<4x256xf32>
    %242 = arith.addf %237, %241 : vector<4x256xf32>
    %243 = vector.extract_strided_slice %222 {offsets = [0, 0], sizes = [1, 256], strides = [1, 1]} : vector<4x256xf32> to vector<1x256xf32>
    %244 = arith.truncf %243 : vector<1x256xf32> to vector<1x256xbf16>
    %cst_103 = arith.constant dense<0.000000e+00> : vector<1x320xf32>
    %245 = tpu.matmul %244, %151, %cst_103 {dimension_numbers = #tpu.dot_dimension_numbers<[1], [0], [0], [1], [0, 0, 1, 1], [], []>} : vector<1x256xbf16>, vector<256x320xbf16>, vector<1x320xf32> -> vector<1x320xf32>
    %246 = vector.extract_strided_slice %245 {offsets = [0, 0], sizes = [1, 40], strides = [1, 1]} : vector<1x320xf32> to vector<1x40xf32>
    %247 = vector.extract_strided_slice %245 {offsets = [0, 40], sizes = [1, 40], strides = [1, 1]} : vector<1x320xf32> to vector<1x40xf32>
    %248 = vector.extract_strided_slice %245 {offsets = [0, 80], sizes = [1, 40], strides = [1, 1]} : vector<1x320xf32> to vector<1x40xf32>
    %249 = vector.extract_strided_slice %245 {offsets = [0, 120], sizes = [1, 40], strides = [1, 1]} : vector<1x320xf32> to vector<1x40xf32>
    %250 = vector.extract_strided_slice %245 {offsets = [0, 160], sizes = [1, 40], strides = [1, 1]} : vector<1x320xf32> to vector<1x40xf32>
    %251 = vector.extract_strided_slice %245 {offsets = [0, 200], sizes = [1, 40], strides = [1, 1]} : vector<1x320xf32> to vector<1x40xf32>
    %252 = vector.extract_strided_slice %245 {offsets = [0, 240], sizes = [1, 40], strides = [1, 1]} : vector<1x320xf32> to vector<1x40xf32>
    %253 = vector.extract_strided_slice %245 {offsets = [0, 280], sizes = [1, 40], strides = [1, 1]} : vector<1x320xf32> to vector<1x40xf32>
    %254 = tpu.concatenate %246, %247, %248, %249, %250, %251, %252, %253 in 0 : vector<1x40xf32>, vector<1x40xf32>, vector<1x40xf32>, vector<1x40xf32>, vector<1x40xf32>, vector<1x40xf32>, vector<1x40xf32>, vector<1x40xf32> -> vector<8x40xf32>
    %255 = arith.truncf %254 : vector<8x40xf32> to vector<8x40xbf16>
    %cst_104 = arith.constant dense<0.000000e+00> : vector<8x40xf32>
    %256 = tpu.matmul %152, %255, %cst_104 {dimension_numbers = #tpu.dot_dimension_numbers<[1], [0], [0], [1], [0, 0, 1, 1], [], []>} : vector<8x8xbf16>, vector<8x40xbf16>, vector<8x40xf32> -> vector<8x40xf32>
    %257 = vector.broadcast %153 : vector<8x1xf32> to vector<8x40xf32>
    %258 = arith.addf %256, %257 : vector<8x40xf32>
    %cst_105 = arith.constant 0.000000e+00 : f32
    %259 = vector.broadcast %cst_105 : f32 to vector<8x40xf32>
    %260 = arith.maximumf %258, %259 : vector<8x40xf32>
    %261 = vector.extract_strided_slice %260 {offsets = [0, 0], sizes = [4, 40], strides = [1, 1]} : vector<8x40xf32> to vector<4x40xf32>
    %262 = vector.extract_strided_slice %154 {offsets = [0, 0], sizes = [40, 256], strides = [1, 1]} : vector<80x256xbf16> to vector<40x256xbf16>
    %263 = arith.truncf %261 : vector<4x40xf32> to vector<4x40xbf16>
    %cst_106 = arith.constant dense<0.000000e+00> : vector<4x256xf32>
    %264 = tpu.matmul %263, %262, %cst_106 {dimension_numbers = #tpu.dot_dimension_numbers<[1], [0], [0], [1], [0, 0, 1, 1], [], []>} : vector<4x40xbf16>, vector<40x256xbf16>, vector<4x256xf32> -> vector<4x256xf32>
    %265 = vector.extract_strided_slice %260 {offsets = [4, 0], sizes = [4, 40], strides = [1, 1]} : vector<8x40xf32> to vector<4x40xf32>
    %266 = vector.extract_strided_slice %154 {offsets = [40, 0], sizes = [40, 256], strides = [1, 1]} : vector<80x256xbf16> to vector<40x256xbf16>
    %267 = arith.truncf %265 : vector<4x40xf32> to vector<4x40xbf16>
    %cst_107 = arith.constant dense<0.000000e+00> : vector<4x256xf32>
    %268 = tpu.matmul %267, %266, %cst_107 {dimension_numbers = #tpu.dot_dimension_numbers<[1], [0], [0], [1], [0, 0, 1, 1], [], []>} : vector<4x40xbf16>, vector<40x256xbf16>, vector<4x256xf32> -> vector<4x256xf32>
    %269 = arith.addf %264, %268 : vector<4x256xf32>
    %270 = arith.addf %222, %242 : vector<4x256xf32>
    %271 = arith.addf %270, %269 : vector<4x256xf32>
    %272 = arith.truncf %271 : vector<4x256xf32> to vector<4x256xbf16>
    %cst_108 = arith.constant dense<0.000000e+00> : vector<8x256xf32>
    %273 = tpu.matmul %155, %272, %cst_108 {dimension_numbers = #tpu.dot_dimension_numbers<[1], [0], [0], [1], [0, 0, 1, 1], [], []>} : vector<8x4xbf16>, vector<4x256xbf16>, vector<8x256xf32> -> vector<8x256xf32>
    %274 = arith.addf %273, %216 : vector<8x256xf32>
    %275 = vector.broadcast %144 : vector<8x1xf32> to vector<8x256xf32>
    %276 = arith.addf %274, %275 : vector<8x256xf32>
    %cst_109 = arith.constant 0.000000e+00 : f32
    %277 = vector.broadcast %cst_109 : f32 to vector<8x256xf32>
    %278 = arith.maximumf %276, %277 : vector<8x256xf32>
    %279 = arith.addf %2, %215 : vector<8x256xf32>
    %c0_110 = arith.constant 0 : index
    %c0_111 = arith.constant 0 : index
    %c0_112 = arith.constant 0 : index
    %280 = vector.load %arg32[%c0_110, %c0_111, %c0_112] : memref<1x8x256xf32, #tpu.memory_space<vmem>>, vector<1x8x256xf32>
    %281 = vector.shape_cast %280 : vector<1x8x256xf32> to vector<8x256xf32>
    %282 = vector.shape_cast %279 : vector<8x256xf32> to vector<1x8x256xf32>
    tpu.vector_store %arg32[%c0_110, %c0_111, %c0_112], %282 {strides = array<i32>} : memref<1x8x256xf32, #tpu.memory_space<vmem>>, vector<1x8x256xf32>,
    %283 = arith.addf %4, %278 : vector<8x256xf32>
    %c0_113 = arith.constant 0 : index
    %c0_114 = arith.constant 0 : index
    %c0_115 = arith.constant 0 : index
    %284 = vector.load %arg33[%c0_113, %c0_114, %c0_115] : memref<1x8x256xf32, #tpu.memory_space<vmem>>, vector<1x8x256xf32>
    %285 = vector.shape_cast %284 : vector<1x8x256xf32> to vector<8x256xf32>
    %286 = vector.shape_cast %283 : vector<8x256xf32> to vector<1x8x256xf32>
    tpu.vector_store %arg33[%c0_113, %c0_114, %c0_115], %286 {strides = array<i32>} : memref<1x8x256xf32, #tpu.memory_space<vmem>>, vector<1x8x256xf32>,
    return
  }
  func.func @transform_0(%arg0: i32) -> (i32, i32, i32) {
    %c0_i32 = arith.constant 0 : i32
    %c0_i32_0 = arith.constant 0 : i32
    %c0_i32_1 = arith.constant 0 : i32
    return %arg0, %c0_i32, %c0_i32_0 : i32, i32, i32
  }
  func.func @transform_1(%arg0: i32) -> (i32, i32, i32) {
    %c0_i32 = arith.constant 0 : i32
    %c0_i32_0 = arith.constant 0 : i32
    %c0_i32_1 = arith.constant 0 : i32
    return %arg0, %c0_i32, %c0_i32_0 : i32, i32, i32
  }
  func.func @transform_2(%arg0: i32) -> (i32, i32) {
    %c0_i32 = arith.constant 0 : i32
    %c0_i32_0 = arith.constant 0 : i32
    %c0_i32_1 = arith.constant 0 : i32
    return %c0_i32, %c0_i32_0 : i32, i32
  }
  func.func @transform_3(%arg0: i32) -> (i32, i32) {
    %c0_i32 = arith.constant 0 : i32
    %c0_i32_0 = arith.constant 0 : i32
    %c0_i32_1 = arith.constant 0 : i32
    return %c0_i32, %c0_i32_0 : i32, i32
  }
  func.func @transform_4(%arg0: i32) -> (i32, i32) {
    %c0_i32 = arith.constant 0 : i32
    %c0_i32_0 = arith.constant 0 : i32
    %c0_i32_1 = arith.constant 0 : i32
    return %c0_i32, %c0_i32_0 : i32, i32
  }
  func.func @transform_5(%arg0: i32) -> (i32, i32) {
    %c0_i32 = arith.constant 0 : i32
    %c0_i32_0 = arith.constant 0 : i32
    %c0_i32_1 = arith.constant 0 : i32
    return %c0_i32, %c0_i32_0 : i32, i32
  }
  func.func @transform_6(%arg0: i32) -> (i32, i32) {
    %c0_i32 = arith.constant 0 : i32
    %c0_i32_0 = arith.constant 0 : i32
    %c0_i32_1 = arith.constant 0 : i32
    return %c0_i32, %c0_i32_0 : i32, i32
  }
  func.func @transform_7(%arg0: i32) -> (i32, i32) {
    %c0_i32 = arith.constant 0 : i32
    %c0_i32_0 = arith.constant 0 : i32
    %c0_i32_1 = arith.constant 0 : i32
    return %c0_i32, %c0_i32_0 : i32, i32
  }
  func.func @transform_8(%arg0: i32) -> (i32, i32) {
    %c0_i32 = arith.constant 0 : i32
    %c0_i32_0 = arith.constant 0 : i32
    %c0_i32_1 = arith.constant 0 : i32
    return %c0_i32, %c0_i32_0 : i32, i32
  }
  func.func @transform_9(%arg0: i32) -> (i32, i32) {
    %c0_i32 = arith.constant 0 : i32
    %c0_i32_0 = arith.constant 0 : i32
    %c0_i32_1 = arith.constant 0 : i32
    return %c0_i32, %c0_i32_0 : i32, i32
  }
  func.func @transform_10(%arg0: i32) -> (i32, i32) {
    %c0_i32 = arith.constant 0 : i32
    %c0_i32_0 = arith.constant 0 : i32
    %c0_i32_1 = arith.constant 0 : i32
    return %c0_i32, %c0_i32_0 : i32, i32
  }
  func.func @transform_11(%arg0: i32) -> (i32, i32) {
    %c0_i32 = arith.constant 0 : i32
    %c0_i32_0 = arith.constant 0 : i32
    %c0_i32_1 = arith.constant 0 : i32
    return %c0_i32, %c0_i32_0 : i32, i32
  }
  func.func @transform_12(%arg0: i32) -> (i32, i32) {
    %c0_i32 = arith.constant 0 : i32
    %c0_i32_0 = arith.constant 0 : i32
    %c0_i32_1 = arith.constant 0 : i32
    return %c0_i32, %c0_i32_0 : i32, i32
  }
  func.func @transform_13(%arg0: i32) -> (i32, i32) {
    %c0_i32 = arith.constant 0 : i32
    %c0_i32_0 = arith.constant 0 : i32
    %c0_i32_1 = arith.constant 0 : i32
    return %c0_i32, %c0_i32_0 : i32, i32
  }
  func.func @transform_14(%arg0: i32) -> (i32, i32) {
    %c0_i32 = arith.constant 0 : i32
    %c0_i32_0 = arith.constant 0 : i32
    %c0_i32_1 = arith.constant 0 : i32
    return %c0_i32, %c0_i32_0 : i32, i32
  }
  func.func @transform_15(%arg0: i32) -> (i32, i32) {
    %c0_i32 = arith.constant 0 : i32
    %c0_i32_0 = arith.constant 0 : i32
    %c0_i32_1 = arith.constant 0 : i32
    return %c0_i32, %c0_i32_0 : i32, i32
  }
  func.func @transform_16(%arg0: i32) -> (i32, i32) {
    %c0_i32 = arith.constant 0 : i32
    %c0_i32_0 = arith.constant 0 : i32
    %c0_i32_1 = arith.constant 0 : i32
    return %c0_i32, %c0_i32_0 : i32, i32
  }
  func.func @transform_17(%arg0: i32) -> (i32, i32) {
    %c0_i32 = arith.constant 0 : i32
    %c0_i32_0 = arith.constant 0 : i32
    %c0_i32_1 = arith.constant 0 : i32
    return %c0_i32, %c0_i32_0 : i32, i32
  }
  func.func @transform_18(%arg0: i32) -> (i32, i32) {
    %c0_i32 = arith.constant 0 : i32
    %c0_i32_0 = arith.constant 0 : i32
    %c0_i32_1 = arith.constant 0 : i32
    return %c0_i32, %c0_i32_0 : i32, i32
  }
  func.func @transform_19(%arg0: i32) -> (i32, i32) {
    %c0_i32 = arith.constant 0 : i32
    %c0_i32_0 = arith.constant 0 : i32
    %c0_i32_1 = arith.constant 0 : i32
    return %c0_i32, %c0_i32_0 : i32, i32
  }
  func.func @transform_20(%arg0: i32) -> (i32, i32) {
    %c0_i32 = arith.constant 0 : i32
    %c0_i32_0 = arith.constant 0 : i32
    %c0_i32_1 = arith.constant 0 : i32
    return %c0_i32, %c0_i32_0 : i32, i32
  }
  func.func @transform_21(%arg0: i32) -> (i32, i32) {
    %c0_i32 = arith.constant 0 : i32
    %c0_i32_0 = arith.constant 0 : i32
    %c0_i32_1 = arith.constant 0 : i32
    return %c0_i32, %c0_i32_0 : i32, i32
  }
  func.func @transform_22(%arg0: i32) -> (i32, i32) {
    %c0_i32 = arith.constant 0 : i32
    %c0_i32_0 = arith.constant 0 : i32
    %c0_i32_1 = arith.constant 0 : i32
    return %c0_i32, %c0_i32_0 : i32, i32
  }
  func.func @transform_23(%arg0: i32) -> (i32, i32) {
    %c0_i32 = arith.constant 0 : i32
    %c0_i32_0 = arith.constant 0 : i32
    %c0_i32_1 = arith.constant 0 : i32
    return %c0_i32, %c0_i32_0 : i32, i32
  }
  func.func @transform_24(%arg0: i32) -> (i32, i32) {
    %c0_i32 = arith.constant 0 : i32
    %c0_i32_0 = arith.constant 0 : i32
    %c0_i32_1 = arith.constant 0 : i32
    return %c0_i32, %c0_i32_0 : i32, i32
  }
  func.func @transform_25(%arg0: i32) -> (i32, i32) {
    %c0_i32 = arith.constant 0 : i32
    %c0_i32_0 = arith.constant 0 : i32
    %c0_i32_1 = arith.constant 0 : i32
    return %c0_i32, %c0_i32_0 : i32, i32
  }
  func.func @transform_26(%arg0: i32) -> (i32, i32) {
    %c0_i32 = arith.constant 0 : i32
    %c0_i32_0 = arith.constant 0 : i32
    %c0_i32_1 = arith.constant 0 : i32
    return %c0_i32, %c0_i32_0 : i32, i32
  }
  func.func @transform_27(%arg0: i32) -> (i32, i32) {
    %c0_i32 = arith.constant 0 : i32
    %c0_i32_0 = arith.constant 0 : i32
    %c0_i32_1 = arith.constant 0 : i32
    return %c0_i32, %c0_i32_0 : i32, i32
  }
  func.func @transform_28(%arg0: i32) -> (i32, i32) {
    %c0_i32 = arith.constant 0 : i32
    %c0_i32_0 = arith.constant 0 : i32
    %c0_i32_1 = arith.constant 0 : i32
    return %c0_i32, %c0_i32_0 : i32, i32
  }
  func.func @transform_29(%arg0: i32) -> (i32, i32) {
    %c0_i32 = arith.constant 0 : i32
    %c0_i32_0 = arith.constant 0 : i32
    %c0_i32_1 = arith.constant 0 : i32
    return %c0_i32, %c0_i32_0 : i32, i32
  }
  func.func @transform_30(%arg0: i32) -> (i32, i32) {
    %c0_i32 = arith.constant 0 : i32
    %c0_i32_0 = arith.constant 0 : i32
    %c0_i32_1 = arith.constant 0 : i32
    return %c0_i32, %c0_i32_0 : i32, i32
  }
  func.func @transform_31(%arg0: i32) -> (i32, i32, i32) {
    %c0_i32 = arith.constant 0 : i32
    %c0_i32_0 = arith.constant 0 : i32
    %c0_i32_1 = arith.constant 0 : i32
    return %arg0, %c0_i32, %c0_i32_0 : i32, i32, i32
  }
  func.func @transform_32(%arg0: i32) -> (i32, i32, i32) {
    %c0_i32 = arith.constant 0 : i32
    %c0_i32_0 = arith.constant 0 : i32
    %c0_i32_1 = arith.constant 0 : i32
    return %arg0, %c0_i32, %c0_i32_0 : i32, i32, i32
  }
}

</mosaic_0001>

<bundles_post_ra>
// kernel: ffc_resnet_block.1
= control target key start
LH: loop header
LB: loop body
LE: loop exit
PB: predicated region body
PF: predicated region fallthrough
CT: control target
= control target key end

     0   :  { %s5909_s6 = smov 1   ;;  %s5910_s10 = smov 2   ;;  %s7012_s0 = inlined_call_operand.smem [shape: u32[33], index: -1, kind: input, shape index: {}] }
   0x1   :  { %s5966_s5 = sld [smem:[%s7012_s0]]   ;;  %s5911_s14 = smov 3  }
   0x2   :  { %s5971_s9 = sld [smem:[%s7012_s0 + %s5909_s6]]   ;;  %s5912_s18 = smov 4  }
   0x3   :  { %s5976_s13 = sld [smem:[%s7012_s0 + %s5910_s10]]   ;;  %s5913_s22 = smov 5  }
   0x4   :  { %s5981_s17 = sld [smem:[%s7012_s0 + %s5911_s14]]   ;;  %s5914_s26 = smov 6  }
   0x5   :  { %s5986_s21 = sld [smem:[%s7012_s0 + %s5912_s18]]   ;;  %s5915_s30 = smov 7  }
   0x6   :  { %s5991_s25 = sld [smem:[%s7012_s0 + %s5913_s22]]   ;;  %s5916_s4 = smov 8  }
   0x7   :  { %7037 = sst [smem:[#allocation2_spill]] %s5966_s5  ;;  %s5917_s10 = smov 9  }
   0x8   :  { %s5996_s29 = sld [smem:[%s7012_s0 + %s5914_s26]]   ;;  %s5918_s15 = smov 10  }
   0x9   :  { %s6001_s3 = sld [smem:[%s7012_s0 + %s5915_s30]]   ;;  %s5919_s20 = smov 11  }
   0xa   :  { %s6006_s8 = sld [smem:[%s7012_s0 + %s5916_s4]]   ;;  %s5920_s26 = smov 12  }
   0xb   :  { %s6011_s14 = sld [smem:[%s7012_s0 + %s5917_s10]]   ;;  %s5921_s1 = smov 13  }
   0xc   :  { %s6016_s19 = sld [smem:[%s7012_s0 + %s5918_s15]]   ;;  %s5922_s7 = smov 14  }
   0xd   :  { %s6021_s24 = sld [smem:[%s7012_s0 + %s5919_s20]]   ;;  %s5923_s15 = smov 15  }
   0xe   :  { %s6026_s30 = sld [smem:[%s7012_s0 + %s5920_s26]]   ;;  %s5924_s22 = smov 16  }
   0xf   :  { %7038 = sst [smem:[#allocation3_spill]] %s6001_s3  ;;  %s5925_s28 = smov 17  }
  0x10   :  { %s6031_s6 = sld [smem:[%s7012_s0 + %s5921_s1]]  }
  0x11   :  { %s6036_s12 = sld [smem:[%s7012_s0 + %s5922_s7]]   ;;  %s5926_s7 = smov 18  }
  0x12   :  { %s6041_s20 = sld [smem:[%s7012_s0 + %s5923_s15]]   ;;  %s5927_s15 = smov 19  }
  0x13   :  { %s6046_s27 = sld [smem:[%s7012_s0 + %s5924_s22]]   ;;  %s5928_s22 = smov 20  }
  0x14   :  { %s6051_s4 = sld [smem:[%s7012_s0 + %s5925_s28]]   ;;  %s5929_s28 = smov 21  }
  0x16   :  { %7039 = sst [smem:[#allocation4_spill]] %s6031_s6 }
  0x17   :  { %s6056_s6 = sld [smem:[%s7012_s0 + %s5926_s7]]   ;;  %s5930_s7 = smov 22  }
  0x18   :  { %7040 = sst [smem:[#allocation5_spill]] %s6041_s20 }
  0x19   :  { %7041 = sst [smem:[#allocation6_spill]] %s6046_s27 }
  0x1a   :  { %7042 = sst [smem:[#allocation7_spill]] %s6051_s4 }
  0x1b   :  { %s6061_s20 = sld [smem:[%s7012_s0 + %s5927_s15]]   ;;  %s5931_s15 = smov 23  }
  0x1c   :  { %s6066_s27 = sld [smem:[%s7012_s0 + %s5928_s22]]   ;;  %s5932_s22 = smov 24  }
  0x1d   :  { %7043 = sst [smem:[#allocation8_spill]] %s6056_s6 }
  0x1e   :  { %s6071_s4 = sld [smem:[%s7012_s0 + %s5929_s28]]   ;;  %s5933_s28 = smov 25  }
  0x1f   :  { %s6076_s6 = sld [smem:[%s7012_s0 + %s5930_s7]]   ;;  %s5934_s7 = smov 26  }
  0x21   :  { %7044 = sst [smem:[#allocation9_spill]] %s6061_s20 }
  0x22   :  { %7045 = sst [smem:[#allocation10_spill]] %s6066_s27 }
  0x23   :  { %s6081_s20 = sld [smem:[%s7012_s0 + %s5931_s15]]   ;;  %s5935_s15 = smov 27  }
  0x24   :  { %7046 = sst [smem:[#allocation11_spill]] %s6071_s4 }
  0x25   :  { %7047 = sst [smem:[#allocation12_spill]] %s6076_s6 }
  0x26   :  { %s6086_s27 = sld [smem:[%s7012_s0 + %s5932_s22]]   ;;  %s5936_s22 = smov 28  }
  0x27   :  { %s6091_s4 = sld [smem:[%s7012_s0 + %s5933_s28]]   ;;  %s5937_s28 = smov 29  }
  0x28   :  { %s6096_s6 = sld [smem:[%s7012_s0 + %s5934_s7]]   ;;  %s5938_s7 = smov 30  }
  0x29   :  { %7048 = sst [smem:[#allocation13_spill]] %s6081_s20 }
  0x2a   :  { %s6101_s20 = sld [smem:[%s7012_s0 + %s5935_s15]]   ;;  %s5939_s15 = smov 31  }
  0x2c   :  { %7049 = sst [smem:[#allocation14_spill]] %s6086_s27 }
  0x2d   :  { %7050 = sst [smem:[#allocation15_spill]] %s6091_s4 }
  0x2e   :  { %7051 = sst [smem:[#allocation16_spill]] %s6096_s6 }
  0x2f   :  { %s6106_s27 = sld [smem:[%s7012_s0 + %s5936_s22]]   ;;  %s5940_s22 = smov 32  }
  0x30   :  { %7052 = sst [smem:[#allocation17_spill]] %s6101_s20 }
  0x31   :  { %s6111_s4 = sld [smem:[%s7012_s0 + %s5937_s28]]   ;;  %s6128_s28 = smov 0  }
  0x32   :  { %s6116_s6 = sld [smem:[%s7012_s0 + %s5938_s7]]  }
  0x33   :  { %s6121_s20 = sld [smem:[%s7012_s0 + %s5939_s15]]  }
  0x35   :  { %7053 = sst [smem:[#allocation18_spill]] %s6106_s27 }
  0x36   :  { %s6126_s27 = sld [smem:[%s7012_s0 + %s5940_s22]]  }
  0x37 LB: > { %s4927_s1 = sadd.s32 4294967295, %s5907_s28   ;;  %p4931_p0 = scmp.ge.s32.totalorder %s5907_s28, 1  ;;  %s5907_s28 = sphi %s6128_s28, %s76_s28  }
  0x38   : > { %p908_p1 = scmp.lt.s32.totalorder %s5907_s28, 3 }
  0x3a   : > { %p909_p2 = pnand %p4931_p0, %p908_p1 }
  0x3b   : > { %p1000_p3 = scmp.lt.s32.totalorder (!%p909_p2), %s4927_s1, 1  ;;  %s7054_s5 = sld [smem:[#allocation2_spill]] (!%p909_p2)  ;;  %v5941_v0 = vmov (!%p909_p2), 0   ;;  %vm1555_vm0 = vcmask (!%p909_p2), 1043456   ;;  %v1033_v7 = vld [vmem:[%s5996_s29] sm:$0x3] (!%p909_p2)  ;;  %v1235_v43 = vlaneseq (!%p909_p2) }
  0x3c   : > { %912 = sbr.rel (%p909_p2) target bundleno = 3266 (0xcc2), region = 144  ;;  %1594 = vmatprep.mubr.bf16.mxu1 (!%p909_p2), %v5941_v0  ;;  %5457 = vset.pattern.permute.xlu0 (!%p909_p2), %v5941_v0  ;;  %s5942_s10 = smov (!%p909_p2), 17   ;;  %vm1551_vm1 = vcmask (!%p909_p2), 64512   ;;  %v5489_v9 = vld [vmem:[%s6006_s8] ss:$12 sps:$4 sm:$0xff] (!%p909_p2)   ;;  %vm1255_vm2 = vcmask (!%p909_p2), 130048  }
  0x3d   : > { %5463 = vset.pattern.permute.xlu1 (!%p909_p2), %v5941_v0  ;;  %s7035_s11 = smov (!%p909_p2), 16   ;;  %s5944_s15 = smov (!%p909_p2), 15   ;;  %v5491_v10 = vld [vmem:[%s6006_s8 + $0x4] ss:$12 sps:$4 sm:$0xff] (!%p909_p2)   ;;  %v5494_v12 = vld [vmem:[%s6006_s8 + $0x1c] ss:$12 sps:$4 sm:$0xff] (!%p909_p2)  }
  0x3e   : > { %s5945_s16 = smov (!%p909_p2), 1   ;;  %s7024_s18 = smov (!%p909_p2), 127   ;;  %v5492_v11 = vld [vmem:[%s6006_s8 + $0x18] ss:$12 sps:$4 sm:$0xff] (!%p909_p2)   ;;  %v5495_v13 = vld [vmem:[%s6006_s8 + $0x30] ss:$12 sps:$4 sm:$0xff] (!%p909_p2)  }
  0x3f   : > { %v5497_v14 = vld [vmem:[%s6006_s8 + $0x34] ss:$12 sps:$4 sm:$0xff] (!%p909_p2)   ;;  %s7022_s22 = smov (!%p909_p2), 113   ;;  %v5500_v16 = vld [vmem:[%s6006_s8 + $0x4c] ss:$12 sps:$4 sm:$0xff] (!%p909_p2)   ;;  %s7020_s23 = smov (!%p909_p2), 112  }
  0x40   : > { %v5498_v15 = vld [vmem:[%s6006_s8 + $0x48] ss:$12 sps:$4 sm:$0xff] (!%p909_p2)   ;;  %v5501_v17 = vld [vmem:[%s6006_s8 + $0x60] ss:$12 sps:$4 sm:$0xff] (!%p909_p2)   ;;  %v5503_v18 = vld [vmem:[%s6006_s8 + $0x64] ss:$12 sps:$4 sm:$0xff] (!%p909_p2)  }
  0x41   : > { %v5504_v19 = vld [vmem:[%s6006_s8 + $0x78] ss:$12 sps:$4 sm:$0xff] (!%p909_p2)   ;;  %v5506_v20 = vld [vmem:[%s6006_s8 + $0x7c] ss:$12 sps:$4 sm:$0xff] (!%p909_p2)   ;;  %v5509_v22 = vld [vmem:[%s6006_s8 + $0x94] ss:$12 sps:$4 sm:$0xff] (!%p909_p2)  }
  0x42   : > { %v5507_v21 = vld [vmem:[%s6006_s8 + $0x90] ss:$12 sps:$4 sm:$0xff] (!%p909_p2)   ;;  %v5512_v23 = vld [vmem:[%s6006_s8 + $0xac] ss:$12 sps:$4 sm:$0xff] (!%p909_p2)   ;;  %s7055_s3 = sld [smem:[#allocation3_spill]] (!%p909_p2)  ;;  %s7018_s26 = smov (!%p909_p2), 111  }
  0x43   : > { %s7086_s1 = smov (!%p1000_p3, %s4927_s1), 1  ;;  %v5515_v24 = vld [vmem:[%s5981_s17 + $0x4] ss:$8 sps:$4 sm:$0xff]   ;;  %v5510_v25 = vld [vmem:[%s6006_s8 + $0xa8] ss:$12 sps:$4 sm:$0xff]   ;;  %v6268_v44 = vshrl.u32 %v1235_v43, 7 }
  0x44   : > { %s6139_s0 = sshll.u32 %s7086_s1, 4  ;;  %4944 = vmatprep.mubr.msk.bf16.mxu0 %vm1255_vm2, %v5515_v24  ;;  %v5516_v26 = vld [vmem:[%s6006_s8 + $0xc0] ss:$12 sps:$4 sm:$0xff]   ;;  %v5518_v27 = vld [vmem:[%s6006_s8 + $0xc4] ss:$12 sps:$4 sm:$0xff]   ;;  %vm1226_vm3 = vcmask 138240  }
  0x45   : > { %s6143_s2 = scalar_lea.vmem %s5971_s9, %s6139_s0  ;;  %s6147_s7 = scalar_lea.vmem %s7054_s5, %s6139_s0  ;;  %v5523_v28 = vld [vmem:[%s6006_s8 + $0xdc] ss:$12 sps:$4 sm:$0xff]   ;;  %v5521_v30 = vld [vmem:[%s6006_s8 + $0xd8] ss:$12 sps:$4 sm:$0xff]   ;;  %v5528_v31 = vld [vmem:[%s6006_s8 + $0xf4] ss:$12 sps:$4 sm:$0xff]  }
  0x46   : > { %v6150_v1 = vld [vmem:[%s6143_s2 + $0x8] sm:$0xff]  ;;  %v6153_v2 = vld [vmem:[%s6143_s2] sm:$0xff]  ;;  %v5526_v32 = vld [vmem:[%s6006_s8 + $0xf0] ss:$12 sps:$4 sm:$0xff]   ;;  %v1237_v46 = vsub.s32 0, %v6268_v44  ;;  %v1266_v47 = vsub.s32 1, %v6268_v44 }
  0x47   : > { %v6156_v3 = vld [vmem:[%s6147_s7] sm:$0xff]  ;;  %v1545_v4 = vpack.c.bf16 %v6150_v1, %v6150_v1  ;;  %v1544_v5 = vpack.c.bf16 %v6153_v2, %v6153_v2  ;;  %1222 = vrot.lane.b32.xlu1 %v6153_v2, %s5942_s10  ;;  %v6167_v6 = vld [vmem:[%s6147_s7 + $0x8] sm:$0xff]  ;;  %v5546_v40 = vld [vmem:[%s6006_s8 + $0x150] ss:$12 sps:$4 sm:$0xff]   ;;  %vm1284_vm4 = vcmask 121856   ;;  %vm1313_vm5 = vcmask 7168  }
  0x48   : > { %1218 = vrot.lane.b32.xlu0 %v6156_v3, %s5942_s10  ;;  %v1034_v29 = vld [vmem:[%s7055_s3] sm:$0xf]  ;;  %v5533_v33 = vld [vmem:[%s6006_s8 + $0x10c] ss:$12 sps:$4 sm:$0xff]   ;;  %v5531_v34 = vld [vmem:[%s6006_s8 + $0x108] ss:$12 sps:$4 sm:$0xff]  }
  0x49   : > { %4945 = vmatprep.subr.msk.bf16.mxu1 %vm1555_vm0, %v1545_v4  ;;  %v1557_v8 = vsel %vm1555_vm0, %v1544_v5, 0  ;;  %v5538_v35 = vld [vmem:[%s6006_s8 + $0x124] ss:$12 sps:$4 sm:$0xff]   ;;  %v5536_v36 = vld [vmem:[%s6006_s8 + $0x120] ss:$12 sps:$4 sm:$0xff]   ;;  %vm1354_vm6 = vcmask 1039360  }
  0x4a   : > { %1563 = vmatpush1.bf16.msra.mxu1 %v1557_v8  ;;  %v5543_v37 = vld [vmem:[%s6006_s8 + $0x13c] ss:$12 sps:$4 sm:$0xff]   ;;  %v5541_v38 = vld [vmem:[%s6006_s8 + $0x138] ss:$12 sps:$4 sm:$0xff]   ;;  %v5548_v39 = vld [vmem:[%s6006_s8 + $0x154] ss:$12 sps:$4 sm:$0xff]  }
  0x4b   : > { %1224 = vrot.lane.b32.xlu1 %v6150_v1, %s5942_s10  ;;  %1863 = vmatprep.subr.bf16.mxu1 %v5491_v10  ;;  %v5553_v41 = vld [vmem:[%s6006_s8 + $0x16c] ss:$12 sps:$4 sm:$0xff]   ;;  %v5551_v42 = vld [vmem:[%s6006_s8 + $0x168] ss:$12 sps:$4 sm:$0xff]   ;;  %v6271_v45 = vld [vmem:[%s5976_s13] sm:$0xff]  ;;  %vm1383_vm7 = vcmask 924672  }
  0x4c   : > { %1220 = vrot.lane.b32.xlu0 %v6167_v6, %s5942_s10  ;;  %v6276_v48 = vld [vmem:[%s5976_s13 + $0x8] sm:$0xff]  ;;  %v6279_v49 = vrot.slane %v6271_v45, %v1237_v46  ;;  %vm1412_vm8 = vcmask 916480   ;;  %vm1441_vm9 = vcmask 908288   ;;  %s7034_s1 = smov 48   ;;  %vm7028_vm10 = vmmov 0   ;;  %s7075_s3 = smov 56  }
  0x4d   : > { %4946 = vmatmul.mubr.msk.bf16.vlgmr.msra.gmra.mrb[0].mxu1 %vm1551_vm1, %v1033_v7  ;;  %v6284_v54 = vrot.slane %v6276_v48, %v1237_v46  ;;  %v1365_v46 = vsub.s32 5, %v6268_v44  ;;  %vm2667_vm11 = vcmask 1040384   ;;  %vm2669_vm12 = vcmask 1041408   ;;  %s7076_s5 = sld [smem:[#allocation9_spill]] }
  0x4e   : > { %1864 = vmatpush1.bf16.msra.mxu1 %v5489_v9  ;;  %vm2671_vm13 = vcmask 1042432   ;;  %vm2674_vm14 = vcmask 1044480   ;;  %vm7032_vm15 = vcmask 1045504  }
  0x4f   : > { %1249 = vrot.lane.b32.xlu1 %v6167_v6, %s7035_s11  ;;  %1865 = vmatprep.subr.bf16.mxu1 %v5494_v12  ;;  %v1295_v12 = vsub.s32 2, %v6268_v44 }
  0x50   : > { %1247 = vrot.lane.b32.xlu0 %v6156_v3, %s7035_s11 }
  0x52   : > { %1866 = vmatpush1.bf16.msra.mxu1 %v5492_v11 }
  0x53   : > { %1253 = vrot.lane.b32.xlu1 %v6150_v1, %s7035_s11  ;;  %1867 = vmatprep.subr.bf16.mxu1 %v5497_v14 }
  0x54   : > { %1251 = vrot.lane.b32.xlu0 %v6153_v2, %s7035_s11 }
  0x56   : > { %1868 = vmatpush1.bf16.msra.mxu1 %v5495_v13 }
  0x57   : > { %1278 = vrot.lane.b32.xlu1 %v6167_v6, %s5944_s15  ;;  %1869 = vmatprep.subr.bf16.mxu1 %v5500_v16 }
  0x58   : > { %1276 = vrot.lane.b32.xlu0 %v6156_v3, %s5944_s15 }
  0x5a   : > { %1870 = vmatpush1.bf16.msra.mxu1 %v5498_v15 }
  0x5b   : > { %1282 = vrot.lane.b32.xlu1 %v6150_v1, %s5944_s15  ;;  %1871 = vmatprep.subr.bf16.mxu1 %v5503_v18  ;;  %v6308_v18 = vrot.slane %v6271_v45, %v1295_v12 }
  0x5c   : > { %1280 = vrot.lane.b32.xlu0 %v6153_v2, %s5944_s15 }
  0x5e   : > { %1872 = vmatpush1.bf16.msra.mxu1 %v5501_v17 }
  0x5f   : > { %1307 = vrot.lane.b32.xlu1 %v6167_v6, %s5945_s16  ;;  %1873 = vmatprep.subr.bf16.mxu1 %v5506_v20 }
  0x60   : > { %1305 = vrot.lane.b32.xlu0 %v6156_v3, %s5945_s16 }
  0x62   : > { %1874 = vmatpush1.bf16.msra.mxu1 %v5504_v19  ;;  %v6311_v19 = vrot.slane %v6276_v48, %v1295_v12 }
  0x63   : > { %1311 = vrot.lane.b32.xlu1 %v6150_v1, %s5945_s16  ;;  %1875 = vmatprep.subr.bf16.mxu1 %v5509_v22 }
  0x64   : > { %1309 = vrot.lane.b32.xlu0 %v6153_v2, %s5945_s16 }
  0x66   : > { %1876 = vmatpush1.bf16.msra.mxu1 %v5507_v21 }
  0x67   : > { %1352 = vrot.lane.b32.xlu1 %v6150_v1, %s7024_s18  ;;  %1877 = vmatprep.subr.bf16.mxu1 %v5512_v23 }
  0x68   : > { %1348 = vrot.lane.b32.xlu0 %v6167_v6, %s7024_s18 }
  0x6a   : > { %1878 = vmatpush1.bf16.msra.mxu1 %v5510_v25  ;;  %v1324_v25 = vsub.s32 3, %v6268_v44 }
  0x6b   : > { %1350 = vrot.lane.b32.xlu1 %v6153_v2, %s7024_s18  ;;  %1879 = vmatprep.subr.bf16.mxu1 %v5518_v27 }
  0x6c   : > { %1346 = vrot.lane.b32.xlu0 %v6156_v3, %s7024_s18  ;;  %s7029_s18 = smov 56  }
  0x6e   : > { %1880 = vmatpush1.bf16.msra.mxu1 %v5516_v26 }
  0x6f   : > { %1381 = vrot.lane.b32.xlu1 %v6150_v1, %s7022_s22  ;;  %1881 = vmatprep.subr.bf16.mxu1 %v5523_v28 }
  0x70   : > { %1377 = vrot.lane.b32.xlu0 %v6167_v6, %s7022_s22 }
  0x72   : > { %1882 = vmatpush1.bf16.msra.mxu1 %v5521_v30  ;;  %v1336_v30 = vsub.s32 4, %v6268_v44 }
  0x73   : > { %1379 = vrot.lane.b32.xlu1 %v6153_v2, %s7022_s22  ;;  %1883 = vmatprep.subr.bf16.mxu1 %v5528_v31 }
  0x74   : > { %1375 = vrot.lane.b32.xlu0 %v6156_v3, %s7022_s22  ;;  %s7026_s22 = smov 8  }
  0x76   : > { %1884 = vmatpush1.bf16.msra.mxu1 %v5526_v32 }
  0x77   : > { %1410 = vrot.lane.b32.xlu1 %v6150_v1, %s7020_s23  ;;  %1885 = vmatprep.subr.bf16.mxu1 %v5533_v33 }
  0x78   : > { %1406 = vrot.lane.b32.xlu0 %v6167_v6, %s7020_s23 }
  0x7a   : > { %1886 = vmatpush1.bf16.msra.mxu1 %v5531_v34 }
  0x7b   : > { %1408 = vrot.lane.b32.xlu1 %v6153_v2, %s7020_s23  ;;  %1887 = vmatprep.subr.bf16.mxu1 %v5538_v35  ;;  %v6324_v35 = vrot.slane %v6271_v45, %v1324_v25 }
  0x7c   : > { %1404 = vrot.lane.b32.xlu0 %v6156_v3, %s7020_s23 }
  0x7e   : > { %1888 = vmatpush1.bf16.msra.mxu1 %v5536_v36 }
  0x7f   : > { %1439 = vrot.lane.b32.xlu1 %v6150_v1, %s7018_s26  ;;  %1889 = vmatprep.subr.bf16.mxu1 %v5543_v37  ;;  %v6327_v37 = vrot.slane %v6276_v48, %v1324_v25 }
  0x80   : > { %1435 = vrot.lane.b32.xlu0 %v6167_v6, %s7018_s26 }
  0x82   : > { %1890 = vmatpush1.bf16.msra.mxu1 %v5541_v38 }
  0x83   : > { %1437 = vrot.lane.b32.xlu1 %v6153_v2, %s7018_s26  ;;  %1891 = vmatprep.subr.bf16.mxu1 %v5548_v39  ;;  %v6293_v2 = vrot.slane %v6271_v45, %v1266_v47 }
  0x84   : > { %1433 = vrot.lane.b32.xlu0 %v6156_v3, %s7018_s26  ;;  %v6296_v3 = vrot.slane %v6276_v48, %v1266_v47  ;;  %v6336_v47 = vrot.slane %v6271_v45, %v1336_v30  ;;  %s7033_s26 = smov 88  }
  0x86   : > { %1892 = vmatpush1.bf16.msra.mxu1 %v5546_v40 }
  0x87   : > { %1893 = vmatprep.subr.bf16.mxu1 %v5553_v41  ;;  %v6330_v41 = vrot.slane %v6276_v48, %v1336_v30 }
  0x88   : > { %1548 = vperm.xlu0 %5457, %v1034_v29  }
  0x8a   : > { %1894 = vmatpush1.bf16.msra.mxu1 %v5551_v42 }
  0xb9   : > { %v1223_v50 = vpop.permute.xlu1 %1222 }
  0xba   : > { %v1219_v51 = vpop.permute.xlu0 %1218  ;;  %v1234_v52 = vsel %vm1226_vm3, 0.0, %v1223_v50 }
  0xbb   : > { %v1233_v53 = vsel %vm1226_vm3, 0.0, %v1219_v51  ;;  %v1245_v55 = vmul.f32 %v6279_v49, %v1234_v52 }
  0xbc   : > { %v1243_v56 = vmul.f32 %v6279_v49, %v1233_v53 }
  0xbd   : > { %v1225_v57 = vpop.permute.xlu1 %1224 }
  0xbe   : > { %v1221_v58 = vpop.permute.xlu0 %1220  ;;  %v1228_v59 = vsel %vm1226_vm3, %v1223_v50, %v1225_v57  ;;  %v1462_v63 = vpack.c.bf16 %v1245_v55, %v1243_v56  ;;  %v5891_v55 = vld [vmem:[%s6147_s7 + $0x8] sm:$0xff] }
  0xbf   : > { %v1227_v60 = vsel %vm1226_vm3, %v1219_v51, %v1221_v58  ;;  %v1246_v62 = vmul.f32 %v6284_v54, %v1228_v59  ;;  %v1343_v56 = vmul.f32 %v5891_v55, %v6330_v41  ;;  %v5892_v57 = vld [vmem:[%s6143_s2 + $0x8] sm:$0xff] }
  0xc0   : > { %v1244_v61 = vmul.f32 %v6284_v54, %v1227_v60  ;;  %v1345_v58 = vmul.f32 %v5892_v57, %v6330_v41 }
  0xc1   : > { %v1250_v1 = vpop.permute.xlu1 %1249 }
  0xc2   : > { %v1248_v4 = vpop.permute.xlu0 %1247  ;;  %v1463_v5 = vpack.c.bf16 %v1246_v62, %v1244_v61 }
  0xc3   : > { %v1256_v6 = vsel %vm1255_vm2, %v1248_v4, %v1250_v1  ;;  %v1262_v7 = vsel %vm1255_vm2, 0.0, %v1248_v4  ;;  %v5893_v1 = vld [vmem:[%s6147_s7] sm:$0xff] }
  0xc4   : > { %1492 = vmatprep.subr.bf16.mxu0 %v1463_v5  ;;  %v1272_v8 = vmul.f32 %v6293_v2, %v1262_v7  ;;  %v1273_v9 = vmul.f32 %v6296_v3, %v1256_v6  ;;  %v1342_v4 = vmul.f32 %v5893_v1, %v6336_v47  ;;  %v5894_v5 = vld [vmem:[%s6143_s2] sm:$0xff] }
  0xc5   : > { %1493 = vmatpush1.bf16.msra.mxu0 %v1462_v63  ;;  %v1254_v10 = vpop.permute.xlu1 %1253  ;;  %v6349_v63 = vrot.slane %v6276_v48, %v1365_v46  ;;  %v1344_v6 = vmul.f32 %v5894_v5, %v6336_v47 }
  0xc6   : > { %v1252_v11 = vpop.permute.xlu0 %1251 }
  0xc7   : > { %v1257_v13 = vsel %vm1255_vm2, %v1252_v11, %v1254_v10  ;;  %v1263_v14 = vsel %vm1255_vm2, 0.0, %v1252_v11  ;;  %v1471_v11 = vpack.c.bf16 %v1345_v58, %v1343_v56 }
  0xc8   : > { %v1274_v15 = vmul.f32 %v6293_v2, %v1263_v14  ;;  %v1275_v16 = vmul.f32 %v6296_v3, %v1257_v13 }
  0xc9   : > { %v1279_v17 = vpop.permute.xlu1 %1278 }
  0xca   : > { %v1277_v20 = vpop.permute.xlu0 %1276  ;;  %v1465_v21 = vpack.c.bf16 %v1275_v16, %v1273_v9  ;;  %v1464_v22 = vpack.c.bf16 %v1274_v15, %v1272_v8  ;;  %v6360_v16 = vrot.slane %v6271_v45, %v1365_v46 }
  0xcb   : > { %v1285_v23 = vsel %vm1284_vm4, %v1277_v20, %v1279_v17  ;;  %v1291_v24 = vsel %vm1284_vm4, 0.0, %v1277_v20  ;;  %v1394_v17 = vsub.s32 6, %v6268_v44  ;;  %v1470_v20 = vpack.c.bf16 %v1344_v6, %v1342_v4 }
  0xcc   : > { %1494 = vmatprep.subr.bf16.mxu0 %v1465_v21  ;;  %v1301_v26 = vmul.f32 %v6308_v18, %v1291_v24  ;;  %v1302_v27 = vmul.f32 %v6311_v19, %v1285_v23 }
  0xcd   : > { %1495 = vmatpush1.bf16.msra.mxu0 %v1464_v22  ;;  %v1283_v28 = vpop.permute.xlu1 %1282 }
  0xce   : > { %v1281_v29 = vpop.permute.xlu0 %1280 }
  0xcf   : > { %v1286_v31 = vsel %vm1284_vm4, %v1281_v29, %v1283_v28  ;;  %v1292_v32 = vsel %vm1284_vm4, 0.0, %v1281_v29  ;;  %v6368_v28 = vrot.slane %v6276_v48, %v1394_v17 }
  0xd0   : > { %v1303_v33 = vmul.f32 %v6308_v18, %v1292_v32  ;;  %v1304_v34 = vmul.f32 %v6311_v19, %v1286_v31 }
  0xd1   : > { %v1308_v36 = vpop.permute.xlu1 %1307 }
  0xd2   : > { %v1306_v38 = vpop.permute.xlu0 %1305  ;;  %v1467_v39 = vpack.c.bf16 %v1304_v34, %v1302_v27  ;;  %v1466_v40 = vpack.c.bf16 %v1303_v33, %v1301_v26 }
  0xd3   : > { %v1314_v42 = vsel %vm1313_vm5, %v1306_v38, %v1308_v36  ;;  %v1320_v43 = vsel %vm1313_vm5, 0.0, %v1306_v38  ;;  %v6375_v38 = vrot.slane %v6271_v45, %v1394_v17 }
  0xd4   : > { %1496 = vmatprep.subr.bf16.mxu0 %v1467_v39  ;;  %v1330_v50 = vmul.f32 %v6324_v35, %v1320_v43  ;;  %v1331_v51 = vmul.f32 %v6327_v37, %v1314_v42  ;;  %v1423_v39 = vsub.s32 7, %v6268_v44 }
  0xd5   : > { %1497 = vmatpush1.bf16.msra.mxu0 %v1466_v40  ;;  %v1312_v52 = vpop.permute.xlu1 %1311 }
  0xd6   : > { %v1310_v53 = vpop.permute.xlu0 %1309 }
  0xd7   : > { %v1315_v59 = vsel %vm1313_vm5, %v1310_v53, %v1312_v52  ;;  %v1321_v60 = vsel %vm1313_vm5, 0.0, %v1310_v53  ;;  %v6383_v53 = vrot.slane %v6276_v48, %v1423_v39 }
  0xd8   : > { %v1332_v61 = vmul.f32 %v6324_v35, %v1321_v60  ;;  %v1333_v62 = vmul.f32 %v6327_v37, %v1315_v59 }
  0xd9   : > { %v1353_v7 = vpop.permute.xlu1 %1352 }
  0xda   : > { %v1349_v8 = vpop.permute.xlu0 %1348  ;;  %v1469_v9 = vpack.c.bf16 %v1333_v62, %v1331_v51  ;;  %v1468_v10 = vpack.c.bf16 %v1332_v61, %v1330_v50  ;;  %v1362_v12 = vsel %vm1354_vm6, %v1353_v7, 0.0  ;;  %v6390_v61 = vrot.slane %v6271_v45, %v1423_v39  ;;  %v5535_v39 = vld [vmem:[%s6006_s8 + $0x50] ss:$12 sps:$4 sm:$0xff]  }
  0xdb   : > { %v1361_v13 = vsel %vm1354_vm6, %v1349_v8, 0.0  ;;  %v1374_v14 = vmul.f32 %v6349_v63, %v1362_v12 }
  0xdc   : > { %v1372_v15 = vmul.f32 %v6349_v63, %v1361_v13  ;;  %1498 = vmatprep.subr.bf16.mxu0 %v1469_v9 }
  0xdd   : > { %1499 = vmatpush1.bf16.msra.mxu0 %v1468_v10  ;;  %v1351_v21 = vpop.permute.xlu1 %1350 }
  0xde   : > { %v1347_v22 = vpop.permute.xlu0 %1346  ;;  %1500 = vmatprep.subr.bf16.mxu0 %v1471_v11  ;;  %v1473_v23 = vpack.c.bf16 %v1374_v14, %v1372_v15  ;;  %v1356_v24 = vsel %vm1354_vm6, %v1351_v21, %v1353_v7  ;;  %v4940_v15 = vld [vmem:[%s5976_s13 + $0x10] ss:$0 sm:$0xff] }
  0xdf   : > { %v1355_v25 = vsel %vm1354_vm6, %v1347_v22, %v1349_v8  ;;  %v1373_v26 = vmul.f32 %v6360_v16, %v1356_v24  ;;  %v4941_v8 = vld [vmem:[%s5976_s13 + $0x18] ss:$0 sm:$0xff] }
  0xe0   : > { %v1371_v27 = vmul.f32 %v6360_v16, %v1355_v25 }
  0xe1   : > { %1501 = vmatpush1.bf16.msra.mxu0 %v1470_v20  ;;  %v1382_v29 = vpop.permute.xlu1 %1381 }
  0xe2   : > { %v1378_v30 = vpop.permute.xlu0 %1377  ;;  %1502 = vmatprep.subr.bf16.mxu0 %v1473_v23  ;;  %v1472_v31 = vpack.c.bf16 %v1373_v26, %v1371_v27  ;;  %v1391_v32 = vsel %vm1383_vm7, %v1382_v29, 0.0  ;;  %v5519_v26 = vld [vmem:[%s6006_s8 + $0xc8] ss:$12 sps:$4 sm:$0xff]  }
  0xe3   : > { %v1390_v33 = vsel %vm1383_vm7, %v1378_v30, 0.0  ;;  %v1403_v34 = vmul.f32 %v6368_v28, %v1391_v32  ;;  %v5525_v32 = vld [vmem:[%s6006_s8 + $0x20] ss:$12 sps:$4 sm:$0xff]  }
  0xe4   : > { %v1401_v36 = vmul.f32 %v6368_v28, %v1390_v33  ;;  %v5529_v33 = vld [vmem:[%s6006_s8 + $0xf8] ss:$12 sps:$4 sm:$0xff]  }
  0xe5   : > { %1503 = vmatpush1.bf16.msra.mxu0 %v1472_v31  ;;  %v1380_v40 = vpop.permute.xlu1 %1379  ;;  %v5524_v31 = vld [vmem:[%s6006_s8 + $0xe0] ss:$12 sps:$4 sm:$0xff]  }
  0xe6   : > { %v1376_v42 = vpop.permute.xlu0 %1375  ;;  %v1475_v43 = vpack.c.bf16 %v1403_v34, %v1401_v36  ;;  %v1385_v46 = vsel %vm1383_vm7, %v1380_v40, %v1382_v29  ;;  %v5513_v29 = vld [vmem:[%s5981_s17] ss:$8 sps:$4 sm:$0xff]   ;;  %v5530_v34 = vld [vmem:[%s6006_s8 + $0x38] ss:$12 sps:$4 sm:$0xff]   ;;  %v5534_v36 = vld [vmem:[%s6006_s8 + $0x110] ss:$12 sps:$4 sm:$0xff]  }
  0xe7   : > { %v1384_v50 = vsel %vm1383_vm7, %v1376_v42, %v1378_v30  ;;  %v1402_v51 = vmul.f32 %v6375_v38, %v1385_v46  ;;  %v5520_v30 = vld [vmem:[%s6006_s8 + $0x8] ss:$12 sps:$4 sm:$0xff]   ;;  %v5545_v46 = vld [vmem:[%s6006_s8 + $0x80] ss:$12 sps:$4 sm:$0xff]  }
  0xe8   : > { %v1400_v52 = vmul.f32 %v6375_v38, %v1384_v50  ;;  %1504 = vmatprep.subr.bf16.mxu0 %v1475_v43  ;;  %v5539_v40 = vld [vmem:[%s6006_s8 + $0x128] ss:$12 sps:$4 sm:$0xff]   ;;  %v5544_v43 = vld [vmem:[%s6006_s8 + $0x140] ss:$12 sps:$4 sm:$0xff]   ;;  %v5549_v50 = vld [vmem:[%s6006_s8 + $0x158] ss:$12 sps:$4 sm:$0xff]  }
  0xe9   : > { %v1411_v55 = vpop.permute.xlu1 %1410  ;;  %v5540_v42 = vld [vmem:[%s6006_s8 + $0x68] ss:$12 sps:$4 sm:$0xff]  }
  0xea   : > { %v1407_v56 = vpop.permute.xlu0 %1406  ;;  %v1474_v44 = vpack.c.bf16 %v1402_v51, %v1400_v52  ;;  %v1420_v57 = vsel %vm1412_vm8, %v1411_v55, 0.0  ;;  %v5550_v51 = vld [vmem:[%s6006_s8 + $0x98] ss:$12 sps:$4 sm:$0xff]   ;;  %v5554_v52 = vld [vmem:[%s6006_s8 + $0x170] ss:$12 sps:$4 sm:$0xff]  }
  0xeb   : > { %v1419_v58 = vsel %vm1412_vm8, %v1407_v56, 0.0  ;;  %v1432_v59 = vmul.f32 %v6383_v53, %v1420_v57 }
  0xec   : > { %v1430_v60 = vmul.f32 %v6383_v53, %v1419_v58  ;;  %1505 = vmatpush1.bf16.msra.mxu0 %v1474_v44 }
  0xed   : > { %v1409_v62 = vpop.permute.xlu1 %1408 }
  0xee   : > { %v1405_v48 = vpop.permute.xlu0 %1404  ;;  %v1477_v1 = vpack.c.bf16 %v1432_v59, %v1430_v60  ;;  %v1414_v4 = vsel %vm1412_vm8, %v1409_v62, %v1411_v55  ;;  %v5555_v55 = vld [vmem:[%s6006_s8 + $0xb0] ss:$12 sps:$4 sm:$0xff]  }
  0xef   : > { %v1413_v5 = vsel %vm1412_vm8, %v1405_v48, %v1407_v56  ;;  %v1431_v6 = vmul.f32 %v6390_v61, %v1414_v4 }
  0xf0   : > { %v1429_v7 = vmul.f32 %v6390_v61, %v1413_v5  ;;  %1506 = vmatprep.subr.bf16.mxu0 %v1477_v1 }
  0xf1   : > { %v1440_v9 = vpop.permute.xlu1 %1439 }
  0xf2   : > { %v1436_v10 = vpop.permute.xlu0 %1435  ;;  %v1476_v45 = vpack.c.bf16 %v1431_v6, %v1429_v7  ;;  %v1449_v11 = vsel %vm1441_vm9, %v1440_v9, 0.0 }
  0xf3   : > { %v1448_v12 = vsel %vm1441_vm9, %v1436_v10, 0.0  ;;  %v1461_v13 = vmul.f32 %v4941_v8, %v1449_v11 }
  0xf4   : > { %v1459_v14 = vmul.f32 %v4941_v8, %v1448_v12  ;;  %1507 = vmatpush1.bf16.msra.mxu0 %v1476_v45 }
  0xf5   : > { %v1438_v17 = vpop.permute.xlu1 %1437 }
  0xf6   : > { %v1434_v20 = vpop.permute.xlu0 %1433  ;;  %v1479_v21 = vpack.c.bf16 %v1461_v13, %v1459_v14  ;;  %v1443_v22 = vsel %vm1441_vm9, %v1438_v17, %v1440_v9 }
  0xf7   : > { %v1442_v23 = vsel %vm1441_vm9, %v1434_v20, %v1436_v10  ;;  %v1460_v24 = vmul.f32 %v4940_v15, %v1443_v22 }
  0xf8   : > { %v1458_v25 = vmul.f32 %v4940_v15, %v1442_v23  ;;  %1508 = vmatprep.subr.bf16.mxu0 %v1479_v21 }
  0xfa   : > { %v1478_v27 = vpack.c.bf16 %v1460_v24, %v1458_v25  ;;  %v1100_v24 = vld [vmem:[%s6016_s19] sm:$0xff]  ;;  %v5620_v25 = vld [vmem:[%s6021_s24 + $0x90] ss:$8 sps:$4 sm:$0xff]  }
  0xfc   : > { %1509 = vmatpush1.bf16.msra.mxu0 %v1478_v27  ;;  %v5625_v27 = vld [vmem:[%s6021_s24 + $0xa4] ss:$8 sps:$4 sm:$0xff]  }
  0xfd   : > { %5268 = vmatprep.subr.bf16.mxu0 %v5519_v26  ;;  %v5622_v26 = vld [vmem:[%s6021_s24 + $0x94] ss:$8 sps:$4 sm:$0xff]  }
  0xfe   : > { %2116 = vmatprep.subr.bf16.mxu1 %v5622_v26  ;;  %v5582_v26 = vld [vmem:[%s6026_s30 + $0xc4] ss:$12 sps:$4 sm:$0xff]  }
  0xff   : > { %1525 = vmatmul.mubr.bf16.vlgmr.msra.gmra.mrb[0].mxu0 %v5513_v29  ;;  %v5623_v29 = vld [vmem:[%s6021_s24 + $0xa0] ss:$8 sps:$4 sm:$0xff]  }
 0x100   : > { %5269 = vmatpush3.bf16.msra.mxu0 %v5520_v30  ;;  %v5628_v30 = vld [vmem:[%s6021_s24 + $0xb4] ss:$8 sps:$4 sm:$0xff]  }
 0x101   : > { %5270 = vmatprep.subr.bf16.mxu0 %v5524_v31  ;;  %v5626_v31 = vld [vmem:[%s6021_s24 + $0xb0] ss:$8 sps:$4 sm:$0xff]  }
 0x104   : > { %5271 = vmatpush3.bf16.msra.mxu0 %v5525_v32  ;;  %v5631_v32 = vld [vmem:[%s6021_s24 + $0xc4] ss:$8 sps:$4 sm:$0xff]  }
 0x105   : > { %5272 = vmatprep.subr.bf16.mxu0 %v5529_v33  ;;  %v5629_v33 = vld [vmem:[%s6021_s24 + $0xc0] ss:$8 sps:$4 sm:$0xff]  }
 0x107   : > { %v1549_v56 = vpop.permute.xlu0 %1548 }
 0x108   : > { %5273 = vmatpush3.bf16.msra.mxu0 %v5530_v34  ;;  %v5634_v34 = vld [vmem:[%s6021_s24 + $0xd4] ss:$8 sps:$4 sm:$0xff]  }
 0x109   : > { %5274 = vmatprep.subr.bf16.mxu0 %v5534_v36  ;;  %v5632_v36 = vld [vmem:[%s6021_s24 + $0xd0] ss:$8 sps:$4 sm:$0xff]  }
 0x10c   : > { %5275 = vmatpush3.bf16.msra.mxu0 %v5535_v39  ;;  %v5637_v39 = vld [vmem:[%s6021_s24 + $0xe4] ss:$8 sps:$4 sm:$0xff]  }
 0x10d   : > { %5276 = vmatprep.subr.bf16.mxu0 %v5539_v40  ;;  %v5635_v40 = vld [vmem:[%s6021_s24 + $0xe0] ss:$8 sps:$4 sm:$0xff]  }
 0x110   : > { %5277 = vmatpush3.bf16.msra.mxu0 %v5540_v42  ;;  %v5640_v42 = vld [vmem:[%s6021_s24 + $0xf4] ss:$8 sps:$4 sm:$0xff]  }
 0x111   : > { %5278 = vmatprep.subr.bf16.mxu0 %v5544_v43 }
 0x114   : > { %5279 = vmatpush3.bf16.msra.mxu0 %v5545_v46 }
 0x115   : > { %5280 = vmatprep.subr.bf16.mxu0 %v5549_v50 }
 0x118   : > { %5281 = vmatpush3.bf16.msra.mxu0 %v5550_v51  ;;  %v5638_v51 = vld [vmem:[%s6021_s24 + $0xf0] ss:$8 sps:$4 sm:$0xff]  }
 0x119   : > { %5282 = vmatprep.subr.bf16.mxu0 %v5554_v52 }
 0x11c   : > { %5283 = vmatpush3.bf16.msra.mxu0 %v5555_v55 }
 0x120   : > { %v1596_v44 = vpop.f32.mrb[0].mxu1 }
 0x121   : > { %v1597_v57 = vadd.f32 %v1596_v44, %v1549_v56  ;;  %v1598_v58 = vpop.f32.mrb[1].mxu1 }
 0x122   : > { %v1599_v59 = vadd.f32 %v1598_v58, %v1549_v56  ;;  %v1600_v60 = vpop.f32.mrb[2].mxu1  ;;  %v5558_v58 = vld [vmem:[%s6026_s30 + $0x4] ss:$12 sps:$4 sm:$0xff]  }
 0x123   : > { %v6419_v62 = vmax.f32 %v1597_v57, 0.0  ;;  %v1601_v48 = vpop.f32.mrb[3].mxu1  ;;  %v1099_v60 = vld [vmem:[%s6011_s14] sm:$0xf] }
 0x124   : > { %v6421_v1 = vmax.f32 %v1599_v59, 0.0  ;;  %v5556_v48 = vld [vmem:[%s6026_s30] ss:$12 sps:$4 sm:$0xff]  }
 0x125   : > { %v6429_v5 = vpack.c.bf16 %v6419_v62, %v6419_v62 }
 0x126   : > { %v6425_v4 = vpack.c.bf16 %v6421_v1, %v6421_v1 }
 0x128   : > { %1895 = vmatprep.mubr.bf16.mxu1 %v6425_v4  ;;  %1936 = vmatprep.mubr.bf16.mxu0 %v6425_v4 }
 0x129   : > { %1896 = vmatmul.mubr.bf16.vlgmr.msra.gmra.mrb[4].mxu1 %v6429_v5  ;;  %1937 = vmatmul.mubr.bf16.vlgmr.msra.gmra.mrb[4].mxu0 %v6429_v5 }
 0x12a   : > { %2005 = vmatprep.mubr.bf16.mxu0 %v5941_v0  ;;  %2117 = vmatpush1.bf16.msra.mxu1 %v5620_v25  ;;  %v5577_v25 = vld [vmem:[%s6026_s30 + $0xa8] ss:$12 sps:$4 sm:$0xff]  }
 0x12b   : > { %2118 = vmatprep.subr.bf16.mxu1 %v5625_v27  ;;  %v5580_v27 = vld [vmem:[%s6026_s30 + $0xc0] ss:$12 sps:$4 sm:$0xff]  }
 0x12e   : > { %2119 = vmatpush1.bf16.msra.mxu1 %v5623_v29  ;;  %v5585_v29 = vld [vmem:[%s6026_s30 + $0xdc] ss:$12 sps:$4 sm:$0xff]  }
 0x12f   : > { %2120 = vmatprep.subr.bf16.mxu1 %v5628_v30  ;;  %v5583_v30 = vld [vmem:[%s6026_s30 + $0xd8] ss:$12 sps:$4 sm:$0xff]  }
 0x132   : > { %2121 = vmatpush1.bf16.msra.mxu1 %v5626_v31  ;;  %v5588_v31 = vld [vmem:[%s6026_s30 + $0xf4] ss:$12 sps:$4 sm:$0xff]  }
 0x133   : > { %2122 = vmatprep.subr.bf16.mxu1 %v5631_v32  ;;  %v5586_v32 = vld [vmem:[%s6026_s30 + $0xf0] ss:$12 sps:$4 sm:$0xff]  }
 0x136   : > { %2123 = vmatpush1.bf16.msra.mxu1 %v5629_v33  ;;  %v5591_v33 = vld [vmem:[%s6026_s30 + $0x10c] ss:$12 sps:$4 sm:$0xff]  }
 0x137   : > { %2124 = vmatprep.subr.bf16.mxu1 %v5634_v34  ;;  %v5589_v34 = vld [vmem:[%s6026_s30 + $0x108] ss:$12 sps:$4 sm:$0xff]  }
 0x13a   : > { %2125 = vmatpush1.bf16.msra.mxu1 %v5632_v36  ;;  %v5594_v36 = vld [vmem:[%s6026_s30 + $0x124] ss:$12 sps:$4 sm:$0xff]  }
 0x13b   : > { %2126 = vmatprep.subr.bf16.mxu1 %v5637_v39  ;;  %v5592_v39 = vld [vmem:[%s6026_s30 + $0x120] ss:$12 sps:$4 sm:$0xff]  }
 0x13e   : > { %2127 = vmatpush1.bf16.msra.mxu1 %v5635_v40  ;;  %v5597_v40 = vld [vmem:[%s6026_s30 + $0x13c] ss:$12 sps:$4 sm:$0xff]  }
 0x13f   : > { %2128 = vmatprep.subr.bf16.mxu1 %v5640_v42  ;;  %v5595_v42 = vld [vmem:[%s6026_s30 + $0x138] ss:$12 sps:$4 sm:$0xff]  }
 0x142   : > { %2129 = vmatpush1.bf16.msra.mxu1 %v5638_v51  ;;  %v5601_v51 = vld [vmem:[%s6026_s30 + $0x168] ss:$12 sps:$4 sm:$0xff]  }
 0x1d2   : > { %v6436_v6 = vpop.f32.mrb[0].mxu0 }
 0x1d3   : > { %v6438_v7 = vpop.f32.mrb[1].mxu0 }
 0x1d4   : > { %v6440_v8 = vpop.f32.mrb[2].mxu0 }
 0x1d5   : > { %v6442_v9 = vpop.f32.mrb[3].mxu0 }
 0x1fc   : > { %v1897_v10 = vpop.f32.mrb[4].mxu1  ;;  %v5284_v45 = vpop.f32.mrb[4].mxu0 }
 0x1fd   : > { %v1899_v11 = vpop.f32.mrb[5].mxu1  ;;  %v5285_v12 = vpop.f32.mrb[5].mxu0 }
 0x1fe   : > { %v5286_v13 = vadd.f32 %v5285_v12, %v5284_v45  ;;  %v1901_v14 = vpop.f32.mrb[6].mxu1  ;;  %v5287_v15 = vpop.f32.mrb[6].mxu0  ;;  %v1946_v21 = vrot.slane %v1899_v11, 4  ;;  %v5561_v45 = vld [vmem:[%s6026_s30 + $0x1c] ss:$12 sps:$4 sm:$0xff]  }
 0x1ff   : > { %v1902_v17 = vpop.f32.mrb[7].mxu1  ;;  %v5288_v20 = vpop.f32.mrb[7].mxu0  ;;  %v5562_v12 = vld [vmem:[%s6026_s30 + $0x30] ss:$12 sps:$4 sm:$0xff]   ;;  %v5565_v14 = vld [vmem:[%s6026_s30 + $0x48] ss:$12 sps:$4 sm:$0xff]  }
 0x200   : > { %v1947_v22 = vrot.slane %v5286_v13, 4  ;;  %v5567_v13 = vld [vmem:[%s6026_s30 + $0x4c] ss:$12 sps:$4 sm:$0xff]   ;;  %v5570_v15 = vld [vmem:[%s6026_s30 + $0x64] ss:$12 sps:$4 sm:$0xff]  }
 0x201   : > { %v5568_v17 = vld [vmem:[%s6026_s30 + $0x60] ss:$12 sps:$4 sm:$0xff]   ;;  %v5573_v20 = vld [vmem:[%s6026_s30 + $0x7c] ss:$12 sps:$4 sm:$0xff]  }
 0x202   : > { %v5458_v23 = vpack.i.bf16 %v1947_v22, %v1946_v21  ;;  %v5571_v21 = vld [vmem:[%s6026_s30 + $0x78] ss:$12 sps:$4 sm:$0xff]   ;;  %v5576_v22 = vld [vmem:[%s6026_s30 + $0x94] ss:$12 sps:$4 sm:$0xff]  }
 0x204   : > { %5459 = vrot.lane.b32.xlu1 %v5458_v23, %s7020_s23  ;;  %v5574_v23 = vld [vmem:[%s6026_s30 + $0x90] ss:$12 sps:$4 sm:$0xff]   ;;  %s7031_s23 = smov 96  }
 0x208   : > { %1961 = vperm.xlu1 %5463, %v1100_v24   ;;  %v5579_v24 = vld [vmem:[%s6026_s30 + $0xac] ss:$12 sps:$4 sm:$0xff]  }
 0x276   : > { %v5460_v43 = vpop.permute.xlu1 %5459 }
 0x277   : > { %v5462_v46 = vunpack.i.h.bf16 %v5460_v43  ;;  %v5461_v50 = vunpack.i.l.bf16 %v5460_v43  ;;  %v5600_v43 = vld [vmem:[%s6026_s30 + $0x154] ss:$12 sps:$4 sm:$0xff]  }
 0x279   : > { %v1956_v52 = vsel %vm1555_vm0, %v1899_v11, %v5462_v46  ;;  %v1952_v55 = vsel %vm1412_vm8, %v5461_v50, %v5462_v46  ;;  %v5564_v11 = vld [vmem:[%s6026_s30 + $0x34] ss:$12 sps:$4 sm:$0xff]   ;;  %v5598_v46 = vld [vmem:[%s6026_s30 + $0x150] ss:$12 sps:$4 sm:$0xff]   ;;  %v5603_v50 = vld [vmem:[%s6026_s30 + $0x16c] ss:$12 sps:$4 sm:$0xff]  }
 0x27a   : > { %v1958_v56 = vpack.c.bf16 %v1956_v52, %v1956_v52  ;;  %v1955_v44 = vsel %vm1555_vm0, %v1897_v10, %v1952_v55  ;;  %v5559_v10 = vld [vmem:[%s6026_s30 + $0x18] ss:$12 sps:$4 sm:$0xff]   ;;  %v5604_v52 = vld [vmem:[%s6026_s30 + $0xc8] ss:$12 sps:$4 sm:$0xff]  }
 0x27b   : > { %v1957_v57 = vpack.c.bf16 %v1955_v44, %v1955_v44  ;;  %v5605_v55 = vld [vmem:[%s6026_s30 + $0x8] ss:$12 sps:$4 sm:$0xff]   ;;  %v5607_v44 = vld [vmem:[%s6026_s30 + $0x20] ss:$12 sps:$4 sm:$0xff]  }
 0x27c   : > { %4995 = vmatprep.subr.msk.bf16.mxu0 %vm1555_vm0, %v1958_v56  ;;  %v5606_v56 = vld [vmem:[%s6026_s30 + $0xe0] ss:$12 sps:$4 sm:$0xff]  }
 0x27d   : > { %v1968_v59 = vsel %vm1555_vm0, %v1957_v57, 0  ;;  %v5608_v57 = vld [vmem:[%s6026_s30 + $0xf8] ss:$12 sps:$4 sm:$0xff]  }
 0x27e   : > { %1974 = vmatpush1.bf16.msra.mxu0 %v1968_v59  ;;  %v5610_v59 = vld [vmem:[%s6026_s30 + $0x110] ss:$12 sps:$4 sm:$0xff]  }
 0x27f   : > { %2547 = vmatprep.subr.bf16.mxu0 %v5558_v58  ;;  %v5609_v58 = vld [vmem:[%s6026_s30 + $0x38] ss:$12 sps:$4 sm:$0xff]  }
 0x281   : > { %4996 = vmatmul.mubr.msk.bf16.vlgmr.msra.gmra.mrb[8].mxu0 %vm1551_vm1, %v1099_v60  ;;  %v5611_v60 = vld [vmem:[%s6026_s30 + $0x50] ss:$12 sps:$4 sm:$0xff]  }
 0x282   : > { %2548 = vmatpush1.bf16.msra.mxu0 %v5556_v48  ;;  %2579 = vmatprep.mubr.bf16.mxu0 %v6425_v4  ;;  %v5612_v48 = vld [vmem:[%s6026_s30 + $0x128] ss:$12 sps:$4 sm:$0xff]  }
 0x283   : > { %2549 = vmatprep.subr.bf16.mxu0 %v5561_v45  ;;  %v5614_v45 = vld [vmem:[%s6026_s30 + $0x140] ss:$12 sps:$4 sm:$0xff]  }
 0x286   : > { %2550 = vmatpush1.bf16.msra.mxu0 %v5559_v10  ;;  %v5615_v10 = vld [vmem:[%s6026_s30 + $0x80] ss:$12 sps:$4 sm:$0xff]  }
 0x287   : > { %2551 = vmatprep.subr.bf16.mxu0 %v5564_v11  ;;  %v5616_v11 = vld [vmem:[%s6026_s30 + $0x158] ss:$12 sps:$4 sm:$0xff]  }
 0x28a   : > { %2552 = vmatpush1.bf16.msra.mxu0 %v5562_v12  ;;  %v5643_v12 = vld [vmem:[%s6021_s24 + $0x104] ss:$8 sps:$4 sm:$0xff]  }
 0x28b   : > { %2553 = vmatprep.subr.bf16.mxu0 %v5567_v13  ;;  %v5641_v13 = vld [vmem:[%s6021_s24 + $0x100] ss:$8 sps:$4 sm:$0xff]   ;;  %2130 = vmatprep.subr.bf16.mxu1 %v5643_v12 }
 0x28c   : > { %2131 = vmatpush1.bf16.msra.mxu1 %v5641_v13 }
 0x28e   : > { %2554 = vmatpush1.bf16.msra.mxu0 %v5565_v14  ;;  %v5617_v14 = vld [vmem:[%s6026_s30 + $0x98] ss:$12 sps:$4 sm:$0xff]  }
 0x28f   : > { %2555 = vmatprep.subr.bf16.mxu0 %v5570_v15  ;;  %v5618_v15 = vld [vmem:[%s6026_s30 + $0x170] ss:$12 sps:$4 sm:$0xff]  }
 0x292   : > { %2556 = vmatpush1.bf16.msra.mxu0 %v5568_v17  ;;  %v5646_v17 = vld [vmem:[%s6021_s24 + $0x114] ss:$8 sps:$4 sm:$0xff]  }
 0x293   : > { %2557 = vmatprep.subr.bf16.mxu0 %v5573_v20  ;;  %v5644_v20 = vld [vmem:[%s6021_s24 + $0x110] ss:$8 sps:$4 sm:$0xff]   ;;  %2132 = vmatprep.subr.bf16.mxu1 %v5646_v17 }
 0x294   : > { %2133 = vmatpush1.bf16.msra.mxu1 %v5644_v20 }
 0x296   : > { %2558 = vmatpush1.bf16.msra.mxu0 %v5571_v21  ;;  %v5619_v21 = vld [vmem:[%s6026_s30 + $0xb0] ss:$12 sps:$4 sm:$0xff]  }
 0x297   : > { %2559 = vmatprep.subr.bf16.mxu0 %v5576_v22  ;;  %v5649_v22 = vld [vmem:[%s6021_s24 + $0x4] ss:$8 sps:$4 sm:$0xff]  }
 0x298   : > { %2250 = vmatprep.subr.bf16.mxu1 %v5649_v22 }
 0x29a   : > { %2560 = vmatpush1.bf16.msra.mxu0 %v5574_v23  ;;  %v1962_v23 = vpop.permute.xlu1 %1961 }
 0x29b   : > { %2561 = vmatprep.subr.bf16.mxu0 %v5579_v24 }
 0x29e   : > { %2562 = vmatpush1.bf16.msra.mxu0 %v5577_v25 }
 0x29f   : > { %2563 = vmatprep.subr.bf16.mxu0 %v5582_v26 }
 0x2a2   : > { %2564 = vmatpush1.bf16.msra.mxu0 %v5580_v27 }
 0x2a3   : > { %2565 = vmatprep.subr.bf16.mxu0 %v5585_v29 }
 0x2a6   : > { %2566 = vmatpush1.bf16.msra.mxu0 %v5583_v30 }
 0x2a7   : > { %2567 = vmatprep.subr.bf16.mxu0 %v5588_v31 }
 0x2aa   : > { %2568 = vmatpush1.bf16.msra.mxu0 %v5586_v32 }
 0x2ab   : > { %2569 = vmatprep.subr.bf16.mxu0 %v5591_v33 }
 0x2ae   : > { %2570 = vmatpush1.bf16.msra.mxu0 %v5589_v34 }
 0x2af   : > { %2571 = vmatprep.subr.bf16.mxu0 %v5594_v36 }
 0x2b2   : > { %2572 = vmatpush1.bf16.msra.mxu0 %v5592_v39  ;;  %v5647_v39 = vld [vmem:[%s6021_s24] ss:$8 sps:$4 sm:$0xff]  }
 0x2b3   : > { %2573 = vmatprep.subr.bf16.mxu0 %v5597_v40  ;;  %v5652_v40 = vld [vmem:[%s6021_s24 + $0x14] ss:$8 sps:$4 sm:$0xff]  }
 0x2b6   : > { %2574 = vmatpush1.bf16.msra.mxu0 %v5595_v42  ;;  %v5650_v42 = vld [vmem:[%s6021_s24 + $0x10] ss:$8 sps:$4 sm:$0xff]  }
 0x2b7   : > { %2575 = vmatprep.subr.bf16.mxu0 %v5600_v43  ;;  %v5655_v43 = vld [vmem:[%s6021_s24 + $0x24] ss:$8 sps:$4 sm:$0xff]  }
 0x2ba   : > { %2576 = vmatpush1.bf16.msra.mxu0 %v5598_v46  ;;  %v5653_v46 = vld [vmem:[%s6021_s24 + $0x20] ss:$8 sps:$4 sm:$0xff]  }
 0x2bb   : > { %2577 = vmatprep.subr.bf16.mxu0 %v5603_v50  ;;  %v5658_v50 = vld [vmem:[%s6021_s24 + $0x34] ss:$8 sps:$4 sm:$0xff]  }
 0x2be   : > { %2578 = vmatpush1.bf16.msra.mxu0 %v5601_v51  ;;  %v5656_v51 = vld [vmem:[%s6021_s24 + $0x30] ss:$8 sps:$4 sm:$0xff]  }
 0x2bf   : > { %5290 = vmatprep.subr.bf16.mxu0 %v5604_v52  ;;  %v5661_v52 = vld [vmem:[%s6021_s24 + $0x44] ss:$8 sps:$4 sm:$0xff]  }
 0x2c1   : > { %2580 = vmatmul.mubr.bf16.vlgmr.msra.gmra.mrb[12].mxu0 %v6429_v5 }
 0x2c2   : > { %5291 = vmatpush3.bf16.msra.mxu0 %v5605_v55  ;;  %2620 = vmatprep.mubr.bf16.mxu0 %v6425_v4  ;;  %v5613_v4 = vld [vmem:[%s6026_s30 + $0x68] ss:$12 sps:$4 sm:$0xff]  }
 0x2c3   : > { %5292 = vmatprep.subr.bf16.mxu0 %v5606_v56  ;;  %v5659_v55 = vld [vmem:[%s6021_s24 + $0x40] ss:$8 sps:$4 sm:$0xff]   ;;  %v5664_v56 = vld [vmem:[%s6021_s24 + $0x54] ss:$8 sps:$4 sm:$0xff]  }
 0x2c6   : > { %5293 = vmatpush3.bf16.msra.mxu0 %v5607_v44  ;;  %v5662_v44 = vld [vmem:[%s6021_s24 + $0x50] ss:$8 sps:$4 sm:$0xff]  }
 0x2c7   : > { %5294 = vmatprep.subr.bf16.mxu0 %v5608_v57  ;;  %v5667_v57 = vld [vmem:[%s6021_s24 + $0x64] ss:$8 sps:$4 sm:$0xff]  }
 0x2ca   : > { %5295 = vmatpush3.bf16.msra.mxu0 %v5609_v58  ;;  %v5665_v58 = vld [vmem:[%s6021_s24 + $0x60] ss:$8 sps:$4 sm:$0xff]  }
 0x2cb   : > { %5296 = vmatprep.subr.bf16.mxu0 %v5610_v59  ;;  %v5670_v59 = vld [vmem:[%s6021_s24 + $0x74] ss:$8 sps:$4 sm:$0xff]  }
 0x2ce   : > { %5297 = vmatpush3.bf16.msra.mxu0 %v5611_v60  ;;  %v5668_v60 = vld [vmem:[%s6021_s24 + $0x70] ss:$8 sps:$4 sm:$0xff]  }
 0x2cf   : > { %5298 = vmatprep.subr.bf16.mxu0 %v5612_v48  ;;  %v5673_v48 = vld [vmem:[%s6021_s24 + $0x84] ss:$8 sps:$4 sm:$0xff]  }
 0x2d2   : > { %5299 = vmatpush3.bf16.msra.mxu0 %v5613_v4  ;;  %v5671_v4 = vld [vmem:[%s6021_s24 + $0x80] ss:$8 sps:$4 sm:$0xff]  }
 0x2d3   : > { %5300 = vmatprep.subr.bf16.mxu0 %v5614_v45 }
 0x2d6   : > { %5301 = vmatpush3.bf16.msra.mxu0 %v5615_v10 }
 0x2d7   : > { %5302 = vmatprep.subr.bf16.mxu0 %v5616_v11 }
 0x2da   : > { %5303 = vmatpush3.bf16.msra.mxu0 %v5617_v14 }
 0x2db   : > { %5304 = vmatprep.subr.bf16.mxu0 %v5618_v15 }
 0x2de   : > { %5305 = vmatpush3.bf16.msra.mxu0 %v5619_v21 }
 0x2e1   : > { %2621 = vmatmul.mubr.bf16.vlgmr.msra.gmra.mrb[16].mxu0 %v6429_v5 }
 0x2e2   : > { %2935 = vmatprep.mubr.bf16.mxu0 %v5941_v0 }
 0x354   : > { %v2007_v24 = vpop.f32.mrb[8].mxu0 }
 0x355   : > { %v2008_v25 = vadd.f32 %v2007_v24, %v1962_v23  ;;  %v2009_v26 = vpop.f32.mrb[9].mxu0 }
 0x356   : > { %v2010_v27 = vadd.f32 %v2009_v26, %v1962_v23  ;;  %v2011_v29 = vpop.f32.mrb[10].mxu0  ;;  %v5955_v23 = vmov 0.0  }
 0x357   : > { %v2014_v30 = vmax.f32 %v2008_v25, 0.0  ;;  %v2012_v31 = vpop.f32.mrb[11].mxu0 }
 0x358   : > { %v2015_v32 = vmax.f32 %v2010_v27, 0.0 }
 0x359   : > { %v2016_v33 = vpack.c.bf16 %v2014_v30, %v2014_v30 }
 0x35a   : > { %v2017_v34 = vpack.c.bf16 %v2015_v32, %v2015_v32 }
 0x35b   : > { %v2020_v36 = vrot.slane %v2016_v33, 2 }
 0x35c   : > { %v2021_v5 = vrot.slane %v2017_v34, 2 }
 0x35e   : > { %5015 = vmatprep.mubr.msk.bf16.mxu1 %vm1255_vm2, %v2021_v5  ;;  %v1031_v5 = vld [vmem:[%s5986_s21] sm:$0xff] }
 0x35f   : > { %2149 = vmatmul.mubr.bf16.vlgmr.msra.gmra.mrb[8].mxu1 %v2020_v36  ;;  %v1202_v36 = vld [vmem:[%s6036_s12] sm:$0xff] }
 0x360   : > { %2251 = vmatpush1.bf16.msra.mxu1 %v5647_v39  ;;  %5034 = vmatprep.mubr.msk.bf16.mxu1 %vm1255_vm2, %v2017_v34  ;;  %v1032_v34 = vld [vmem:[%s5991_s25] sm:$0xff] }
 0x361   : > { %2252 = vmatprep.subr.bf16.mxu1 %v5652_v40 }
 0x364   : > { %2253 = vmatpush1.bf16.msra.mxu1 %v5650_v42 }
 0x365   : > { %2254 = vmatprep.subr.bf16.mxu1 %v5655_v43 }
 0x368   : > { %2255 = vmatpush1.bf16.msra.mxu1 %v5653_v46 }
 0x369   : > { %2256 = vmatprep.subr.bf16.mxu1 %v5658_v50 }
 0x36c   : > { %2257 = vmatpush1.bf16.msra.mxu1 %v5656_v51 }
 0x36d   : > { %2258 = vmatprep.subr.bf16.mxu1 %v5661_v52 }
 0x370   : > { %2259 = vmatpush1.bf16.msra.mxu1 %v5659_v55 }
 0x371   : > { %2260 = vmatprep.subr.bf16.mxu1 %v5664_v56 }
 0x374   : > { %2261 = vmatpush1.bf16.msra.mxu1 %v5662_v44 }
 0x375   : > { %2262 = vmatprep.subr.bf16.mxu1 %v5667_v57 }
 0x378   : > { %2263 = vmatpush1.bf16.msra.mxu1 %v5665_v58 }
 0x379   : > { %2264 = vmatprep.subr.bf16.mxu1 %v5670_v59 }
 0x37c   : > { %2265 = vmatpush1.bf16.msra.mxu1 %v5668_v60 }
 0x37d   : > { %2266 = vmatprep.subr.bf16.mxu1 %v5673_v48 }
 0x380   : > { %2267 = vmatpush1.bf16.msra.mxu1 %v5671_v4 }
 0x381   : > { %5360 = vmatprep.subr.bf16.mxu1 %v5955_v23 }
 0x383   : > { %2283 = vmatmul.mubr.bf16.vlgmr.msra.gmra.mrb[8].mxu1 %v2016_v33 }
 0x384   : > { %5362 = vmatprep.mubr.msk.bf16.mxu1 %vm7028_vm10, %v5955_v23  ;;  %vm7030_vm10 = vcmask 1046528  }
 0x394   : > { %v2581_v45 = vpop.f32.mrb[12].mxu0 }
 0x395   : > { %v2638_v10 = vrot.slane %v2581_v45, 5  ;;  %v2583_v11 = vpop.f32.mrb[13].mxu0  ;;  %v2633_v12 = vrot.slane %v2581_v45, 6  ;;  %v2629_v13 = vrot.slane %v2581_v45, 7 }
 0x396   : > { %v2639_v14 = vrot.slane %v2583_v11, 5  ;;  %v2585_v15 = vpop.f32.mrb[14].mxu0  ;;  %v2646_v21 = vrot.slane %v2583_v11, 4  ;;  %v2650_v22 = vrot.slane %v2583_v11, 3  ;;  %v2655_v30 = vrot.slane %v2583_v11, 2 }
 0x397   : > { %2634 = vrot.lane.b32.xlu1 %v2633_v12, %s7034_s1  ;;  %2630 = vrot.lane.b32.xlu0 %v2629_v13, %s7033_s26  ;;  %v2586_v17 = vpop.f32.mrb[15].mxu0  ;;  %s7060_s26 = sld [smem:[#allocation10_spill]]  ;;  %s7062_s1 = sld [smem:[#allocation12_spill]] }
 0x398   : > { %v5464_v20 = vpack.i.bf16 %v2639_v14, %v2638_v10 }
 0x39b   : > { %2647 = vrot.lane.b32.xlu1 %v2646_v21, %s7031_s23  ;;  %5465 = vrot.lane.b32.xlu0 %v5464_v20, %s7026_s22  ;;  %s7027_s22 = smov 104   ;;  %s7059_s23 = sld [smem:[#allocation6_spill]] }
 0x39f   : > { %2651 = vrot.lane.b32.xlu0 %v2650_v22, %s7029_s18  ;;  %s7057_s18 = sld [smem:[#allocation5_spill]] }
 0x3b4   : > { %v5306_v24 = vpop.f32.mrb[16].mxu0 }
 0x3b5   : > { %v5307_v25 = vpop.f32.mrb[17].mxu0 }
 0x3b6   : > { %v5308_v26 = vadd.f32 %v5307_v25, %v5306_v24  ;;  %v5309_v27 = vpop.f32.mrb[18].mxu0  ;;  %v5679_v25 = vld [vmem:[%s7057_s18 + $0x3c] ss:$8 sps:$4 sm:$0xff]  }
 0x3b7   : > { %v5310_v29 = vpop.f32.mrb[19].mxu0  ;;  %v1212_v27 = vld [vmem:[%s7057_s18 + $0x48] sm:$0xff] }
 0x3b8   : > { %v2656_v31 = vrot.slane %v5308_v26, 2  ;;  %v2663_v32 = vrot.slane %v5308_v26, 1  ;;  %v5677_v26 = vld [vmem:[%s7057_s18 + $0x38] ss:$8 sps:$4 sm:$0xff]   ;;  %v5089_v29 = vcombine.high %v1212_v27, %v1212_v27 }
 0x3ba   : > { %2664 = vrot.lane.b32.xlu0 %v2663_v32, %s7027_s22  ;;  %v5469_v33 = vpack.i.bf16 %v2656_v31, %v2655_v30  ;;  %s7056_s22 = sld [smem:[#allocation4_spill]]  ;;  %v5088_v30 = vcombine.low %v1212_v27, %v1212_v27  ;;  %v5684_v32 = vld [vmem:[%s7057_s18 + $0x4] ss:$8 sps:$4 sm:$0xff]   ;;  %v2957_v27 = vld [vmem:[%s7060_s26] sm:$0x3]  ;;  %s7064_s26 = smov 112  }
 0x3bc   : > { %5470 = vrot.lane.b32.xlu1 %v5469_v33, %s7035_s11  ;;  %v2766_v31 = vsel %vm1555_vm0, %v5088_v30, 0  ;;  %v5690_v30 = vld [vmem:[%s7062_s1] ss:$12 sps:$4 sm:$0xff]  }
 0x3be   : > { %2946 = vperm.xlu0 %5457, %v1032_v34  }
 0x3c0   : > { %2683 = vperm.xlu1 %5463, %v1202_v36   ;;  %v1201_v14 = vld [vmem:[%s7056_s22] sm:$0xf]  ;;  %s7058_s22 = smov 127  }
 0x3c4   : > { %1537 = vperm.xlu1 %5463, %v1031_v5  }
 0x409   : > { %v2631_v39 = vpop.permute.xlu0 %2630  ;;  %v2635_v42 = vpop.permute.xlu1 %2634 }
 0x40a   : > { %v2668_v50 = vsel %vm2667_vm11, %v2581_v45, %v2631_v39 }
 0x40b   : > { %v2670_v52 = vsel %vm2669_vm12, %v2668_v50, %v2635_v42  ;;  %v5687_v50 = vld [vmem:[%s7057_s18 + $0x14] ss:$8 sps:$4 sm:$0xff]  }
 0x40d   : > { %v5466_v40 = vpop.permute.xlu0 %5465  ;;  %v2648_v55 = vpop.permute.xlu1 %2647 }
 0x40e   : > { %v5468_v43 = vunpack.i.h.bf16 %v5466_v40  ;;  %v5467_v46 = vunpack.i.l.bf16 %v5466_v40 }
 0x410   : > { %v2644_v51 = vsel %vm1551_vm1, %v5467_v46, %v5468_v43  ;;  %v5682_v43 = vld [vmem:[%s7057_s18] ss:$8 sps:$4 sm:$0xff]  }
 0x411   : > { %v2672_v56 = vsel %vm2671_vm13, %v2670_v52, %v2644_v51  ;;  %v2652_v44 = vpop.permute.xlu0 %2651  ;;  %v1207_v51 = vld [vmem:[%s7057_s18 + $0x20] sm:$0xff]  ;;  %v5685_v52 = vld [vmem:[%s7057_s18 + $0x10] ss:$8 sps:$4 sm:$0xff]  }
 0x412   : > { %v2673_v57 = vsel %vm1555_vm0, %v2672_v56, %v2648_v55  ;;  %v5097_v55 = vcombine.high %v1207_v51, %v1207_v51  ;;  %v5096_v56 = vcombine.low %v1207_v51, %v1207_v51  ;;  %v5705_v51 = vld [vmem:[%s7062_s1 + $0x78] ss:$12 sps:$4 sm:$0xff]  }
 0x413   : > { %v2675_v48 = vsel %vm2674_vm14, %v2673_v57, %v2652_v44 }
 0x414   : > { %v2841_v44 = vsel %vm1555_vm0, %v5096_v56, 0  ;;  %v5713_v56 = vld [vmem:[%s7062_s1 + $0xac] ss:$12 sps:$4 sm:$0xff]  }
 0x42c   : > { %v2665_v45 = vpop.permute.xlu0 %2664 }
 0x42e   : > { %v5471_v58 = vpop.permute.xlu1 %5470 }
 0x42f   : > { %v5473_v59 = vunpack.i.h.bf16 %v5471_v58  ;;  %v5472_v60 = vunpack.i.l.bf16 %v5471_v58 }
 0x431   : > { %v2661_v4 = vsel %vm1255_vm2, %v5472_v60, %v5473_v59 }
 0x432   : > { %v2677_v10 = vsel %vm7032_vm15, %v2675_v48, %v2661_v4  ;;  %vm2893_vm15 = vcmask 31744  }
 0x433   : > { %v2679_v11 = vsel %vm7030_vm10, %v2677_v10, %v2665_v45  ;;  %vm2761_vm10 = vcmask 326656  }
 0x434   : > { %v2680_v12 = vpack.c.bf16 %v2679_v11, %v2679_v11 }
 0x436   : > { %v2690_v13 = vsel %vm1555_vm0, %v2680_v12, 0  ;;  %v1213_v12 = vld [vmem:[%s7059_s23] sm:$0xf]  ;;  %s7061_s23 = smov 113  }
 0x437   : > { %5361 = vmatpush3.bf16.msra.mxu1 %v2690_v13 }
 0x43a   : > { %5363 = vmatmul.mubr.msk.bf16.vlgmr.msra.gmra.mrb[12].mxu1 %vm1551_vm1, %v1201_v14 }
 0x43b   : > { %2803 = vmatprep.mubr.bf16.mxu1 %v5941_v0 }
 0x43f   : > { %v2684_v15 = vpop.permute.xlu1 %2683 }
 0x443   : > { %v1538_v17 = vpop.permute.xlu1 %1537 }
 0x444   : > { %v1540_v20 = vadd.f32 %v1538_v17, %v6436_v6  ;;  %v1541_v21 = vadd.f32 %v1538_v17, %v6438_v7  ;;  %v5674_v6 = vld [vmem:[%s7057_s18 + $0x28] ss:$8 sps:$4 sm:$0xff]   ;;  %v5676_v7 = vld [vmem:[%s7057_s18 + $0x2c] ss:$8 sps:$4 sm:$0xff]  }
 0x445   : > { %2771 = vmatprep.subr.bf16.mxu1 %v5676_v7 }
 0x446   : > { %v6572_v22 = vmax.f32 %v1540_v20, 0.0  ;;  %v6574_v24 = vmax.f32 %v1541_v21, 0.0  ;;  %2772 = vmatpush1.bf16.msra.mxu1 %v5674_v6 }
 0x447   : > { %2773 = vmatprep.subr.bf16.mxu1 %v5679_v25 }
 0x448   : > { %3144 = vrot.lane.b32.xlu1 %v6574_v24, %s5942_s10  ;;  %3142 = vrot.lane.b32.xlu0 %v6572_v22, %s5942_s10 }
 0x44a   : > { %2774 = vmatpush1.bf16.msra.mxu1 %v5677_v26 }
 0x44b   : > { %5090 = vmatprep.subr.msk.bf16.mxu1 %vm1555_vm0, %v5089_v29  ;;  %v5692_v29 = vld [vmem:[%s7062_s1 + $0x4] ss:$12 sps:$4 sm:$0xff]  }
 0x44c   : > { %3164 = vrot.lane.b32.xlu1 %v6574_v24, %s7035_s11  ;;  %3162 = vrot.lane.b32.xlu0 %v6572_v22, %s7035_s11 }
 0x44e   : > { %2776 = vmatpush1.bf16.msra.mxu1 %v2766_v31  ;;  %v5693_v31 = vld [vmem:[%s7062_s1 + $0x18] ss:$12 sps:$4 sm:$0xff]  }
 0x44f   : > { %2846 = vmatprep.subr.bf16.mxu1 %v5684_v32  ;;  %v5695_v32 = vld [vmem:[%s7062_s1 + $0x1c] ss:$12 sps:$4 sm:$0xff]  }
 0x450   : > { %3184 = vrot.lane.b32.xlu1 %v6574_v24, %s5944_s15  ;;  %3182 = vrot.lane.b32.xlu0 %v6572_v22, %s5944_s15 }
 0x454   : > { %3204 = vrot.lane.b32.xlu1 %v6574_v24, %s5945_s16  ;;  %3202 = vrot.lane.b32.xlu0 %v6572_v22, %s5945_s16 }
 0x458   : > { %3228 = vrot.lane.b32.xlu0 %v6574_v24, %s7058_s22 }
 0x45c   : > { %3226 = vrot.lane.b32.xlu0 %v6572_v22, %s7058_s22 }
 0x50d   : > { %v2726_v33 = vpop.f32.mrb[12].mxu1 }
 0x50e   : > { %v2727_v34 = vadd.f32 %v2726_v33, %v2684_v15  ;;  %v5364_v36 = vpop.f32.mrb[13].mxu1 }
 0x50f   : > { %v2729_v5 = vpop.f32.mrb[14].mxu1  ;;  %v5698_v36 = vld [vmem:[%s7062_s1 + $0x34] ss:$12 sps:$4 sm:$0xff]  }
 0x510   : > { %v2732_v39 = vmax.f32 %v2727_v34, 0.0  ;;  %v5365_v40 = vpop.f32.mrb[15].mxu1  ;;  %v5696_v34 = vld [vmem:[%s7062_s1 + $0x30] ss:$12 sps:$4 sm:$0xff]  }
 0x511   : > { %v5701_v40 = vld [vmem:[%s7062_s1 + $0x4c] ss:$12 sps:$4 sm:$0xff]  }
 0x512   : > { %v2733_v42 = vpack.c.bf16 %v2732_v39, %v2732_v39  ;;  %v5699_v39 = vld [vmem:[%s7062_s1 + $0x48] ss:$12 sps:$4 sm:$0xff]  }
 0x514   : > { %v2735_v46 = vrot.slane %v2733_v42, 2 }
 0x516   : > { %5091 = vmatmul.mubr.msk.bf16.vlgmr.msra.gmra.mrb[8].mxu1 %vm2761_vm10, %v2735_v46  ;;  %v5702_v46 = vld [vmem:[%s7062_s1 + $0x60] ss:$12 sps:$4 sm:$0xff]  }
 0x517   : > { %2847 = vmatpush1.bf16.msra.mxu1 %v5682_v43  ;;  %2878 = vmatprep.mubr.bf16.mxu1 %v5941_v0 }
 0x518   : > { %2848 = vmatprep.subr.bf16.mxu1 %v5687_v50  ;;  %v5707_v50 = vld [vmem:[%s7062_s1 + $0x7c] ss:$12 sps:$4 sm:$0xff]  }
 0x51b   : > { %2849 = vmatpush1.bf16.msra.mxu1 %v5685_v52  ;;  %v5710_v52 = vld [vmem:[%s7062_s1 + $0x94] ss:$12 sps:$4 sm:$0xff]  }
 0x51c   : > { %5098 = vmatprep.subr.msk.bf16.mxu1 %vm1555_vm0, %v5097_v55  ;;  %v5708_v55 = vld [vmem:[%s7062_s1 + $0x90] ss:$12 sps:$4 sm:$0xff]  }
 0x51f   : > { %2851 = vmatpush1.bf16.msra.mxu1 %v2841_v44  ;;  %v5711_v44 = vld [vmem:[%s7062_s1 + $0xa8] ss:$12 sps:$4 sm:$0xff]  }
 0x522   : > { %5099 = vmatmul.mubr.msk.bf16.vlgmr.msra.gmra.mrb[8].mxu1 %vm2761_vm10, %v2733_v42  ;;  %v5704_v42 = vld [vmem:[%s7062_s1 + $0x64] ss:$12 sps:$4 sm:$0xff]  }
 0x5f5   : > { %v2880_v57 = vpop.f32.mrb[8].mxu1 }
 0x5f6   : > { %v5372_v58 = vadd.f32 %v2880_v57, %v6419_v62  ;;  %v2882_v59 = vpop.f32.mrb[9].mxu1  ;;  %v5719_v57 = vld [vmem:[%s7062_s1 + $0xc4] ss:$12 sps:$4 sm:$0xff]  }
 0x5f7   : > { %v5373_v60 = vadd.f32 %v2882_v59, %v6421_v1  ;;  %v2884_v48 = vpop.f32.mrb[10].mxu1  ;;  %v2947_v1 = vpop.permute.xlu0 %2946  ;;  %v5724_v59 = vld [vmem:[%s7062_s1 + $0xdc] ss:$12 sps:$4 sm:$0xff]  }
 0x5f8   : > { %v2891_v4 = vpack.c.bf16 %v5372_v58, %v5372_v58  ;;  %v2885_v45 = vpop.f32.mrb[11].mxu1  ;;  %v5717_v58 = vld [vmem:[%s7062_s1 + $0xc0] ss:$12 sps:$4 sm:$0xff]  }
 0x5f9   : > { %v2892_v10 = vpack.c.bf16 %v5373_v60, %v5373_v60  ;;  %v5722_v60 = vld [vmem:[%s7062_s1 + $0xd8] ss:$12 sps:$4 sm:$0xff]   ;;  %v5729_v48 = vld [vmem:[%s7062_s1 + $0xf4] ss:$12 sps:$4 sm:$0xff]  }
 0x5fa   : > { %v2898_v11 = vsel %vm2669_vm12, %v2891_v4, 0  ;;  %v5727_v4 = vld [vmem:[%s7062_s1 + $0xf0] ss:$12 sps:$4 sm:$0xff]   ;;  %v5734_v45 = vld [vmem:[%s7062_s1 + $0x10c] ss:$12 sps:$4 sm:$0xff]  }
 0x5fb   : > { %5100 = vmatprep.subr.msk.bf16.mxu0 %vm2669_vm12, %v2892_v10  ;;  %v5732_v10 = vld [vmem:[%s7062_s1 + $0x108] ss:$12 sps:$4 sm:$0xff]  }
 0x5fc   : > { %2904 = vmatpush1.bf16.msra.mxu0 %v2898_v11  ;;  %v5739_v11 = vld [vmem:[%s7062_s1 + $0x124] ss:$12 sps:$4 sm:$0xff]  }
 0x5ff   : > { %5101 = vmatmul.mubr.msk.bf16.vlgmr.msra.gmra.mrb[20].mxu0 %vm2893_vm15, %v1213_v12  ;;  %v3143_v12 = vpop.permute.xlu0 %3142 }
 0x600   : > { %3436 = vmatprep.mubr.bf16.mxu0 %v5941_v0 }
 0x6d2   : > { %v2937_v13 = vpop.f32.mrb[20].mxu0 }
 0x6d3   : > { %v2938_v62 = vadd.f32 %v2937_v13, %v6440_v8  ;;  %v2939_v14 = vpop.f32.mrb[21].mxu0  ;;  %v5737_v13 = vld [vmem:[%s7062_s1 + $0x120] ss:$12 sps:$4 sm:$0xff]  }
 0x6d4   : > { %v2940_v15 = vadd.f32 %v2939_v14, %v6442_v9  ;;  %v2941_v17 = vpop.f32.mrb[22].mxu0  ;;  %v5742_v14 = vld [vmem:[%s7062_s1 + $0x138] ss:$12 sps:$4 sm:$0xff]  }
 0x6d5   : > { %v2949_v20 = vadd.f32 %v2947_v1, %v2938_v62  ;;  %v2942_v21 = vpop.f32.mrb[23].mxu0  ;;  %v5744_v62 = vld [vmem:[%s7062_s1 + $0x13c] ss:$12 sps:$4 sm:$0xff]  }
 0x6d6   : > { %v2950_v6 = vadd.f32 %v2947_v1, %v2940_v15  ;;  %v3163_v1 = vpop.permute.xlu0 %3162  ;;  %v5749_v15 = vld [vmem:[%s7062_s1 + $0x154] ss:$12 sps:$4 sm:$0xff]   ;;  %v5747_v17 = vld [vmem:[%s7062_s1 + $0x150] ss:$12 sps:$4 sm:$0xff]  }
 0x6d7   : > { %v6622_v7 = vmax.f32 %v2949_v20, 0.0  ;;  %v3145_v20 = vpop.permute.xlu1 %3144 }
 0x6d8   : > { %v6624_v25 = vmax.f32 %v2950_v6, 0.0  ;;  %v5754_v6 = vld [vmem:[%s7062_s1 + $0x16c] ss:$12 sps:$4 sm:$0xff]  }
 0x6d9   : > { %3230 = vrot.lane.b32.xlu1 %v6622_v7, %s7058_s22  ;;  %3146 = vrot.lane.b32.xlu0 %v6622_v7, %s5942_s10  ;;  %v3388_v8 = vpack.c.bf16 %v6622_v7, %v6622_v7 }
 0x6da   : > { %v3389_v9 = vpack.c.bf16 %v6624_v25, %v6624_v25  ;;  %v3183_v21 = vpop.permute.xlu0 %3182 }
 0x6db   : > { %v3399_v26 = vsel %vm1555_vm0, %v3388_v8, 0  ;;  %v5752_v8 = vld [vmem:[%s7062_s1 + $0x168] ss:$12 sps:$4 sm:$0xff]  }
 0x6dc   : > { %5105 = vmatprep.subr.msk.bf16.mxu0 %vm1555_vm0, %v3389_v9 }
 0x6dd   : > { %3250 = vrot.lane.b32.xlu1 %v6622_v7, %s7061_s23  ;;  %3166 = vrot.lane.b32.xlu0 %v6622_v7, %s7035_s11 }
 0x6de   : > { %3405 = vmatpush1.bf16.msra.mxu0 %v3399_v26  ;;  %v3165_v26 = vpop.permute.xlu1 %3164 }
 0x6df   : > { %3705 = vmatprep.subr.bf16.mxu0 %v5692_v29 }
 0x6e1   : > { %5106 = vmatmul.mubr.msk.bf16.vlgmr.msra.gmra.mrb[24].mxu0 %vm1551_vm1, %v2957_v27  ;;  %3148 = vrot.lane.b32.xlu1 %v6624_v25, %s5942_s10  ;;  %s7063_s10 = sld [smem:[#allocation11_spill]]  ;;  %v3203_v27 = vpop.permute.xlu0 %3202 }
 0x6e2   : > { %3186 = vrot.lane.b32.xlu0 %v6622_v7, %s5944_s15  ;;  %3706 = vmatpush1.bf16.msra.mxu0 %v5690_v30  ;;  %v3185_v29 = vpop.permute.xlu1 %3184 }
 0x6e3   : > { %3707 = vmatprep.subr.bf16.mxu0 %v5695_v32 }
 0x6e5   : > { %3168 = vrot.lane.b32.xlu1 %v6624_v25, %s7035_s11  ;;  %v6715_v30 = vpop.permute.xlu0 %3228  ;;  %s7073_s11 = smov 8  }
 0x6e6   : > { %3206 = vrot.lane.b32.xlu0 %v6622_v7, %s5945_s16  ;;  %3708 = vmatpush1.bf16.msra.mxu0 %v5693_v31  ;;  %v3205_v31 = vpop.permute.xlu1 %3204 }
 0x6e7   : > { %v2958_v33 = vld [vmem:[%s7063_s10] sm:$0xf]  ;;  %3709 = vmatprep.subr.bf16.mxu0 %v5698_v36  ;;  %s7069_s10 = smov 48  }
 0x6e9   : > { %3188 = vrot.lane.b32.xlu1 %v6624_v25, %s5944_s15  ;;  %s7065_s15 = smov 111   ;;  %v6717_v32 = vpop.permute.xlu0 %3226 }
 0x6ea   : > { %3248 = vrot.lane.b32.xlu0 %v6574_v24, %s7061_s23  ;;  %3710 = vmatpush1.bf16.msra.mxu0 %v5696_v34 }
 0x6eb   : > { %3711 = vmatprep.subr.bf16.mxu0 %v5701_v40  ;;  %v3150_v40 = vsel %vm1226_vm3, %v3143_v12, %v3145_v20 }
 0x6ed   : > { %3208 = vrot.lane.b32.xlu1 %v6624_v25, %s5945_s16  ;;  %s7066_s16 = sld [smem:[#allocation14_spill]] }
 0x6ee   : > { %3246 = vrot.lane.b32.xlu0 %v6572_v22, %s7061_s23  ;;  %3712 = vmatpush1.bf16.msra.mxu0 %v5699_v39 }
 0x6ef   : > { %3713 = vmatprep.subr.bf16.mxu0 %v5704_v42  ;;  %v3156_v42 = vsel %vm1226_vm3, 0.0, %v3143_v12 }
 0x6f1   : > { %3270 = vrot.lane.b32.xlu1 %v6622_v7, %s7064_s26 }
 0x6f2   : > { %3268 = vrot.lane.b32.xlu0 %v6574_v24, %s7064_s26  ;;  %3714 = vmatpush1.bf16.msra.mxu0 %v5702_v46 }
 0x6f3   : > { %v3024_v5 = vld [vmem:[%s7066_s16] sm:$0xff]  ;;  %3715 = vmatprep.subr.bf16.mxu0 %v5707_v50  ;;  %s7071_s16 = sld [smem:[#allocation8_spill]] }
 0x6f5   : > { %3232 = vrot.lane.b32.xlu1 %v6624_v25, %s7058_s22  ;;  %s7067_s22 = sld [smem:[#allocation7_spill]] }
 0x6f6   : > { %3266 = vrot.lane.b32.xlu0 %v6572_v22, %s7064_s26  ;;  %3716 = vmatpush1.bf16.msra.mxu0 %v5705_v51 }
 0x6f7   : > { %3717 = vmatprep.subr.bf16.mxu0 %v5710_v52  ;;  %v3159_v52 = vmul.f32 %v3150_v40, %v6284_v54 }
 0x6f9   : > { %3252 = vrot.lane.b32.xlu1 %v6624_v25, %s7061_s23  ;;  %s7068_s23 = sld [smem:[#allocation16_spill]] }
 0x6fa   : > { %3288 = vrot.lane.b32.xlu0 %v6574_v24, %s7065_s15  ;;  %3718 = vmatpush1.bf16.msra.mxu0 %v5708_v55 }
 0x6fb   : > { %v5714_v43 = vld [vmem:[%s7067_s22 + $0x4] ss:$8 sps:$4 sm:$0xff]   ;;  %3719 = vmatprep.subr.bf16.mxu0 %v5713_v56 }
 0x6fc   : > { %5104 = vmatprep.mubr.msk.bf16.mxu1 %vm1255_vm2, %v5714_v43 }
 0x6fd   : > { %3272 = vrot.lane.b32.xlu1 %v6624_v25, %s7064_s26 }
 0x6fe   : > { %3286 = vrot.lane.b32.xlu0 %v6572_v22, %s7065_s15  ;;  %3720 = vmatpush1.bf16.msra.mxu0 %v5711_v44  ;;  %v3158_v44 = vmul.f32 %v3156_v42, %v6279_v49 }
 0x6ff   : > { %3721 = vmatprep.subr.bf16.mxu0 %v5719_v57  ;;  %v5759_v9 = vld [vmem:[%s7068_s23 + $0x4] ss:$12 sps:$4 sm:$0xff]   ;;  %v3170_v57 = vsel %vm1255_vm2, %v3163_v1, %v3165_v26  ;;  %v3210_v26 = vsel %vm1313_vm5, %v3203_v27, %v3205_v31 }
 0x701   : > { %3292 = vrot.lane.b32.xlu1 %v6624_v25, %s7065_s15 }
 0x702   : > { %3392 = vperm.xlu0 %5457, %v2958_v33   ;;  %3722 = vmatpush1.bf16.msra.mxu0 %v5717_v58  ;;  %v3176_v58 = vsel %vm1255_vm2, 0.0, %v3163_v1 }
 0x703   : > { %3723 = vmatprep.subr.bf16.mxu0 %v5724_v59 }
 0x705   : > { %3290 = vrot.lane.b32.xlu1 %v6622_v7, %s7065_s15  ;;  %s7070_s15 = smov 88  }
 0x706   : > { %3803 = vperm.xlu0 %5457, %v3024_v5   ;;  %3724 = vmatpush1.bf16.msra.mxu0 %v5722_v60 }
 0x707   : > { %3725 = vmatprep.subr.bf16.mxu0 %v5729_v48 }
 0x70a   : > { %3726 = vmatpush1.bf16.msra.mxu0 %v5727_v4 }
 0x70b   : > { %3727 = vmatprep.subr.bf16.mxu0 %v5734_v45 }
 0x70e   : > { %3728 = vmatpush1.bf16.msra.mxu0 %v5732_v10 }
 0x70f   : > { %3729 = vmatprep.subr.bf16.mxu0 %v5739_v11  ;;  %v3179_v11 = vmul.f32 %v3170_v57, %v6296_v3 }
 0x712   : > { %3730 = vmatpush1.bf16.msra.mxu0 %v5737_v13  ;;  %v3190_v13 = vsel %vm1284_vm4, %v3183_v21, %v3185_v29 }
 0x713   : > { %3731 = vmatprep.subr.bf16.mxu0 %v5744_v62  ;;  %v3196_v62 = vsel %vm1284_vm4, 0.0, %v3183_v21  ;;  %v3216_v21 = vsel %vm1313_vm5, 0.0, %v3203_v27 }
 0x714   : > { %v3218_v31 = vmul.f32 %v3216_v21, %v6324_v35 }
 0x716   : > { %3732 = vmatpush1.bf16.msra.mxu0 %v5742_v14 }
 0x717   : > { %3733 = vmatprep.subr.bf16.mxu0 %v5749_v15 }
 0x71a   : > { %3734 = vmatpush1.bf16.msra.mxu0 %v5747_v17 }
 0x71b   : > { %3735 = vmatprep.subr.bf16.mxu0 %v5754_v6 }
 0x71e   : > { %3736 = vmatpush1.bf16.msra.mxu0 %v5752_v8  ;;  %v3199_v8 = vmul.f32 %v3190_v13, %v6311_v19 }
 0x71f   : > { %4389 = vmatprep.subr.bf16.mxu0 %v5759_v9 }
 0x74b   : > { %v6719_v33 = vpop.permute.xlu1 %3230  ;;  %v3147_v34 = vpop.permute.xlu0 %3146 }
 0x74c   : > { %v3157_v39 = vsel %vm1226_vm3, 0.0, %v3147_v34 }
 0x74d   : > { %v3160_v46 = vmul.f32 %v3157_v39, %v6279_v49  ;;  %v3178_v49 = vmul.f32 %v3176_v58, %v6293_v2 }
 0x74f   : > { %v6721_v36 = vpop.permute.xlu1 %3250  ;;  %v3167_v5 = vpop.permute.xlu0 %3166  ;;  %v3306_v48 = vpack.c.bf16 %v3160_v46, %v3158_v44 }
 0x750   : > { %v3177_v55 = vsel %vm1255_vm2, 0.0, %v3167_v5 }
 0x751   : > { %v3180_v4 = vmul.f32 %v3177_v55, %v6293_v2  ;;  %v3198_v2 = vmul.f32 %v3196_v62, %v6308_v18  ;;  %v3224_v55 = vmul.f32 %v6622_v7, %v6336_v47 }
 0x753   : > { %v3149_v43 = vpop.permute.xlu1 %3148  ;;  %v3308_v15 = vpack.c.bf16 %v3180_v4, %v3178_v49 }
 0x754   : > { %v3151_v50 = vsel %vm1226_vm3, %v3147_v34, %v3149_v43  ;;  %v3187_v51 = vpop.permute.xlu0 %3186  ;;  %v3219_v43 = vmul.f32 %v3210_v26, %v6327_v37  ;;  %v5895_v26 = vld [vmem:[%s5976_s13 + $0x18] ss:$0 sm:$0xff]  ;;  %vm7081_vm3 = vcmask 1045504  }
 0x755   : > { %v3161_v56 = vmul.f32 %v3151_v50, %v6284_v54  ;;  %v3197_v12 = vsel %vm1284_vm4, 0.0, %v3187_v51  ;;  %v3223_v50 = vmul.f32 %v6574_v24, %v6330_v41 }
 0x756   : > { %v3200_v17 = vmul.f32 %v3197_v12, %v6308_v18  ;;  %v3225_v18 = vmul.f32 %v6624_v25, %v6330_v41  ;;  %v3222_v25 = vmul.f32 %v6572_v22, %v6336_v47 }
 0x757   : > { %v3169_v59 = vpop.permute.xlu1 %3168  ;;  %v3307_v60 = vpack.c.bf16 %v3161_v56, %v3159_v52 }
 0x758   : > { %v3171_v45 = vsel %vm1255_vm2, %v3167_v5, %v3169_v59  ;;  %v3207_v10 = vpop.permute.xlu0 %3206  ;;  %v3310_v5 = vpack.c.bf16 %v3200_v17, %v3198_v2  ;;  %v3315_v56 = vpack.c.bf16 %v3225_v18, %v3223_v50  ;;  %v3314_v57 = vpack.c.bf16 %v3224_v55, %v3222_v25  ;;  %v5716_v18 = vld [vmem:[%s7067_s22] ss:$8 sps:$4 sm:$0xff]   ;;  %v5730_v50 = vld [vmem:[%s7062_s1 + $0xf8] ss:$12 sps:$4 sm:$0xff]   ;;  %v5736_v55 = vld [vmem:[%s7062_s1 + $0x50] ss:$12 sps:$4 sm:$0xff]  }
 0x759   : > { %v3181_v54 = vmul.f32 %v3171_v45, %v6296_v3  ;;  %3336 = vmatprep.subr.bf16.mxu1 %v3307_v60  ;;  %v3217_v3 = vsel %vm1313_vm5, 0.0, %v3207_v10  ;;  %v5746_v25 = vld [vmem:[%s7062_s1 + $0x80] ss:$12 sps:$4 sm:$0xff]  }
 0x75a   : > { %3337 = vmatpush1.bf16.msra.mxu1 %v3306_v48  ;;  %v3220_v39 = vmul.f32 %v3217_v3, %v6324_v35  ;;  %v3234_v35 = vsel %vm1354_vm6, %v6717_v32, %v6715_v30 }
 0x75b   : > { %v3189_v14 = vpop.permute.xlu1 %3188  ;;  %v3309_v1 = vpack.c.bf16 %v3181_v54, %v3179_v11  ;;  %v3242_v59 = vmul.f32 %v3234_v35, %v6360_v16  ;;  %v5745_v35 = vld [vmem:[%s7062_s1 + $0x140] ss:$12 sps:$4 sm:$0xff]  }
 0x75c   : > { %v3191_v20 = vsel %vm1284_vm4, %v3187_v51, %v3189_v14  ;;  %v3249_v6 = vpop.permute.xlu0 %3248  ;;  %v3312_v51 = vpack.c.bf16 %v3220_v39, %v3218_v31  ;;  %v5896_v39 = vld [vmem:[%s5976_s13 + $0x10] ss:$0 sm:$0xff]  ;;  %v5721_v31 = vld [vmem:[%s7062_s1 + $0x8] ss:$12 sps:$4 sm:$0xff]   ;;  %vm7082_vm4 = vcmask 1046528  }
 0x75d   : > { %v3201_v9 = vmul.f32 %v3191_v20, %v6311_v19  ;;  %3338 = vmatprep.subr.bf16.mxu1 %v3309_v1  ;;  %v3260_v32 = vsel %vm1383_vm7, %v3249_v6, 0.0 }
 0x75e   : > { %3339 = vmatpush1.bf16.msra.mxu1 %v3308_v15 }
 0x75f   : > { %v3209_v29 = vpop.permute.xlu1 %3208  ;;  %v3311_v34 = vpack.c.bf16 %v3201_v9, %v3199_v8 }
 0x760   : > { %v3211_v40 = vsel %vm1313_vm5, %v3207_v10, %v3209_v29  ;;  %v3247_v42 = vpop.permute.xlu0 %3246  ;;  %v3263_v10 = vmul.f32 %v3260_v32, %v6368_v28 }
 0x761   : > { %v3221_v19 = vmul.f32 %v3211_v40, %v6327_v37  ;;  %3340 = vmatprep.subr.bf16.mxu1 %v3311_v34  ;;  %v3240_v37 = vsel %vm1354_vm6, %v6715_v30, 0.0  ;;  %v3254_v47 = vsel %vm1383_vm7, %v3247_v42, %v3249_v6 }
 0x762   : > { %3341 = vmatpush1.bf16.msra.mxu1 %v3310_v5  ;;  %v3243_v58 = vmul.f32 %v3240_v37, %v6349_v63  ;;  %v3262_v11 = vmul.f32 %v3254_v47, %v6375_v38  ;;  %v5741_v37 = vld [vmem:[%s7062_s1 + $0x68] ss:$12 sps:$4 sm:$0xff]  }
 0x763   : > { %v3271_v27 = vpop.permute.xlu1 %3270  ;;  %v3313_v46 = vpack.c.bf16 %v3221_v19, %v3219_v43  ;;  %v5720_v43 = vld [vmem:[%s7062_s1 + $0xc8] ss:$12 sps:$4 sm:$0xff]  }
 0x764   : > { %v3269_v52 = vpop.permute.xlu0 %3268 }
 0x765   : > { %3342 = vmatprep.subr.bf16.mxu1 %v3313_v46  ;;  %v3280_v54 = vsel %vm1412_vm8, %v3269_v52, 0.0  ;;  %v5726_v46 = vld [vmem:[%s7062_s1 + $0x20] ss:$12 sps:$4 sm:$0xff]  }
 0x766   : > { %3343 = vmatpush1.bf16.msra.mxu1 %v3312_v51  ;;  %v3283_v15 = vmul.f32 %v3280_v54, %v6383_v53  ;;  %v5731_v51 = vld [vmem:[%s7062_s1 + $0x38] ss:$12 sps:$4 sm:$0xff]   ;;  %v5766_v54 = vld [vmem:[%s7068_s23 + $0x48] ss:$12 sps:$4 sm:$0xff]  }
 0x767   : > { %v3233_v44 = vpop.permute.xlu1 %3232  ;;  %3344 = vmatprep.subr.bf16.mxu1 %v3315_v56  ;;  %v5740_v56 = vld [vmem:[%s7062_s1 + $0x128] ss:$12 sps:$4 sm:$0xff]  }
 0x768   : > { %v3235_v41 = vsel %vm1354_vm6, %v6719_v33, %v3233_v44  ;;  %v3241_v24 = vsel %vm1354_vm6, %v3233_v44, 0.0  ;;  %v3267_v7 = vpop.permute.xlu0 %3266  ;;  %v5750_v44 = vld [vmem:[%s7062_s1 + $0x158] ss:$12 sps:$4 sm:$0xff]  }
 0x769   : > { %v3244_v60 = vmul.f32 %v3235_v41, %v6360_v16  ;;  %v3245_v30 = vmul.f32 %v3241_v24, %v6349_v63  ;;  %v3274_v49 = vsel %vm1412_vm8, %v3267_v7, %v3269_v52  ;;  %v5735_v52 = vld [vmem:[%s7062_s1 + $0x110] ss:$12 sps:$4 sm:$0xff]   ;;  %v5751_v41 = vld [vmem:[%s7062_s1 + $0x98] ss:$12 sps:$4 sm:$0xff]  }
 0x76a   : > { %3345 = vmatpush1.bf16.msra.mxu1 %v3314_v57  ;;  %v5755_v24 = vld [vmem:[%s7062_s1 + $0x170] ss:$12 sps:$4 sm:$0xff]  }
 0x76b   : > { %v3316_v22 = vpack.c.bf16 %v3244_v60, %v3242_v59  ;;  %v3253_v48 = vpop.permute.xlu1 %3252  ;;  %v3317_v33 = vpack.c.bf16 %v3245_v30, %v3243_v58  ;;  %v5756_v7 = vld [vmem:[%s7062_s1 + $0xb0] ss:$12 sps:$4 sm:$0xff]  }
 0x76c   : > { %v3255_v4 = vsel %vm1383_vm7, %v6721_v36, %v3253_v48  ;;  %v3261_v45 = vsel %vm1383_vm7, %v3253_v48, 0.0  ;;  %v3289_v12 = vpop.permute.xlu0 %3288 }
 0x76d   : > { %v3264_v16 = vmul.f32 %v3255_v4, %v6375_v38  ;;  %v3265_v63 = vmul.f32 %v3261_v45, %v6368_v28  ;;  %3346 = vmatprep.subr.bf16.mxu1 %v3317_v33  ;;  %v3282_v38 = vmul.f32 %v3274_v49, %v6390_v61  ;;  %v3300_v20 = vsel %vm1441_vm9, %v3289_v12, 0.0  ;;  %v5757_v4 = vld [vmem:[%s7068_s23] ss:$12 sps:$4 sm:$0xff]   ;;  %v5771_v49 = vld [vmem:[%s7068_s23 + $0x64] ss:$12 sps:$4 sm:$0xff]  }
 0x76e   : > { %3347 = vmatpush1.bf16.msra.mxu1 %v3316_v22  ;;  %v3303_v21 = vmul.f32 %v5895_v26, %v3300_v20  ;;  %v5786_v20 = vld [vmem:[%s7068_s23 + $0xdc] ss:$12 sps:$4 sm:$0xff]  }
 0x76f   : > { %v3318_v13 = vpack.c.bf16 %v3264_v16, %v3262_v11  ;;  %v3273_v62 = vpop.permute.xlu1 %3272  ;;  %v3319_v36 = vpack.c.bf16 %v3265_v63, %v3263_v10  ;;  %v5762_v10 = vld [vmem:[%s7068_s23 + $0x1c] ss:$12 sps:$4 sm:$0xff]   ;;  %v5760_v11 = vld [vmem:[%s7068_s23 + $0x18] ss:$12 sps:$4 sm:$0xff]   ;;  %v5765_v16 = vld [vmem:[%s7068_s23 + $0x34] ss:$12 sps:$4 sm:$0xff]  }
 0x770   : > { %v3275_v14 = vsel %vm1412_vm8, %v3271_v27, %v3273_v62  ;;  %v3281_v1 = vsel %vm1412_vm8, %v3273_v62, 0.0  ;;  %v3287_v8 = vpop.permute.xlu0 %3286  ;;  %v5725_v27 = vld [vmem:[%s7062_s1 + $0xe0] ss:$12 sps:$4 sm:$0xff]   ;;  %v5763_v63 = vld [vmem:[%s7068_s23 + $0x30] ss:$12 sps:$4 sm:$0xff]   ;;  %s7074_s1 = sld [smem:[#allocation18_spill]] }
 0x771   : > { %v3284_v28 = vmul.f32 %v3275_v14, %v6390_v61  ;;  %v3285_v17 = vmul.f32 %v3281_v1, %v6383_v53  ;;  %3348 = vmatprep.subr.bf16.mxu1 %v3319_v36  ;;  %v3294_v53 = vsel %vm1441_vm9, %v3287_v8, %v3289_v12  ;;  %v5768_v12 = vld [vmem:[%s7068_s23 + $0x4c] ss:$12 sps:$4 sm:$0xff]   ;;  %v5774_v62 = vld [vmem:[%s7068_s23 + $0x7c] ss:$12 sps:$4 sm:$0xff]   ;;  %v5777_v14 = vld [vmem:[%s7068_s23 + $0x94] ss:$12 sps:$4 sm:$0xff]  }
 0x772   : > { %3349 = vmatpush1.bf16.msra.mxu1 %v3318_v13  ;;  %v3302_v40 = vmul.f32 %v5896_v39, %v3294_v53  ;;  %v5769_v13 = vld [vmem:[%s7068_s23 + $0x60] ss:$12 sps:$4 sm:$0xff]   ;;  %v5772_v36 = vld [vmem:[%s7068_s23 + $0x78] ss:$12 sps:$4 sm:$0xff]   ;;  %v5775_v1 = vld [vmem:[%s7068_s23 + $0x90] ss:$12 sps:$4 sm:$0xff]  }
 0x773   : > { %v3320_v6 = vpack.c.bf16 %v3284_v28, %v3282_v38  ;;  %v3293_v3 = vpop.permute.xlu1 %3292  ;;  %v3321_v9 = vpack.c.bf16 %v3285_v17, %v3283_v15  ;;  %v5780_v15 = vld [vmem:[%s7068_s23 + $0xac] ss:$12 sps:$4 sm:$0xff]   ;;  %v5778_v38 = vld [vmem:[%s7068_s23 + $0xa8] ss:$12 sps:$4 sm:$0xff]   ;;  %v5783_v28 = vld [vmem:[%s7068_s23 + $0xc4] ss:$12 sps:$4 sm:$0xff]  }
 0x774   : > { %v3301_v2 = vsel %vm1441_vm9, %v3293_v3, 0.0  ;;  %v5781_v17 = vld [vmem:[%s7068_s23 + $0xc0] ss:$12 sps:$4 sm:$0xff]   ;;  %v5796_v53 = vld [vmem:[%s7068_s23 + $0x138] ss:$12 sps:$4 sm:$0xff]  }
 0x775   : > { %v3305_v29 = vmul.f32 %v5895_v26, %v3301_v2  ;;  %3350 = vmatprep.subr.bf16.mxu1 %v3321_v9  ;;  %v5789_v8 = vld [vmem:[%s7068_s23 + $0xf4] ss:$12 sps:$4 sm:$0xff]   ;;  %v5792_v9 = vld [vmem:[%s7068_s23 + $0x10c] ss:$12 sps:$4 sm:$0xff]   ;;  %v5795_v26 = vld [vmem:[%s7068_s23 + $0x124] ss:$12 sps:$4 sm:$0xff]  }
 0x776   : > { %3351 = vmatpush1.bf16.msra.mxu1 %v3320_v6  ;;  %v5784_v6 = vld [vmem:[%s7068_s23 + $0xd8] ss:$12 sps:$4 sm:$0xff]   ;;  %v5790_v2 = vld [vmem:[%s7068_s23 + $0x108] ss:$12 sps:$4 sm:$0xff]  }
 0x777   : > { %v3291_v61 = vpop.permute.xlu1 %3290  ;;  %v3323_v34 = vpack.c.bf16 %v3305_v29, %v3303_v21  ;;  %v5793_v21 = vld [vmem:[%s7068_s23 + $0x120] ss:$12 sps:$4 sm:$0xff]   ;;  %v5798_v29 = vld [vmem:[%s7068_s23 + $0x13c] ss:$12 sps:$4 sm:$0xff]  }
 0x778   : > { %v3295_v5 = vsel %vm1441_vm9, %v3291_v61, %v3293_v3  ;;  %v5787_v3 = vld [vmem:[%s7068_s23 + $0xf0] ss:$12 sps:$4 sm:$0xff]   ;;  %v5801_v61 = vld [vmem:[%s7068_s23 + $0x154] ss:$12 sps:$4 sm:$0xff]  }
 0x779   : > { %v3304_v42 = vmul.f32 %v5896_v39, %v3295_v5  ;;  %3352 = vmatprep.subr.bf16.mxu1 %v3323_v34  ;;  %v5799_v34 = vld [vmem:[%s7068_s23 + $0x150] ss:$12 sps:$4 sm:$0xff]   ;;  %v5804_v5 = vld [vmem:[%s7068_s23 + $0x16c] ss:$12 sps:$4 sm:$0xff]   ;;  %v5802_v39 = vld [vmem:[%s7068_s23 + $0x168] ss:$12 sps:$4 sm:$0xff]  }
 0x77b   : > { %v3322_v19 = vpack.c.bf16 %v3304_v42, %v3302_v40  ;;  %v5805_v40 = vld [vmem:[%s7068_s23 + $0xc8] ss:$12 sps:$4 sm:$0xff]  }
 0x77c   : > { %v5806_v42 = vld [vmem:[%s7068_s23 + $0x8] ss:$12 sps:$4 sm:$0xff]  }
 0x77d   : > { %3353 = vmatpush1.bf16.msra.mxu1 %v3322_v19  ;;  %v5808_v19 = vld [vmem:[%s7068_s23 + $0x20] ss:$12 sps:$4 sm:$0xff]  }
 0x77e   : > { %5314 = vmatprep.subr.bf16.mxu1 %v5720_v43  ;;  %v5807_v43 = vld [vmem:[%s7068_s23 + $0xe0] ss:$12 sps:$4 sm:$0xff]  }
 0x780   : > { %3369 = vmatmul.mubr.bf16.vlgmr.msra.gmra.mrb[16].mxu1 %v5716_v18  ;;  %v5809_v18 = vld [vmem:[%s7068_s23 + $0xf8] ss:$12 sps:$4 sm:$0xff]  }
 0x781   : > { %5315 = vmatpush3.bf16.msra.mxu1 %v5721_v31  ;;  %v3393_v57 = vpop.permute.xlu0 %3392  ;;  %v5810_v31 = vld [vmem:[%s7068_s23 + $0x38] ss:$12 sps:$4 sm:$0xff]  }
 0x782   : > { %5316 = vmatprep.subr.bf16.mxu1 %v5725_v27  ;;  %v5811_v27 = vld [vmem:[%s7068_s23 + $0x110] ss:$12 sps:$4 sm:$0xff]  }
 0x785   : > { %5317 = vmatpush3.bf16.msra.mxu1 %v5726_v46  ;;  %v5812_v46 = vld [vmem:[%s7068_s23 + $0x50] ss:$12 sps:$4 sm:$0xff]  }
 0x786   : > { %5318 = vmatprep.subr.bf16.mxu1 %v5730_v50  ;;  %v5813_v50 = vld [vmem:[%s7068_s23 + $0x128] ss:$12 sps:$4 sm:$0xff]  }
 0x789   : > { %5319 = vmatpush3.bf16.msra.mxu1 %v5731_v51  ;;  %v5814_v51 = vld [vmem:[%s7068_s23 + $0x68] ss:$12 sps:$4 sm:$0xff]  }
 0x78a   : > { %5320 = vmatprep.subr.bf16.mxu1 %v5735_v52  ;;  %v5815_v52 = vld [vmem:[%s7068_s23 + $0x140] ss:$12 sps:$4 sm:$0xff]  }
 0x78d   : > { %5321 = vmatpush3.bf16.msra.mxu1 %v5736_v55  ;;  %v5816_v55 = vld [vmem:[%s7068_s23 + $0x80] ss:$12 sps:$4 sm:$0xff]  }
 0x78e   : > { %5322 = vmatprep.subr.bf16.mxu1 %v5740_v56  ;;  %v5817_v56 = vld [vmem:[%s7068_s23 + $0x158] ss:$12 sps:$4 sm:$0xff]  }
 0x791   : > { %5323 = vmatpush3.bf16.msra.mxu1 %v5741_v37  ;;  %v5818_v37 = vld [vmem:[%s7068_s23 + $0x98] ss:$12 sps:$4 sm:$0xff]  }
 0x792   : > { %5324 = vmatprep.subr.bf16.mxu1 %v5745_v35  ;;  %v5819_v35 = vld [vmem:[%s7068_s23 + $0x170] ss:$12 sps:$4 sm:$0xff]  }
 0x795   : > { %5325 = vmatpush3.bf16.msra.mxu1 %v5746_v25  ;;  %v5820_v25 = vld [vmem:[%s7068_s23 + $0xb0] ss:$12 sps:$4 sm:$0xff]  }
 0x796   : > { %5326 = vmatprep.subr.bf16.mxu1 %v5750_v44 }
 0x799   : > { %5327 = vmatpush3.bf16.msra.mxu1 %v5751_v41 }
 0x79a   : > { %5328 = vmatprep.subr.bf16.mxu1 %v5755_v24 }
 0x79d   : > { %5329 = vmatpush3.bf16.msra.mxu1 %v5756_v7 }
 0x7b4   : > { %v3438_v58 = vpop.f32.mrb[24].mxu0 }
 0x7b5   : > { %v3439_v59 = vadd.f32 %v3438_v58, %v3393_v57  ;;  %v3440_v60 = vpop.f32.mrb[25].mxu0 }
 0x7b6   : > { %v3441_v30 = vadd.f32 %v3440_v60, %v3393_v57  ;;  %v3442_v32 = vpop.f32.mrb[26].mxu0 }
 0x7b7   : > { %v6815_v47 = vmax.f32 %v3439_v59, 0.0  ;;  %v3443_v22 = vpop.f32.mrb[27].mxu0 }
 0x7b8   : > { %v6817_v48 = vmax.f32 %v3441_v30, 0.0 }
 0x7b9   : > { %v6826_v45 = vpack.c.bf16 %v6815_v47, %v6815_v47 }
 0x7ba   : > { %v6821_v33 = vpack.c.bf16 %v6817_v48, %v6817_v48 }
 0x7bc   : > { %3737 = vmatprep.mubr.bf16.mxu0 %v6821_v33  ;;  %3778 = vmatprep.mubr.bf16.mxu1 %v6821_v33 }
 0x7bd   : > { %3738 = vmatmul.mubr.bf16.vlgmr.msra.gmra.mrb[28].mxu0 %v6826_v45  ;;  %3779 = vmatmul.mubr.bf16.vlgmr.msra.gmra.mrb[20].mxu1 %v6826_v45 }
 0x7be   : > { %4390 = vmatpush1.bf16.msra.mxu0 %v5757_v4  ;;  %4421 = vmatprep.mubr.bf16.mxu0 %v6821_v33 }
 0x7bf   : > { %4391 = vmatprep.subr.bf16.mxu0 %v5762_v10  ;;  %3847 = vmatprep.mubr.bf16.mxu1 %v5941_v0 }
 0x7c2   : > { %4392 = vmatpush1.bf16.msra.mxu0 %v5760_v11 }
 0x7c3   : > { %4393 = vmatprep.subr.bf16.mxu0 %v5765_v16 }
 0x7c6   : > { %4394 = vmatpush1.bf16.msra.mxu0 %v5763_v63 }
 0x7c7   : > { %4395 = vmatprep.subr.bf16.mxu0 %v5768_v12 }
 0x7ca   : > { %4396 = vmatpush1.bf16.msra.mxu0 %v5766_v54 }
 0x7cb   : > { %4397 = vmatprep.subr.bf16.mxu0 %v5771_v49 }
 0x7ce   : > { %4398 = vmatpush1.bf16.msra.mxu0 %v5769_v13 }
 0x7cf   : > { %4399 = vmatprep.subr.bf16.mxu0 %v5774_v62 }
 0x7d2   : > { %4400 = vmatpush1.bf16.msra.mxu0 %v5772_v36 }
 0x7d3   : > { %4401 = vmatprep.subr.bf16.mxu0 %v5777_v14 }
 0x7d6   : > { %4402 = vmatpush1.bf16.msra.mxu0 %v5775_v1 }
 0x7d7   : > { %4403 = vmatprep.subr.bf16.mxu0 %v5780_v15 }
 0x7da   : > { %4404 = vmatpush1.bf16.msra.mxu0 %v5778_v38 }
 0x7db   : > { %4405 = vmatprep.subr.bf16.mxu0 %v5783_v28 }
 0x7de   : > { %4406 = vmatpush1.bf16.msra.mxu0 %v5781_v17 }
 0x7df   : > { %4407 = vmatprep.subr.bf16.mxu0 %v5786_v20 }
 0x7e2   : > { %4408 = vmatpush1.bf16.msra.mxu0 %v5784_v6 }
 0x7e3   : > { %4409 = vmatprep.subr.bf16.mxu0 %v5789_v8 }
 0x7e6   : > { %4410 = vmatpush1.bf16.msra.mxu0 %v5787_v3 }
 0x7e7   : > { %4411 = vmatprep.subr.bf16.mxu0 %v5792_v9 }
 0x7ea   : > { %4412 = vmatpush1.bf16.msra.mxu0 %v5790_v2 }
 0x7eb   : > { %4413 = vmatprep.subr.bf16.mxu0 %v5795_v26  ;;  %v2955_v26 = vld [vmem:[%s7071_s16] sm:$0xff] }
 0x7ee   : > { %4414 = vmatpush1.bf16.msra.mxu0 %v5793_v21  ;;  %v3126_v21 = vld [vmem:[%s7074_s1] sm:$0xff] }
 0x7ef   : > { %4415 = vmatprep.subr.bf16.mxu0 %v5798_v29  ;;  %v2956_v29 = vld [vmem:[%s7076_s5] sm:$0xff]  ;;  %s1014_s5 = scalar_lea.vmem %s6121_s20, %s6139_s0 }
 0x7f2   : > { %4416 = vmatpush1.bf16.msra.mxu0 %v5796_v53 }
 0x7f3   : > { %4417 = vmatprep.subr.bf16.mxu0 %v5801_v61 }
 0x7f6   : > { %4418 = vmatpush1.bf16.msra.mxu0 %v5799_v34 }
 0x7f7   : > { %4419 = vmatprep.subr.bf16.mxu0 %v5804_v5 }
 0x7fa   : > { %4420 = vmatpush1.bf16.msra.mxu0 %v5802_v39 }
 0x7fb   : > { %5336 = vmatprep.subr.bf16.mxu0 %v5805_v40 }
 0x7fd   : > { %4422 = vmatmul.mubr.bf16.vlgmr.msra.gmra.mrb[32].mxu0 %v6826_v45 }
 0x7fe   : > { %5337 = vmatpush3.bf16.msra.mxu0 %v5806_v42  ;;  %4462 = vmatprep.mubr.bf16.mxu0 %v6821_v33 }
 0x7ff   : > { %5338 = vmatprep.subr.bf16.mxu0 %v5807_v43 }
 0x802   : > { %5339 = vmatpush3.bf16.msra.mxu0 %v5808_v19 }
 0x803   : > { %5340 = vmatprep.subr.bf16.mxu0 %v5809_v18 }
 0x806   : > { %5341 = vmatpush3.bf16.msra.mxu0 %v5810_v31 }
 0x807   : > { %5342 = vmatprep.subr.bf16.mxu0 %v5811_v27 }
 0x80a   : > { %5343 = vmatpush3.bf16.msra.mxu0 %v5812_v46 }
 0x80b   : > { %5344 = vmatprep.subr.bf16.mxu0 %v5813_v50 }
 0x80e   : > { %5345 = vmatpush3.bf16.msra.mxu0 %v5814_v51 }
 0x80f   : > { %5346 = vmatprep.subr.bf16.mxu0 %v5815_v52 }
 0x812   : > { %5347 = vmatpush3.bf16.msra.mxu0 %v5816_v55 }
 0x813   : > { %5348 = vmatprep.subr.bf16.mxu0 %v5817_v56 }
 0x816   : > { %5349 = vmatpush3.bf16.msra.mxu0 %v5818_v37 }
 0x817   : > { %5350 = vmatprep.subr.bf16.mxu0 %v5819_v35 }
 0x81a   : > { %5351 = vmatpush3.bf16.msra.mxu0 %v5820_v25 }
 0x81d   : > { %4463 = vmatmul.mubr.bf16.vlgmr.msra.gmra.mrb[36].mxu0 %v6826_v45 }
 0x81e   : > { %4769 = vmatprep.mubr.bf16.mxu0 %v5941_v0 }
 0x853   : > { %v6884_v44 = vpop.f32.mrb[16].mxu1 }
 0x854   : > { %v6886_v41 = vpop.f32.mrb[17].mxu1 }
 0x855   : > { %v6888_v24 = vpop.f32.mrb[18].mxu1 }
 0x856   : > { %v6890_v7 = vpop.f32.mrb[19].mxu1 }
 0x890   : > { %v3739_v57 = vpop.f32.mrb[28].mxu0  ;;  %v5330_v58 = vpop.f32.mrb[20].mxu1 }
 0x891   : > { %v3741_v59 = vpop.f32.mrb[29].mxu0  ;;  %v5331_v60 = vpop.f32.mrb[21].mxu1 }
 0x892   : > { %v5332_v30 = vadd.f32 %v5331_v60, %v5330_v58  ;;  %v3743_v32 = vpop.f32.mrb[30].mxu0  ;;  %v5333_v22 = vpop.f32.mrb[22].mxu1  ;;  %v3788_v45 = vrot.slane %v3741_v59, 4 }
 0x893   : > { %v3744_v33 = vpop.f32.mrb[31].mxu0  ;;  %v5334_v4 = vpop.f32.mrb[23].mxu1 }
 0x894   : > { %v3789_v10 = vrot.slane %v5332_v30, 4  ;;  %v3804_v60 = vpop.permute.xlu0 %3803 }
 0x896   : > { %v5474_v11 = vpack.i.bf16 %v3789_v10, %v3788_v45 }
 0x898   : > { %5475 = vrot.lane.b32.xlu1 %v5474_v11, %s7064_s26  ;;  %s7072_s26 = smov 96  }
 0x8d0   : > { %v6893_v16 = vpop.f32.mrb[32].mxu0 }
 0x8d1   : > { %v4480_v63 = vrot.slane %v6893_v16, 5  ;;  %v4425_v12 = vpop.f32.mrb[33].mxu0  ;;  %v4475_v54 = vrot.slane %v6893_v16, 6  ;;  %v4471_v49 = vrot.slane %v6893_v16, 7 }
 0x8d2   : > { %v4481_v13 = vrot.slane %v4425_v12, 5  ;;  %v4427_v62 = vpop.f32.mrb[34].mxu0  ;;  %v4488_v1 = vrot.slane %v4425_v12, 4  ;;  %v4492_v15 = vrot.slane %v4425_v12, 3  ;;  %v4497_v8 = vrot.slane %v4425_v12, 2 }
 0x8d3   : > { %4476 = vrot.lane.b32.xlu0 %v4475_v54, %s7069_s10  ;;  %v4428_v36 = vpop.f32.mrb[35].mxu0  ;;  %4472 = vrot.lane.b32.xlu1 %v4471_v49, %s7070_s15  ;;  %s7077_s10 = smov 104   ;;  %s7078_s15 = sld [smem:[#allocation15_spill]] }
 0x8d4   : > { %v5479_v14 = vpack.i.bf16 %v4481_v13, %v4480_v63 }
 0x8d7   : > { %4489 = vrot.lane.b32.xlu0 %v4488_v1, %s7072_s26  ;;  %5480 = vrot.lane.b32.xlu1 %v5479_v14, %s7073_s11  ;;  %s7079_s26 = smov 16   ;;  %s7080_s11 = sld [smem:[#allocation13_spill]] }
 0x8d9   : > { %v5823_v19 = vld [vmem:[%s7078_s15 + $0x94] ss:$8 sps:$4 sm:$0xff]   ;;  %v5821_v27 = vld [vmem:[%s7078_s15 + $0x90] ss:$8 sps:$4 sm:$0xff]   ;;  %v5826_v46 = vld [vmem:[%s7078_s15 + $0xa4] ss:$8 sps:$4 sm:$0xff]  }
 0x8da   : > { %v5824_v50 = vld [vmem:[%s7078_s15 + $0xa0] ss:$8 sps:$4 sm:$0xff]   ;;  %v5829_v51 = vld [vmem:[%s7078_s15 + $0xb4] ss:$8 sps:$4 sm:$0xff]   ;;  %v5827_v52 = vld [vmem:[%s7078_s15 + $0xb0] ss:$8 sps:$4 sm:$0xff]  }
 0x8db   : > { %4493 = vrot.lane.b32.xlu1 %v4492_v15, %s7075_s3  ;;  %v5832_v55 = vld [vmem:[%s7078_s15 + $0xc4] ss:$8 sps:$4 sm:$0xff]   ;;  %v5830_v56 = vld [vmem:[%s7078_s15 + $0xc0] ss:$8 sps:$4 sm:$0xff]   ;;  %v5835_v37 = vld [vmem:[%s7078_s15 + $0xd4] ss:$8 sps:$4 sm:$0xff]  }
 0x8dc   : > { %v5833_v35 = vld [vmem:[%s7078_s15 + $0xd0] ss:$8 sps:$4 sm:$0xff]   ;;  %v5838_v25 = vld [vmem:[%s7078_s15 + $0xe4] ss:$8 sps:$4 sm:$0xff]   ;;  %v5841_v58 = vld [vmem:[%s7078_s15 + $0xf4] ss:$8 sps:$4 sm:$0xff]  }
 0x8dd   : > { %v3023_v31 = vld [vmem:[%s7080_s11] sm:$0xf]  ;;  %s7083_s3 = sld [smem:[#allocation17_spill]] }
 0x8de   : > { %v5842_v36 = vld [vmem:[%s7078_s15 + $0x100] ss:$8 sps:$4 sm:$0xff]  }
 0x8f0   : > { %v5352_v38 = vpop.f32.mrb[36].mxu0 }
 0x8f1   : > { %v5353_v28 = vpop.f32.mrb[37].mxu0 }
 0x8f2   : > { %v5354_v17 = vadd.f32 %v5353_v28, %v5352_v38  ;;  %v5355_v20 = vpop.f32.mrb[38].mxu0  ;;  %v5847_v38 = vld [vmem:[%s7078_s15 + $0x114] ss:$8 sps:$4 sm:$0xff]  }
 0x8f3   : > { %v5356_v6 = vpop.f32.mrb[39].mxu0 }
 0x8f4   : > { %v4498_v3 = vrot.slane %v5354_v17, 2  ;;  %v4505_v9 = vrot.slane %v5354_v17, 1  ;;  %v5845_v17 = vld [vmem:[%s7078_s15 + $0x110] ss:$8 sps:$4 sm:$0xff]  }
 0x8f6   : > { %4506 = vrot.lane.b32.xlu1 %v4505_v9, %s7077_s10  ;;  %v5484_v2 = vpack.i.bf16 %v4498_v3, %v4497_v8  ;;  %v5850_v8 = vld [vmem:[%s7078_s15 + $0x4] ss:$8 sps:$4 sm:$0xff]  }
 0x8f8   : > { %5485 = vrot.lane.b32.xlu0 %v5484_v2, %s7079_s26 }
 0x8fa   : > { %3381 = vperm.xlu1 %5463, %v2955_v26  }
 0x8fc   : > { %4519 = vperm.xlu0 %5457, %v3126_v21  }
 0x900   : > { %4780 = vperm.xlu0 %5457, %v2956_v29   ;;  %v5897_v29 = vld [vmem:[%s6147_s7] sm:$0xff] }
 0x90a   : > { %v5476_v53 = vpop.permute.xlu1 %5475 }
 0x90b   : > { %v5478_v61 = vunpack.i.h.bf16 %v5476_v53  ;;  %v5477_v34 = vunpack.i.l.bf16 %v5476_v53 }
 0x90d   : > { %v3798_v5 = vsel %vm1555_vm0, %v3741_v59, %v5478_v61  ;;  %v3794_v39 = vsel %vm1412_vm8, %v5477_v34, %v5478_v61  ;;  %v5839_v59 = vld [vmem:[%s7078_s15 + $0xf0] ss:$8 sps:$4 sm:$0xff]   ;;  %v5898_v61 = vld [vmem:[%s6147_s7 + $0x8] sm:$0xff]  ;;  %s1019_s7 = scalar_lea.vmem %s6126_s27, %s6139_s0 }
 0x90e   : > { %v3800_v40 = vpack.c.bf16 %v3798_v5, %v3798_v5  ;;  %v3797_v42 = vsel %vm1555_vm0, %v3739_v57, %v3794_v39  ;;  %v5836_v57 = vld [vmem:[%s7078_s15 + $0xe0] ss:$8 sps:$4 sm:$0xff]  }
 0x90f   : > { %v3799_v43 = vpack.c.bf16 %v3797_v42, %v3797_v42 }
 0x910   : > { %5155 = vmatprep.subr.msk.bf16.mxu1 %vm1555_vm0, %v3800_v40 }
 0x911   : > { %v3810_v18 = vsel %vm1555_vm0, %v3799_v43, 0 }
 0x912   : > { %3816 = vmatpush1.bf16.msra.mxu1 %v3810_v18 }
 0x913   : > { %3958 = vmatprep.subr.bf16.mxu1 %v5823_v19 }
 0x915   : > { %5156 = vmatmul.mubr.msk.bf16.vlgmr.msra.gmra.mrb[24].mxu1 %vm1551_vm1, %v3023_v31 }
 0x916   : > { %3959 = vmatpush1.bf16.msra.mxu1 %v5821_v27 }
 0x917   : > { %3960 = vmatprep.subr.bf16.mxu1 %v5826_v46  ;;  %v5848_v46 = vld [vmem:[%s7078_s15] ss:$8 sps:$4 sm:$0xff]  }
 0x91a   : > { %3961 = vmatpush1.bf16.msra.mxu1 %v5824_v50 }
 0x91b   : > { %3962 = vmatprep.subr.bf16.mxu1 %v5829_v51  ;;  %v5853_v51 = vld [vmem:[%s7078_s15 + $0x14] ss:$8 sps:$4 sm:$0xff]  }
 0x91e   : > { %3963 = vmatpush1.bf16.msra.mxu1 %v5827_v52  ;;  %v5851_v52 = vld [vmem:[%s7078_s15 + $0x10] ss:$8 sps:$4 sm:$0xff]  }
 0x91f   : > { %3964 = vmatprep.subr.bf16.mxu1 %v5832_v55  ;;  %v5856_v55 = vld [vmem:[%s7078_s15 + $0x24] ss:$8 sps:$4 sm:$0xff]  }
 0x922   : > { %3965 = vmatpush1.bf16.msra.mxu1 %v5830_v56  ;;  %v5854_v56 = vld [vmem:[%s7078_s15 + $0x20] ss:$8 sps:$4 sm:$0xff]  }
 0x923   : > { %3966 = vmatprep.subr.bf16.mxu1 %v5835_v37  ;;  %v5859_v37 = vld [vmem:[%s7078_s15 + $0x34] ss:$8 sps:$4 sm:$0xff]  }
 0x926   : > { %3967 = vmatpush1.bf16.msra.mxu1 %v5833_v35  ;;  %v5857_v35 = vld [vmem:[%s7078_s15 + $0x30] ss:$8 sps:$4 sm:$0xff]  }
 0x927   : > { %3968 = vmatprep.subr.bf16.mxu1 %v5838_v25  ;;  %v5862_v25 = vld [vmem:[%s7078_s15 + $0x44] ss:$8 sps:$4 sm:$0xff]  }
 0x92a   : > { %3969 = vmatpush1.bf16.msra.mxu1 %v5836_v57  ;;  %v5860_v57 = vld [vmem:[%s7078_s15 + $0x40] ss:$8 sps:$4 sm:$0xff]  }
 0x92b   : > { %3970 = vmatprep.subr.bf16.mxu1 %v5841_v58  ;;  %v5865_v58 = vld [vmem:[%s7078_s15 + $0x54] ss:$8 sps:$4 sm:$0xff]  }
 0x92e   : > { %3971 = vmatpush1.bf16.msra.mxu1 %v5839_v59  ;;  %v5863_v59 = vld [vmem:[%s7078_s15 + $0x50] ss:$8 sps:$4 sm:$0xff]  }
 0x945   : > { %v4473_v30 = vpop.permute.xlu1 %4472  ;;  %v4477_v22 = vpop.permute.xlu0 %4476 }
 0x946   : > { %v4509_v32 = vsel %vm2667_vm11, %v6893_v16, %v4473_v30  ;;  %v5844_v16 = vld [vmem:[%s7078_s15 + $0x104] ss:$8 sps:$4 sm:$0xff]   ;;  %v5866_v30 = vld [vmem:[%s7078_s15 + $0x60] ss:$8 sps:$4 sm:$0xff]  }
 0x947   : > { %v4510_v10 = vsel %vm2669_vm12, %v4509_v32, %v4477_v22  ;;  %3972 = vmatprep.subr.bf16.mxu1 %v5844_v16  ;;  %v5871_v32 = vld [vmem:[%s7078_s15 + $0x74] ss:$8 sps:$4 sm:$0xff]   ;;  %v5869_v22 = vld [vmem:[%s7078_s15 + $0x70] ss:$8 sps:$4 sm:$0xff]  }
 0x948   : > { %3973 = vmatpush1.bf16.msra.mxu1 %v5842_v36  ;;  %v5885_v36 = vld [vmem:[%s6111_s4 + $0x4] ss:$8 sps:$4 sm:$0xff]  }
 0x949   : > { %v5481_v33 = vpop.permute.xlu1 %5480  ;;  %v4490_v63 = vpop.permute.xlu0 %4489  ;;  %3974 = vmatprep.subr.bf16.mxu1 %v5847_v38 }
 0x94a   : > { %v5483_v4 = vunpack.i.h.bf16 %v5481_v33  ;;  %v5482_v45 = vunpack.i.l.bf16 %v5481_v33  ;;  %v5874_v33 = vld [vmem:[%s7078_s15 + $0x84] ss:$8 sps:$4 sm:$0xff]  }
 0x94c   : > { %v4486_v11 = vsel %vm1551_vm1, %v5482_v45, %v5483_v4  ;;  %3975 = vmatpush1.bf16.msra.mxu1 %v5845_v17  ;;  %v5872_v4 = vld [vmem:[%s7078_s15 + $0x80] ss:$8 sps:$4 sm:$0xff]  }
 0x94d   : > { %v4494_v12 = vpop.permute.xlu1 %4493  ;;  %v4511_v54 = vsel %vm2671_vm13, %v4510_v10, %v4486_v11  ;;  %4092 = vmatprep.subr.bf16.mxu1 %v5850_v8  ;;  %v5877_v10 = vld [vmem:[%s6111_s4 + $0x2c] ss:$8 sps:$4 sm:$0xff]   ;;  %v5883_v8 = vld [vmem:[%s6111_s4] ss:$8 sps:$4 sm:$0xff]  }
 0x94e   : > { %v4512_v49 = vsel %vm1555_vm0, %v4511_v54, %v4490_v63  ;;  %v3125_v63 = vld [vmem:[%s7083_s3] sm:$0xf]  ;;  %v5880_v54 = vld [vmem:[%s6111_s4 + $0x3c] ss:$8 sps:$4 sm:$0xff]  }
 0x94f   : > { %v4513_v13 = vsel %vm2674_vm14, %v4512_v49, %v4494_v12  ;;  %v5875_v12 = vld [vmem:[%s6111_s4 + $0x28] ss:$8 sps:$4 sm:$0xff]   ;;  %v5878_v49 = vld [vmem:[%s6111_s4 + $0x38] ss:$8 sps:$4 sm:$0xff]  }
 0x968   : > { %v4507_v28 = vpop.permute.xlu1 %4506 }
 0x96a   : > { %v5486_v62 = vpop.permute.xlu0 %5485 }
 0x96b   : > { %v5488_v14 = vunpack.i.h.bf16 %v5486_v62  ;;  %v5487_v1 = vunpack.i.l.bf16 %v5486_v62 }
 0x96d   : > { %v4503_v15 = vsel %vm1255_vm2, %v5487_v1, %v5488_v14 }
 0x96e   : > { %v4514_v20 = vsel %vm7081_vm3, %v4513_v13, %v4503_v15  ;;  %v3136_v13 = vld [vmem:[%s6111_s4 + $0x48] sm:$0xff] }
 0x96f   : > { %v6943_v6 = vsel %vm7082_vm4, %v4514_v20, %v4507_v28  ;;  %v5249_v16 = vcombine.high %v3136_v13, %v3136_v13  ;;  %v5248_v62 = vcombine.low %v3136_v13, %v3136_v13 }
 0x970   : > { %v4516_v45 = vpack.c.bf16 %v6943_v6, %v6943_v6 }
 0x972   : > { %v4526_v11 = vsel %vm1555_vm0, %v4516_v45, 0 }
 0x979   : > { %v3382_v3 = vpop.permute.xlu1 %3381 }
 0x97a   : > { %v3384_v9 = vadd.f32 %v3382_v3, %v6884_v44  ;;  %v3385_v2 = vadd.f32 %v3382_v3, %v6886_v41 }
 0x97b   : > { %v4520_v14 = vpop.permute.xlu0 %4519 }
 0x97c   : > { %v3386_v26 = vmax.f32 %v3384_v9, 0.0  ;;  %v3387_v21 = vmax.f32 %v3385_v2, 0.0  ;;  %v5888_v9 = vld [vmem:[%s6111_s4 + $0x14] ss:$8 sps:$4 sm:$0xff]   ;;  %v3131_v2 = vld [vmem:[%s6111_s4 + $0x20] sm:$0xff] }
 0x97e   : > { %v4787_v53 = vadd.f32 %v5897_v29, %v3386_v26  ;;  %v4788_v34 = vadd.f32 %v5898_v61, %v3387_v21  ;;  %v5886_v26 = vld [vmem:[%s6111_s4 + $0x10] ss:$8 sps:$4 sm:$0xff]   ;;  %v5257_v21 = vcombine.high %v3131_v2, %v3131_v2  ;;  %v5256_v29 = vcombine.low %v3131_v2, %v3131_v2 }
 0x980   : > { %4789 = vst [vmem:[%s1014_s5] sm:$0xff] %v4787_v53  ;;  %4790 = vst [vmem:[%s1014_s5 + $0x8] sm:$0xff] %v4788_v34  ;;  %v4676_v53 = vsel %vm1555_vm0, %v5256_v29, 0 }
 0x9e8   : > { %v3849_v5 = vpop.f32.mrb[24].mxu1 }
 0x9e9   : > { %v3850_v39 = vadd.f32 %v3849_v5, %v3804_v60  ;;  %v3851_v40 = vpop.f32.mrb[25].mxu1 }
 0x9ea   : > { %v3852_v42 = vadd.f32 %v3851_v40, %v3804_v60  ;;  %v3853_v43 = vpop.f32.mrb[26].mxu1  ;;  %v5868_v60 = vld [vmem:[%s7078_s15 + $0x64] ss:$8 sps:$4 sm:$0xff]  }
 0x9eb   : > { %v3856_v44 = vmax.f32 %v3850_v39, 0.0  ;;  %v3854_v41 = vpop.f32.mrb[27].mxu1 }
 0x9ec   : > { %v3857_v19 = vmax.f32 %v3852_v42, 0.0  ;;  %v3137_v41 = vld [vmem:[%s6116_s6] sm:$0xf] }
 0x9ed   : > { %v3858_v18 = vpack.c.bf16 %v3856_v44, %v3856_v44 }
 0x9ee   : > { %v3859_v31 = vpack.c.bf16 %v3857_v19, %v3857_v19 }
 0x9ef   : > { %v3862_v50 = vrot.slane %v3858_v18, 2 }
 0x9f0   : > { %v3863_v27 = vrot.slane %v3859_v31, 2 }
 0x9f2   : > { %5175 = vmatprep.mubr.msk.bf16.mxu1 %vm1255_vm2, %v3863_v27 }
 0x9f3   : > { %3991 = vmatmul.mubr.bf16.vlgmr.msra.gmra.mrb[28].mxu1 %v3862_v50 }
 0x9f4   : > { %4093 = vmatpush1.bf16.msra.mxu1 %v5848_v46  ;;  %5194 = vmatprep.mubr.msk.bf16.mxu1 %vm1255_vm2, %v3859_v31  ;;  %vm7084_vm2 = vmmov 0  }
 0x9f5   : > { %4094 = vmatprep.subr.bf16.mxu1 %v5853_v51 }
 0x9f8   : > { %4095 = vmatpush1.bf16.msra.mxu1 %v5851_v52 }
 0x9f9   : > { %4096 = vmatprep.subr.bf16.mxu1 %v5856_v55 }
 0x9fc   : > { %4097 = vmatpush1.bf16.msra.mxu1 %v5854_v56  ;;  %v5899_v56 = vld [vmem:[%s6143_s2] sm:$0xff] }
 0x9fd   : > { %4098 = vmatprep.subr.bf16.mxu1 %v5859_v37 }
 0xa00   : > { %4099 = vmatpush1.bf16.msra.mxu1 %v5857_v35  ;;  %v5900_v35 = vld [vmem:[%s6143_s2 + $0x8] sm:$0xff] }
 0xa01   : > { %4100 = vmatprep.subr.bf16.mxu1 %v5862_v25 }
 0xa04   : > { %4101 = vmatpush1.bf16.msra.mxu1 %v5860_v57 }
 0xa05   : > { %4102 = vmatprep.subr.bf16.mxu1 %v5865_v58 }
 0xa08   : > { %4103 = vmatpush1.bf16.msra.mxu1 %v5863_v59 }
 0xa09   : > { %4104 = vmatprep.subr.bf16.mxu1 %v5868_v60 }
 0xa0c   : > { %4105 = vmatpush1.bf16.msra.mxu1 %v5866_v30 }
 0xa0d   : > { %4106 = vmatprep.subr.bf16.mxu1 %v5871_v32 }
 0xa10   : > { %4107 = vmatpush1.bf16.msra.mxu1 %v5869_v22 }
 0xa11   : > { %4108 = vmatprep.subr.bf16.mxu1 %v5874_v33 }
 0xa14   : > { %4109 = vmatpush1.bf16.msra.mxu1 %v5872_v4 }
 0xa15   : > { %5366 = vmatprep.subr.bf16.mxu1 %v5955_v23 }
 0xa17   : > { %4125 = vmatmul.mubr.bf16.vlgmr.msra.gmra.mrb[28].mxu1 %v3858_v18  ;;  %v4781_v18 = vpop.permute.xlu0 %4780 }
 0xa18   : > { %5367 = vmatpush3.bf16.msra.mxu1 %v4526_v11  ;;  %5368 = vmatprep.mubr.msk.bf16.mxu1 %vm7084_vm2, %v5955_v23  ;;  %v4601_v23 = vsel %vm1555_vm0, %v5248_v62, 0 }
 0xa19   : > { %4606 = vmatprep.subr.bf16.mxu1 %v5877_v10 }
 0xa1f   : > { %5369 = vmatmul.mubr.msk.bf16.vlgmr.msra.gmra.mrb[32].mxu1 %vm1551_vm1, %v3125_v63 }
 0xa20   : > { %4607 = vmatpush1.bf16.msra.mxu1 %v5875_v12  ;;  %4638 = vmatprep.mubr.bf16.mxu1 %v5941_v0 }
 0xa21   : > { %4608 = vmatprep.subr.bf16.mxu1 %v5880_v54 }
 0xa24   : > { %4609 = vmatpush1.bf16.msra.mxu1 %v5878_v49 }
 0xa25   : > { %5250 = vmatprep.subr.msk.bf16.mxu1 %vm1555_vm0, %v5249_v16 }
 0xa28   : > { %4611 = vmatpush1.bf16.msra.mxu1 %v4601_v23 }
 0xa29   : > { %4681 = vmatprep.subr.bf16.mxu1 %v5885_v36 }
 0xaf2   : > { %v4562_v1 = vpop.f32.mrb[32].mxu1 }
 0xaf3   : > { %v4563_v15 = vadd.f32 %v4562_v1, %v4520_v14  ;;  %v5370_v38 = vpop.f32.mrb[33].mxu1 }
 0xaf4   : > { %v4565_v28 = vpop.f32.mrb[34].mxu1 }
 0xaf5   : > { %v4568_v17 = vmax.f32 %v4563_v15, 0.0  ;;  %v5371_v20 = vpop.f32.mrb[35].mxu1 }
 0xaf7   : > { %v4569_v6 = vpack.c.bf16 %v4568_v17, %v4568_v17 }
 0xaf9   : > { %v4571_v3 = vrot.slane %v4569_v6, 2 }
 0xafb   : > { %5251 = vmatmul.mubr.msk.bf16.vlgmr.msra.gmra.mrb[28].mxu1 %vm2761_vm10, %v4571_v3 }
 0xafc   : > { %4682 = vmatpush1.bf16.msra.mxu1 %v5883_v8  ;;  %4713 = vmatprep.mubr.bf16.mxu1 %v5941_v0 }
 0xafd   : > { %4683 = vmatprep.subr.bf16.mxu1 %v5888_v9 }
 0xb00   : > { %4684 = vmatpush1.bf16.msra.mxu1 %v5886_v26 }
 0xb01   : > { %5258 = vmatprep.subr.msk.bf16.mxu1 %vm1555_vm0, %v5257_v21 }
 0xb04   : > { %4686 = vmatpush1.bf16.msra.mxu1 %v4676_v53 }
 0xb07   : > { %5259 = vmatmul.mubr.msk.bf16.vlgmr.msra.gmra.mrb[28].mxu1 %vm2761_vm10, %v4569_v6 }
 0xbda   : > { %v4715_v61 = vpop.f32.mrb[28].mxu1 }
 0xbdb   : > { %v5374_v34 = vadd.f32 %v4715_v61, %v6815_v47  ;;  %v4717_v5 = vpop.f32.mrb[29].mxu1 }
 0xbdc   : > { %v5375_v39 = vadd.f32 %v4717_v5, %v6817_v48  ;;  %v4719_v40 = vpop.f32.mrb[30].mxu1 }
 0xbdd   : > { %v4726_v0 = vpack.c.bf16 %v5374_v34, %v5374_v34  ;;  %v4720_v42 = vpop.f32.mrb[31].mxu1 }
 0xbde   : > { %v4727_v43 = vpack.c.bf16 %v5375_v39, %v5375_v39 }
 0xbdf   : > { %v4732_v44 = vsel %vm2669_vm12, %v4726_v0, 0 }
 0xbe0   : > { %5260 = vmatprep.subr.msk.bf16.mxu0 %vm2669_vm12, %v4727_v43 }
 0xbe1   : > { %4738 = vmatpush1.bf16.msra.mxu0 %v4732_v44 }
 0xbe4   : > { %5261 = vmatmul.mubr.msk.bf16.vlgmr.msra.gmra.mrb[40].mxu0 %vm2893_vm15, %v3137_v41 }
 0xcb7   : > { %v4771_v47 = vpop.f32.mrb[40].mxu0 }
 0xcb8   : > { %v4772_v19 = vadd.f32 %v4771_v47, %v6888_v24  ;;  %v4773_v48 = vpop.f32.mrb[41].mxu0 }
 0xcb9   : > { %v4774_v31 = vadd.f32 %v4773_v48, %v6890_v7  ;;  %v4775_v27 = vpop.f32.mrb[42].mxu0 }
 0xcba   : > { %v4783_v46 = vadd.f32 %v4781_v18, %v4772_v19  ;;  %v4776_v50 = vpop.f32.mrb[43].mxu0 }
 0xcbb   : > { %v4784_v51 = vadd.f32 %v4781_v18, %v4774_v31 }
 0xcbc   : > { %v4785_v52 = vmax.f32 %v4783_v46, 0.0 }
 0xcbd   : > { %v4786_v55 = vmax.f32 %v4784_v51, 0.0 }
 0xcbe   : > { %v4791_v37 = vadd.f32 %v5899_v56, %v4785_v52 }
 0xcbf   : > { %v4792_v25 = vadd.f32 %v5900_v35, %v4786_v55 }
 0xcc0   : > { %4793 = vst [vmem:[%s1019_s7] sm:$0xff] %v4791_v37 }
 0xcc1   : > { %4794 = vst [vmem:[%s1019_s7 + $0x8] sm:$0xff] %v4792_v25 }
 0xcc2 PF: > { %s76_s28 = sadd.s32 1, %s5907_s28  }
 0xcc3   : > { %p73_p4 = scmp.ge.s32.totalorder %s76_s28, 4  }
 0xcc5   :  { %75 = sbr.rel (!%p73_p4) target bundleno = 55 (0x37), region = 221 }

</bundles_post_ra>
